<compile_context>
chip_gen: v6e
topology: v6e:2x2x1
jax: 0.10.0
libtpu: 0.0.40
codegen_flags: <defaults>
</compile_context>

<pallas_src>
import jax
import jax.numpy as jnp
import numpy as np
from jax.experimental import pallas as pl
from jax.experimental.pallas import tpu as pltpu

VIEWPE = 6
IN_CHANEL = 4
FEATURE_C = 128
IDE_C = 2 * VIEWPE * 3 + 14                 # 50-wide directional encoding
IN_MLPC = IN_CHANEL * 2 + 3 + IDE_C         # 61 (matches the PyTorch module)
RAW_C = IN_CHANEL * 2 + 3 + 1               # 12-wide raw stream fed to the kernel
TILE_N = 1024                               # points per grid step

assert IN_MLPC == 61 and RAW_C == 12


def _softplus(x):
    # torch.nn.Softplus() (beta=1) == log(1 + exp(x)); threshold=20 linearization
    # is numerically irrelevant in f32 for this input range.
    return jnp.logaddexp(x, 0.0)


def _build_ide_constants(key):
    """Constants for a roughness-attenuated directional encoding of width 50.

    # TODO(synk): generate_ide_fn's source was not provided; this synthesizes a
    # deterministic integrated directional encoding with the exact width implied
    # by in_mlpC (2*viewpe*3 + 14 = 50): squashed linear "phases" of the view
    # direction, attenuated by exp(-0.5 * roughness * kappa) per frequency band.
    # It uses only matmul / tanh / exp so it fuses cleanly into the TPU kernel.
    """
    proj7 = np.asarray(jax.random.normal(key, (3, 7), jnp.float32))
    half = IDE_C // 2                                   # 25
    a_half = np.zeros((3, half), np.float32)
    kappa_half = np.zeros((half,), np.float32)
    for i in range(VIEWPE):
        a_half[:, 3 * i:3 * i + 3] = (2.0 ** i) * np.eye(3, dtype=np.float32)
        kappa_half[3 * i:3 * i + 3] = 4.0 ** i
    a_half[:, 3 * VIEWPE:] = proj7                      # last 7 columns
    kappa_half[3 * VIEWPE:] = 4.0
    a_full = np.concatenate([a_half, a_half], axis=1)                       # (3, 50)
    off = np.concatenate([np.zeros((half,), np.float32),
                          np.full((half,), 0.5 * np.pi, np.float32)])[None]  # (1, 50)
    negkappa = (-0.5 * np.concatenate([kappa_half, kappa_half]))[None]       # (1, 50)
    return jnp.asarray(a_full), jnp.asarray(off), jnp.asarray(negkappa)


def mlp_kernel(raw_ref, pa_ref, ka_ref, off_ref, w1a_ref, w1b_ref, b1_ref,
               w2_ref, b2_ref, w3_ref, o_ref):
    raw = raw_ref[...]                                   # (T, 12) f32

    # ---- fused feature prep (VPU/EUP; f32) ----
    # phase = viewdirs @ A + off   (PA selects the viewdir rows of raw)
    phase = jnp.dot(raw, pa_ref[...], preferred_element_type=jnp.float32) + off_ref[...]
    # log-attenuation = roughness * (-0.5 * kappa)   (KA selects the roughness row)
    atten = jnp.exp(jnp.dot(raw, ka_ref[...], preferred_element_type=jnp.float32))
    ide = jnp.tanh(phase) * atten                        # (T, 50) f32

    # ---- layer 1: x @ W1 == raw @ W1a + ide @ W1b (no in-kernel concat) ----
    h = (jnp.dot(raw.astype(jnp.bfloat16), w1a_ref[...],
                 preferred_element_type=jnp.float32)
         + jnp.dot(ide.astype(jnp.bfloat16), w1b_ref[...],
                   preferred_element_type=jnp.float32)
         + b1_ref[...])
    h = jnp.maximum(h, 0.0)                              # ReLU (f32)

    # ---- layer 2 ----
    h = jnp.dot(h.astype(jnp.bfloat16), w2_ref[...],
                preferred_element_type=jnp.float32) + b2_ref[...]
    h = jnp.maximum(h, 0.0)                              # ReLU (f32)

    # ---- layer 3 (no bias) + final tanh ----
    out = jnp.dot(h.astype(jnp.bfloat16), w3_ref[...],
                  preferred_element_type=jnp.float32)
    o_ref[...] = jnp.tanh(out)


def mlp_render_fea_forward(params, pts, roughness, viewdirs, brdf, local_light):
    del pts  # forward() argument, unused by the module
    # cheap narrow elementwise prep fuses into a single XLA op producing the
    # 12-wide raw stream; everything wider happens inside the kernel.
    raw = jnp.concatenate(
        [jnp.tanh(brdf), jnp.tanh(local_light), viewdirs,
         _softplus(roughness - 1.0)], axis=-1).astype(jnp.float32)    # (N, 12)
    n = raw.shape[0]
    n_pad = pl.cdiv(n, TILE_N) * TILE_N
    if n_pad != n:
        raw = jnp.pad(raw, ((0, n_pad - n), (0, 0)))     # zero rows pass harmlessly

    flops = 2 * n_pad * (2 * RAW_C * IDE_C + RAW_C * FEATURE_C + IDE_C * FEATURE_C
                         + FEATURE_C * FEATURE_C + FEATURE_C * 3)
    transcendentals = n_pad * (2 * IDE_C + 3)
    const_bytes = (2 * RAW_C * IDE_C * 4 + IDE_C * 4
                   + (RAW_C + IDE_C + FEATURE_C) * FEATURE_C * 2 + FEATURE_C * 3 * 2
                   + 2 * FEATURE_C * 4)
    bytes_accessed = n_pad * (RAW_C * 4 + 3 * 4) + const_bytes

    out = pl.pallas_call(
        mlp_kernel,
        out_shape=jax.ShapeDtypeStruct((n_pad, 3), jnp.float32),
        grid_spec=pltpu.PrefetchScalarGridSpec(
            num_scalar_prefetch=0,
            grid=(n_pad // TILE_N,),
            in_specs=[
                pl.BlockSpec((TILE_N, RAW_C), lambda i: (i, 0)),          # raw stream
                pl.BlockSpec((RAW_C, IDE_C), lambda i: (0, 0)),           # PA (f32)
                pl.BlockSpec((RAW_C, IDE_C), lambda i: (0, 0)),           # KA (f32)
                pl.BlockSpec((1, IDE_C), lambda i: (0, 0)),               # phase offset
                pl.BlockSpec((RAW_C, FEATURE_C), lambda i: (0, 0)),       # W1a (bf16)
                pl.BlockSpec((IDE_C, FEATURE_C), lambda i: (0, 0)),       # W1b (bf16)
                pl.BlockSpec((1, FEATURE_C), lambda i: (0, 0)),           # b1 (f32)
                pl.BlockSpec((FEATURE_C, FEATURE_C), lambda i: (0, 0)),   # W2 (bf16)
                pl.BlockSpec((1, FEATURE_C), lambda i: (0, 0)),           # b2 (f32)
                pl.BlockSpec((FEATURE_C, 3), lambda i: (0, 0)),           # W3 (bf16)
            ],
            out_specs=pl.BlockSpec((TILE_N, 3), lambda i: (i, 0)),
        ),
        compiler_params=pltpu.CompilerParams(
            dimension_semantics=("parallel",),
            vmem_limit_bytes=32 * 1024 * 1024),
        cost_estimate=pl.CostEstimate(
            flops=flops, transcendentals=transcendentals,
            bytes_accessed=bytes_accessed),
    )(raw, params["pa"], params["ka"], params["off"], params["w1a"],
      params["w1b"], params["b1"], params["w2"], params["b2"], params["w3"])
    return out[:n], None


def reference_forward(params, pts, roughness, viewdirs, brdf, local_light):
    """Pure-JAX f32 reference of the same forward pass (correctness check)."""
    del pts
    rough = _softplus(roughness - 1.0)
    phase = viewdirs @ params["a_full"] + params["off"]
    ide = jnp.tanh(phase) * jnp.exp(rough * params["negkappa"])
    x = jnp.concatenate([jnp.tanh(brdf), jnp.tanh(local_light), viewdirs, ide], -1)
    assert x.shape[-1] == IN_MLPC
    h = jnp.maximum(x @ params["w1_f32"] + params["b1"], 0.0)
    h = jnp.maximum(h @ params["w2_f32"] + params["b2"], 0.0)
    return jnp.tanh(h @ params["w3_f32"]), None


def init_params(key):
    """Deterministic, PyTorch-Linear-style init (U(-1/sqrt(fan_in), +))."""
    k1, k2, k3, k4, k5, k6 = jax.random.split(key, 6)

    def lin_w(k, fan_in, fan_out):
        bound = 1.0 / np.sqrt(fan_in)
        return jax.random.uniform(k, (fan_in, fan_out), jnp.float32, -bound, bound)

    w1 = lin_w(k1, IN_MLPC, FEATURE_C)                           # (61, 128)
    b1 = jax.random.uniform(k2, (1, FEATURE_C), jnp.float32,
                            -1.0 / np.sqrt(IN_MLPC), 1.0 / np.sqrt(IN_MLPC))
    w2 = lin_w(k3, FEATURE_C, FEATURE_C)
    b2 = jax.random.uniform(k4, (1, FEATURE_C), jnp.float32,
                            -1.0 / np.sqrt(FEATURE_C), 1.0 / np.sqrt(FEATURE_C))
    w3 = lin_w(k5, FEATURE_C, 3)                                 # Linear(featureC,3,bias=False)

    a_full, off, negkappa = _build_ide_constants(k6)

    n_raw = IN_CHANEL * 2 + 3                                    # 11 true MLP inputs in raw
    # PA: selects the viewdir columns of raw and applies the IDE phase matrix.
    pa = np.zeros((RAW_C, IDE_C), np.float32)
    pa[n_raw - 3:n_raw, :] = np.asarray(a_full)
    # KA: selects the roughness column and applies -0.5*kappa.
    ka = np.zeros((RAW_C, IDE_C), np.float32)
    ka[RAW_C - 1, :] = np.asarray(negkappa)[0]

    # Split W1: rows 0:11 act on the raw stream (roughness row zeroed so the raw
    # stream's extra column contributes nothing), rows 11:61 act on the IDE block.
    w1a = jnp.concatenate([w1[:n_raw], jnp.zeros((1, FEATURE_C), jnp.float32)], axis=0)
    w1b = w1[n_raw:]

    return dict(
        # kernel-side: bf16 MXU operands, f32 biases / IDE constants
        pa=jnp.asarray(pa), ka=jnp.asarray(ka), off=off,
        w1a=w1a.astype(jnp.bfloat16), w1b=w1b.astype(jnp.bfloat16),
        w2=w2.astype(jnp.bfloat16), w3=w3.astype(jnp.bfloat16),
        b1=b1, b2=b2,
        # f32 originals for the pure-JAX reference
        w1_f32=w1, w2_f32=w2, w3_f32=w3,
        a_full=a_full, negkappa=negkappa)


if __name__ == "__main__":
    key = jax.random.PRNGKey(0)
    kparams, kin = jax.random.split(key)
    params = init_params(kparams)

    N = 2000  # not a TILE_N multiple: exercises tail padding; grid = 2 (both v7x TCs busy)
    k1, k2, k3, k4, k5 = jax.random.split(kin, 5)
    pts = jax.random.normal(k1, (N, 3), jnp.float32)
    roughness = jax.random.uniform(k2, (N, 1), jnp.float32)
    viewdirs = jax.random.normal(k3, (N, 3), jnp.float32)
    viewdirs = viewdirs / jnp.linalg.norm(viewdirs, axis=-1, keepdims=True)
    brdf = jax.random.normal(k4, (N, IN_CHANEL), jnp.float32)
    local_light = jax.random.normal(k5, (N, IN_CHANEL), jnp.float32)

    spec_color, aux = mlp_render_fea_forward(
        params, pts, roughness, viewdirs, brdf, local_light)
    spec_color = jax.block_until_ready(spec_color)

    ref, _ = reference_forward(params, pts, roughness, viewdirs, brdf, local_light)
    assert aux is None
    assert spec_color.shape == (N, 3)
    err = float(np.max(np.abs(np.asarray(spec_color) - np.asarray(ref))))
    # bf16 MXU operands vs f32 reference -> loosened tolerance (review note).
    assert err < 3e-2, f"max abs err {err}"
    print("KERNEL_OK")
</pallas_src>

<mosaic_0001>
module attributes {stable_mosaic.version = 11 : i64} {
  func.func @mlp_kernel(%arg0: i32, %arg1: memref<1024x12xf32, #tpu.memory_space<vmem>>, %arg2: memref<12x50xf32, #tpu.memory_space<vmem>>, %arg3: memref<12x50xf32, #tpu.memory_space<vmem>>, %arg4: memref<1x50xf32, #tpu.memory_space<vmem>>, %arg5: memref<12x128xbf16, #tpu.memory_space<vmem>>, %arg6: memref<50x128xbf16, #tpu.memory_space<vmem>>, %arg7: memref<1x128xf32, #tpu.memory_space<vmem>>, %arg8: memref<128x128xbf16, #tpu.memory_space<vmem>>, %arg9: memref<1x128xf32, #tpu.memory_space<vmem>>, %arg10: memref<128x3xbf16, #tpu.memory_space<vmem>>, %arg11: memref<1024x3xf32, #tpu.memory_space<vmem>>) attributes {dimension_semantics = [#tpu.dimension_semantics<parallel>], iteration_bounds = array<i64: 2>, scalar_prefetch = 0 : i64, scratch_operands = 0 : i64, tpu.core_type = #tpu.core_type<tc>, window_params = [{transform_indices = @transform_0, window_bounds = array<i64: 1024, 12>}, {pipeline_mode = #tpu.pipeline_mode<synchronous>, transform_indices = @transform_1, window_bounds = array<i64: 12, 50>}, {pipeline_mode = #tpu.pipeline_mode<synchronous>, transform_indices = @transform_2, window_bounds = array<i64: 12, 50>}, {pipeline_mode = #tpu.pipeline_mode<synchronous>, transform_indices = @transform_3, window_bounds = array<i64: 1, 50>}, {pipeline_mode = #tpu.pipeline_mode<synchronous>, transform_indices = @transform_4, window_bounds = array<i64: 12, 128>}, {pipeline_mode = #tpu.pipeline_mode<synchronous>, transform_indices = @transform_5, window_bounds = array<i64: 50, 128>}, {pipeline_mode = #tpu.pipeline_mode<synchronous>, transform_indices = @transform_6, window_bounds = array<i64: 1, 128>}, {pipeline_mode = #tpu.pipeline_mode<synchronous>, transform_indices = @transform_7, window_bounds = array<i64: 128, 128>}, {pipeline_mode = #tpu.pipeline_mode<synchronous>, transform_indices = @transform_8, window_bounds = array<i64: 1, 128>}, {pipeline_mode = #tpu.pipeline_mode<synchronous>, transform_indices = @transform_9, window_bounds = array<i64: 128, 3>}, {transform_indices = @transform_10, window_bounds = array<i64: 1024, 3>}]} {
    %c0 = arith.constant 0 : index
    %c0_0 = arith.constant 0 : index
    %0 = vector.load %arg1[%c0, %c0_0] : memref<1024x12xf32, #tpu.memory_space<vmem>>, vector<1024x12xf32>
    %c0_1 = arith.constant 0 : index
    %c0_2 = arith.constant 0 : index
    %1 = vector.load %arg2[%c0_1, %c0_2] : memref<12x50xf32, #tpu.memory_space<vmem>>, vector<12x50xf32>
    %cst = arith.constant dense<0.000000e+00> : vector<1024x50xf32>
    %2 = tpu.matmul %0, %1, %cst {dimension_numbers = #tpu.dot_dimension_numbers<[1], [0], [0], [1], [0, 0, 1, 1], [], []>} : vector<1024x12xf32>, vector<12x50xf32>, vector<1024x50xf32> -> vector<1024x50xf32>
    %c0_3 = arith.constant 0 : index
    %c0_4 = arith.constant 0 : index
    %3 = vector.load %arg4[%c0_3, %c0_4] : memref<1x50xf32, #tpu.memory_space<vmem>>, vector<1x50xf32>
    %4 = vector.broadcast %3 : vector<1x50xf32> to vector<1024x50xf32>
    %5 = arith.addf %2, %4 : vector<1024x50xf32>
    %c0_5 = arith.constant 0 : index
    %c0_6 = arith.constant 0 : index
    %6 = vector.load %arg3[%c0_5, %c0_6] : memref<12x50xf32, #tpu.memory_space<vmem>>, vector<12x50xf32>
    %cst_7 = arith.constant dense<0.000000e+00> : vector<1024x50xf32>
    %7 = tpu.matmul %0, %6, %cst_7 {dimension_numbers = #tpu.dot_dimension_numbers<[1], [0], [0], [1], [0, 0, 1, 1], [], []>} : vector<1024x12xf32>, vector<12x50xf32>, vector<1024x50xf32> -> vector<1024x50xf32>
    %8 = math.exp %7 : vector<1024x50xf32>
    %9 = math.tanh %5 : vector<1024x50xf32>
    %10 = arith.mulf %9, %8 : vector<1024x50xf32>
    %11 = arith.truncf %0 : vector<1024x12xf32> to vector<1024x12xbf16>
    %c0_8 = arith.constant 0 : index
    %c0_9 = arith.constant 0 : index
    %12 = vector.load %arg5[%c0_8, %c0_9] : memref<12x128xbf16, #tpu.memory_space<vmem>>, vector<12x128xbf16>
    %cst_10 = arith.constant dense<0.000000e+00> : vector<1024x128xf32>
    %13 = tpu.matmul %11, %12, %cst_10 {dimension_numbers = #tpu.dot_dimension_numbers<[1], [0], [0], [1], [0, 0, 1, 1], [], []>} : vector<1024x12xbf16>, vector<12x128xbf16>, vector<1024x128xf32> -> vector<1024x128xf32>
    %14 = arith.truncf %10 : vector<1024x50xf32> to vector<1024x50xbf16>
    %c0_11 = arith.constant 0 : index
    %c0_12 = arith.constant 0 : index
    %15 = vector.load %arg6[%c0_11, %c0_12] : memref<50x128xbf16, #tpu.memory_space<vmem>>, vector<50x128xbf16>
    %cst_13 = arith.constant dense<0.000000e+00> : vector<1024x128xf32>
    %16 = tpu.matmul %14, %15, %cst_13 {dimension_numbers = #tpu.dot_dimension_numbers<[1], [0], [0], [1], [0, 0, 1, 1], [], []>} : vector<1024x50xbf16>, vector<50x128xbf16>, vector<1024x128xf32> -> vector<1024x128xf32>
    %17 = arith.addf %13, %16 : vector<1024x128xf32>
    %c0_14 = arith.constant 0 : index
    %c0_15 = arith.constant 0 : index
    %18 = vector.load %arg7[%c0_14, %c0_15] : memref<1x128xf32, #tpu.memory_space<vmem>>, vector<1x128xf32>
    %19 = vector.broadcast %18 : vector<1x128xf32> to vector<1024x128xf32>
    %20 = arith.addf %17, %19 : vector<1024x128xf32>
    %cst_16 = arith.constant 0.000000e+00 : f32
    %21 = vector.broadcast %cst_16 : f32 to vector<1024x128xf32>
    %22 = arith.maximumf %20, %21 : vector<1024x128xf32>
    %23 = arith.truncf %22 : vector<1024x128xf32> to vector<1024x128xbf16>
    %c0_17 = arith.constant 0 : index
    %c0_18 = arith.constant 0 : index
    %24 = vector.load %arg8[%c0_17, %c0_18] : memref<128x128xbf16, #tpu.memory_space<vmem>>, vector<128x128xbf16>
    %cst_19 = arith.constant dense<0.000000e+00> : vector<1024x128xf32>
    %25 = tpu.matmul %23, %24, %cst_19 {dimension_numbers = #tpu.dot_dimension_numbers<[1], [0], [0], [1], [0, 0, 1, 1], [], []>} : vector<1024x128xbf16>, vector<128x128xbf16>, vector<1024x128xf32> -> vector<1024x128xf32>
    %c0_20 = arith.constant 0 : index
    %c0_21 = arith.constant 0 : index
    %26 = vector.load %arg9[%c0_20, %c0_21] : memref<1x128xf32, #tpu.memory_space<vmem>>, vector<1x128xf32>
    %27 = vector.broadcast %26 : vector<1x128xf32> to vector<1024x128xf32>
    %28 = arith.addf %25, %27 : vector<1024x128xf32>
    %cst_22 = arith.constant 0.000000e+00 : f32
    %29 = vector.broadcast %cst_22 : f32 to vector<1024x128xf32>
    %30 = arith.maximumf %28, %29 : vector<1024x128xf32>
    %31 = arith.truncf %30 : vector<1024x128xf32> to vector<1024x128xbf16>
    %c0_23 = arith.constant 0 : index
    %c0_24 = arith.constant 0 : index
    %32 = vector.load %arg10[%c0_23, %c0_24] : memref<128x3xbf16, #tpu.memory_space<vmem>>, vector<128x3xbf16>
    %cst_25 = arith.constant dense<0.000000e+00> : vector<1024x3xf32>
    %33 = tpu.matmul %31, %32, %cst_25 {dimension_numbers = #tpu.dot_dimension_numbers<[1], [0], [0], [1], [0, 0, 1, 1], [], []>} : vector<1024x128xbf16>, vector<128x3xbf16>, vector<1024x3xf32> -> vector<1024x3xf32>
    %34 = math.tanh %33 : vector<1024x3xf32>
    %c0_26 = arith.constant 0 : index
    %c0_27 = arith.constant 0 : index
    %35 = vector.load %arg11[%c0_26, %c0_27] : memref<1024x3xf32, #tpu.memory_space<vmem>>, vector<1024x3xf32>
    tpu.vector_store %arg11[%c0_26, %c0_27], %34 {strides = array<i32>} : memref<1024x3xf32, #tpu.memory_space<vmem>>, vector<1024x3xf32>,
    return
  }
  func.func @transform_0(%arg0: i32) -> (i32, i32) {
    %c0_i32 = arith.constant 0 : i32
    %c0_i32_0 = arith.constant 0 : i32
    return %arg0, %c0_i32 : i32, i32
  }
  func.func @transform_1(%arg0: i32) -> (i32, i32) {
    %c0_i32 = arith.constant 0 : i32
    %c0_i32_0 = arith.constant 0 : i32
    %c0_i32_1 = arith.constant 0 : i32
    return %c0_i32, %c0_i32_0 : i32, i32
  }
  func.func @transform_2(%arg0: i32) -> (i32, i32) {
    %c0_i32 = arith.constant 0 : i32
    %c0_i32_0 = arith.constant 0 : i32
    %c0_i32_1 = arith.constant 0 : i32
    return %c0_i32, %c0_i32_0 : i32, i32
  }
  func.func @transform_3(%arg0: i32) -> (i32, i32) {
    %c0_i32 = arith.constant 0 : i32
    %c0_i32_0 = arith.constant 0 : i32
    %c0_i32_1 = arith.constant 0 : i32
    return %c0_i32, %c0_i32_0 : i32, i32
  }
  func.func @transform_4(%arg0: i32) -> (i32, i32) {
    %c0_i32 = arith.constant 0 : i32
    %c0_i32_0 = arith.constant 0 : i32
    %c0_i32_1 = arith.constant 0 : i32
    return %c0_i32, %c0_i32_0 : i32, i32
  }
  func.func @transform_5(%arg0: i32) -> (i32, i32) {
    %c0_i32 = arith.constant 0 : i32
    %c0_i32_0 = arith.constant 0 : i32
    %c0_i32_1 = arith.constant 0 : i32
    return %c0_i32, %c0_i32_0 : i32, i32
  }
  func.func @transform_6(%arg0: i32) -> (i32, i32) {
    %c0_i32 = arith.constant 0 : i32
    %c0_i32_0 = arith.constant 0 : i32
    %c0_i32_1 = arith.constant 0 : i32
    return %c0_i32, %c0_i32_0 : i32, i32
  }
  func.func @transform_7(%arg0: i32) -> (i32, i32) {
    %c0_i32 = arith.constant 0 : i32
    %c0_i32_0 = arith.constant 0 : i32
    %c0_i32_1 = arith.constant 0 : i32
    return %c0_i32, %c0_i32_0 : i32, i32
  }
  func.func @transform_8(%arg0: i32) -> (i32, i32) {
    %c0_i32 = arith.constant 0 : i32
    %c0_i32_0 = arith.constant 0 : i32
    %c0_i32_1 = arith.constant 0 : i32
    return %c0_i32, %c0_i32_0 : i32, i32
  }
  func.func @transform_9(%arg0: i32) -> (i32, i32) {
    %c0_i32 = arith.constant 0 : i32
    %c0_i32_0 = arith.constant 0 : i32
    %c0_i32_1 = arith.constant 0 : i32
    return %c0_i32, %c0_i32_0 : i32, i32
  }
  func.func @transform_10(%arg0: i32) -> (i32, i32) {
    %c0_i32 = arith.constant 0 : i32
    %c0_i32_0 = arith.constant 0 : i32
    return %arg0, %c0_i32 : i32, i32
  }
}

</mosaic_0001>

<bundles_post_ra>
// kernel: tpu_custom_call.1
= control target key start
LH: loop header
LB: loop body
LE: loop exit
PB: predicated region body
PF: predicated region fallthrough
CT: control target
= control target key end

     0   :  { %s9378_s13 = smov 0   ;;  %s12563_s0 = inlined_call_operand.vmem [shape: f32[2048,12], index: 0, kind: input, shape index: {}]   ;;  %s12564_s1 = inlined_call_operand.vmem [shape: f32[12,50], index: 1, kind: input, shape index: {}]   ;;  %s12565_s2 = inlined_call_operand.vmem [shape: f32[12,50], index: 2, kind: input, shape index: {}]   ;;  %s12566_s3 = inlined_call_operand.vmem [shape: f32[1,50], index: 3, kind: input, shape index: {}]   ;;  %s12567_s4 = inlined_call_operand.vmem [shape: bf16[12,128], index: 4, kind: input, shape index: {}]   ;;  %s12568_s5 = inlined_call_operand.vmem [shape: bf16[50,128], index: 5, kind: input, shape index: {}]   ;;  %s12569_s6 = inlined_call_operand.vmem [shape: f32[1,128], index: 6, kind: input, shape index: {}]   ;;  %s12570_s7 = inlined_call_operand.vmem [shape: bf16[128,128], index: 7, kind: input, shape index: {}]   ;;  %s12571_s8 = inlined_call_operand.vmem [shape: f32[1,128], index: 8, kind: input, shape index: {}]   ;;  %s12572_s9 = inlined_call_operand.vmem [shape: bf16[128,3], index: 9, kind: input, shape index: {}]   ;;  %s12573_s10 = inlined_call_operand.vmem [shape: f32[2048,3], index: 10, kind: output, shape index: {}]  }
   0x1 LB: > { %s6520_s14 = sadd.s32 4294967295, %s9321_s13   ;;  %p6524_p0 = scmp.ge.s32.totalorder %s9321_s13, 1  ;;  %s9321_s13 = sphi %s9378_s13, %s20_s13  }
   0x2   : > { %p313_p1 = scmp.lt.s32.totalorder %s9321_s13, 3 }
   0x4   : > { %p314_p2 = pnand %p6524_p0, %p313_p1 }
   0x6   : > { %317 = sbr.rel (%p314_p2) target bundleno = 1200 (0x4b0), region = 60 }
   0xb   : > { %v493_v0 = vld [vmem:[%s12564_s1 + $0x8] sm:$0xf]  ;;  %vm886_vm0 = vcmask 1043456   ;;  %v492_v2 = vld [vmem:[%s12564_s1] sm:$0xff]  ;;  %s6525_s23 = sshll.u32 %s6520_s14, 7  ;;  %vm3168_vm1 = vcmask 1040384  }
   0xc   : > { %v1596_v1 = vld [vmem:[%s12565_s2 + $0x8] sm:$0xf]  ;;  %7478 = vmatprep.subr.msk.mxu0 %vm886_vm0, %v493_v0  ;;  %v1595_v3 = vld [vmem:[%s12565_s2] sm:$0xff]  ;;  %p352_p3 = scmp.lt.s32.totalorder %s6525_s23, 255  ;;  %vm3914_vm2 = vcmask 1045504   ;;  %vm501_vm3 = vcmask 97280  }
   0xd   : > { %7674 = vmatprep.subr.msk.mxu1 %vm886_vm0, %v1596_v1  ;;  %7479 = vmatpush3.msk.msra.mxu0 %vm886_vm0, %v493_v0  ;;  %v8434_v4 = vld [vmem:[%s12568_s5 + $0x18] ss:$0 sps:$4 sm:$0x11]   ;;  %v8435_v5 = vld [vmem:[%s12567_s4] sm:$0x3f]   ;;  %v8436_v6 = vld [vmem:[%s12568_s5 + $0x10] sm:$0xff]  }
   0xe   : > { %7675 = vmatpush3.msk.msra.mxu1 %vm886_vm0, %v1596_v1  ;;  %7480 = vmatprep.subr.mxu0 %v492_v2  ;;  %s12697_s23 = smov (!%p352_p3, %s6525_s23), 255  ;;  %v3170_v9 = vsel %vm3168_vm1, %v8434_v4, 0  ;;  %v3916_v15 = vsel %vm3914_vm2, %v8435_v5, 0  ;;  %v8437_v25 = vld [vmem:[%s12568_s5 + $0x8] sm:$0xff]   ;;  %vm2975_vm4 = vcmask 408576   ;;  %vm6335_vm5 = vcmask 23552  }
   0xf   : > { %7676 = vmatprep.subr.mxu1 %v1595_v3  ;;  %7481 = vmatpush3.msra.mxu0 %v492_v2  ;;  %s6526_s28 = sshll.u32 %s12697_s23, 3 }
  0x10   : > { %7677 = vmatpush3.msra.mxu1 %v1595_v3  ;;  %8424 = vmatprep.subr.msk.bf16.mxu0 %vm3168_vm1, %v8434_v4  ;;  %s9414_s11 = scalar_lea.vmem %s12563_s0, %s6526_s28  ;;  %s12282_s18 = scalar_lea.vmem %s12573_s10, %s6526_s28 }
  0x11   : > { %8425 = vmatprep.subr.msk.bf16.mxu1 %vm3914_vm2, %v8435_v5  ;;  %v9420_v7 = vld [vmem:[%s9414_s11] sm:$0xff]  ;;  %v9423_v8 = vld [vmem:[%s9414_s11 + $0x8] sm:$0xff]  ;;  %v9427_v10 = vld [vmem:[%s9414_s11 + $0x10] sm:$0xff] }
  0x12   : > { %7482 = vmatprep.mubr.msk.f32.mxu0 %vm501_vm3, %v9420_v7  ;;  %7678 = vmatprep.mubr.msk.f32.mxu1 %vm501_vm3, %v9420_v7  ;;  %v9436_v12 = vld [vmem:[%s9414_s11 + $0x18] sm:$0xff]  ;;  %v9439_v13 = vld [vmem:[%s9414_s11 + $0x20] sm:$0xff]  ;;  %v9442_v14 = vld [vmem:[%s9414_s11 + $0x28] sm:$0xff] }
  0x13   : > { %7483 = vmatmul.mubr.msk.f32.vlgmr.msra.gmra.mxu0 %vm501_vm3, %v9423_v8  ;;  %7679 = vmatmul.mubr.msk.f32.vlgmr.msra.gmra.mxu1 %vm501_vm3, %v9423_v8  ;;  %v9454_v18 = vld [vmem:[%s9414_s11 + $0x30] sm:$0xff]  ;;  %v9457_v19 = vld [vmem:[%s9414_s11 + $0x38] sm:$0xff]  ;;  %v9460_v20 = vld [vmem:[%s9414_s11 + $0x40] sm:$0xff] }
  0x14   : > { %7871 = vmatpush3.bf16.msra.mxu0 %v3170_v9  ;;  %7485 = vmatprep.mubr.msk.f32.mxu0 %vm501_vm3, %v9427_v10  ;;  %v9467_v22 = vld [vmem:[%s9414_s11 + $0x48] sm:$0xff]  ;;  %v9470_v23 = vld [vmem:[%s9414_s11 + $0x50] sm:$0xff]  ;;  %v9473_v24 = vld [vmem:[%s9414_s11 + $0x58] sm:$0xff] }
  0x15   : > { %7681 = vmatprep.mubr.msk.f32.mxu1 %vm501_vm3, %v9427_v10  ;;  %v9485_v28 = vld [vmem:[%s9414_s11 + $0x60] sm:$0xff]  ;;  %v9488_v29 = vld [vmem:[%s9414_s11 + $0x68] sm:$0xff]  ;;  %v9491_v30 = vld [vmem:[%s9414_s11 + $0x70] sm:$0xff]  ;;  %8007 = vmatpush3.bf16.msra.mxu1 %v3916_v15 }
  0x16   : > { %12602 = vst [vmem:[#allocation2_spill] sm:$0xff] %v9485_v28  ;;  %12603 = vst [vmem:[#allocation3_spill] sm:$0xff] %v9488_v29  ;;  %v9496_v32 = vld [vmem:[%s9414_s11 + $0x78] sm:$0xff]  ;;  %v9499_v33 = vld [vmem:[%s9414_s11 + $0x80] sm:$0xff]  ;;  %7872 = vmatprep.subr.bf16.mxu0 %v8436_v6 }
  0x17   : > { %12604 = vst [vmem:[#allocation4_spill] sm:$0xff] %v9491_v30  ;;  %12605 = vst [vmem:[#allocation5_spill] sm:$0xff] %v9496_v32  ;;  %v9502_v34 = vld [vmem:[%s9414_s11 + $0x88] sm:$0xff]  ;;  %7486 = vmatmul.mubr.msk.f32.gmra.mxu0 %vm501_vm3, %v9436_v12  ;;  %7682 = vmatmul.mubr.msk.f32.gmra.mxu1 %vm501_vm3, %v9436_v12  ;;  %v9513_v37 = vld [vmem:[%s9414_s11 + $0x90] sm:$0xff] }
  0x18   : > { %12606 = vst [vmem:[#allocation6_spill] sm:$0xff] %v9499_v33  ;;  %12607 = vst [vmem:[#allocation7_spill] sm:$0xff] %v9502_v34  ;;  %v9516_v38 = vld [vmem:[%s9414_s11 + $0x98] sm:$0xff]  ;;  %v9519_v39 = vld [vmem:[%s9414_s11 + $0xa0] sm:$0xff]  ;;  %7488 = vmatprep.mubr.msk.f32.mxu0 %vm501_vm3, %v9439_v13  ;;  %7684 = vmatprep.mubr.msk.f32.mxu1 %vm501_vm3, %v9439_v13 }
  0x19   : > { %12608 = vst [vmem:[#allocation8_spill] sm:$0xff] %v9513_v37  ;;  %12609 = vst [vmem:[#allocation9_spill] sm:$0xff] %v9516_v38  ;;  %v9528_v41 = vld [vmem:[%s9414_s11 + $0xa8] sm:$0xff]  ;;  %v9531_v42 = vld [vmem:[%s9414_s11 + $0xb0] sm:$0xff]  ;;  %7873 = vmatpush3.bf16.msra.mxu0 %v8436_v6 }
  0x1a   : > { %12610 = vst [vmem:[#allocation10_spill] sm:$0xff] %v9519_v39  ;;  %12611 = vst [vmem:[#allocation11_spill] sm:$0xff] %v9528_v41  ;;  %v9534_v43 = vld [vmem:[%s9414_s11 + $0xb8] sm:$0xff]  ;;  %v9541_v46 = vld [vmem:[%s9414_s11 + $0xc0] sm:$0xff]  ;;  %7874 = vmatprep.subr.bf16.mxu0 %v8437_v25 }
  0x1b   : > { %12612 = vst [vmem:[#allocation12_spill] sm:$0xff] %v9531_v42  ;;  %12613 = vst [vmem:[#allocation13_spill] sm:$0xff] %v9534_v43  ;;  %v9544_v47 = vld [vmem:[%s9414_s11 + $0xc8] sm:$0xff]  ;;  %v9547_v48 = vld [vmem:[%s9414_s11 + $0xd0] sm:$0xff]  ;;  %7489 = vmatmul.mubr.msk.f32.gmra.mxu0 %vm501_vm3, %v9442_v14  ;;  %7685 = vmatmul.mubr.msk.f32.gmra.mxu1 %vm501_vm3, %v9442_v14 }
  0x1c   : > { %12614 = vst [vmem:[#allocation14_spill] sm:$0xff] %v9541_v46  ;;  %12615 = vst [vmem:[#allocation15_spill] sm:$0xff] %v9544_v47  ;;  %v9552_v50 = vld [vmem:[%s9414_s11 + $0xd8] sm:$0xff]  ;;  %v9555_v51 = vld [vmem:[%s9414_s11 + $0xe0] sm:$0xff]  ;;  %7491 = vmatprep.mubr.msk.f32.mxu0 %vm501_vm3, %v9454_v18  ;;  %7687 = vmatprep.mubr.msk.f32.mxu1 %vm501_vm3, %v9454_v18 }
  0x1d   : > { %12616 = vst [vmem:[#allocation16_spill] sm:$0xff] %v9547_v48  ;;  %12617 = vst [vmem:[#allocation17_spill] sm:$0xff] %v9552_v50  ;;  %v9558_v52 = vld [vmem:[%s9414_s11 + $0xe8] sm:$0xff]  ;;  %v9569_v55 = vld [vmem:[%s9414_s11 + $0xf0] sm:$0xff]  ;;  %7875 = vmatpush3.bf16.msra.mxu0 %v8437_v25 }
  0x1e   : > { %12618 = vst [vmem:[#allocation18_spill] sm:$0xff] %v9555_v51  ;;  %12619 = vst [vmem:[#allocation19_spill] sm:$0xff] %v9558_v52  ;;  %v9572_v56 = vld [vmem:[%s9414_s11 + $0xf8] sm:$0xff]  ;;  %v9575_v57 = vld [vmem:[%s9414_s11 + $0x100] sm:$0xff] }
  0x1f   : > { %12620 = vst [vmem:[#allocation20_spill] sm:$0xff] %v9569_v55  ;;  %12621 = vst [vmem:[#allocation21_spill] sm:$0xff] %v9572_v56  ;;  %v9584_v59 = vld [vmem:[%s9414_s11 + $0x108] sm:$0xff]  ;;  %v9587_v60 = vld [vmem:[%s9414_s11 + $0x110] sm:$0xff]  ;;  %7492 = vmatmul.mubr.msk.f32.gmra.mxu0 %vm501_vm3, %v9457_v19  ;;  %7688 = vmatmul.mubr.msk.f32.gmra.mxu1 %vm501_vm3, %v9457_v19 }
  0x20   : > { %12622 = vst [vmem:[#allocation22_spill] sm:$0xff] %v9575_v57  ;;  %12623 = vst [vmem:[#allocation23_spill] sm:$0xff] %v9584_v59  ;;  %v9590_v61 = vld [vmem:[%s9414_s11 + $0x118] sm:$0xff]  ;;  %v9597_v0 = vld [vmem:[%s9414_s11 + $0x120] sm:$0xff]  ;;  %7494 = vmatprep.mubr.msk.f32.mxu0 %vm501_vm3, %v9460_v20  ;;  %7690 = vmatprep.mubr.msk.f32.mxu1 %vm501_vm3, %v9460_v20 }
  0x21   : > { %12624 = vst [vmem:[#allocation24_spill] sm:$0xff] %v9587_v60  ;;  %12625 = vst [vmem:[#allocation25_spill] sm:$0xff] %v9590_v61  ;;  %v9600_v1 = vld [vmem:[%s9414_s11 + $0x128] sm:$0xff]  ;;  %v9605_v3 = vld [vmem:[%s9414_s11 + $0x130] sm:$0xff] }
  0x22   : > { %12626 = vst [vmem:[#allocation26_spill] sm:$0xff] %v9597_v0  ;;  %12627 = vst [vmem:[#allocation27_spill] sm:$0xff] %v9600_v1  ;;  %v9608_v4 = vld [vmem:[%s9414_s11 + $0x138] sm:$0xff]  ;;  %v8438_v6 = vld [vmem:[%s12568_s5] sm:$0xff]  }
  0x23   : > { %12628 = vst [vmem:[#allocation28_spill] sm:$0xff] %v9605_v3  ;;  %12629 = vst [vmem:[#allocation29_spill] sm:$0xff] %v9608_v4  ;;  %7495 = vmatmul.mubr.msk.f32.gmra.mxu0 %vm501_vm3, %v9467_v22  ;;  %7691 = vmatmul.mubr.msk.f32.gmra.mxu1 %vm501_vm3, %v9467_v22  ;;  %v404_v9 = vld [vmem:[%s9414_s11 + $0x140] sm:$0xff]  ;;  %v405_v15 = vld [vmem:[%s9414_s11 + $0x148] sm:$0xff] }
  0x24   : > { %7497 = vmatprep.mubr.msk.f32.mxu0 %vm501_vm3, %v9470_v23  ;;  %7693 = vmatprep.mubr.msk.f32.mxu1 %vm501_vm3, %v9470_v23  ;;  %v406_v25 = vld [vmem:[%s9414_s11 + $0x150] sm:$0xff]  ;;  %v408_v5 = vld [vmem:[%s9414_s11 + $0x160] sm:$0xff] }
  0x25   : > { %7876 = vmatprep.subr.bf16.mxu0 %v8438_v6  ;;  %v410_v2 = vld [vmem:[%s9414_s11 + $0x170] sm:$0xff]  ;;  %v464_v58 = vld [vmem:[%s9414_s11 + $0x320] sm:$0xff] }
  0x26   : > { %7877 = vmatpush3.bf16.msra.mxu0 %v8438_v6  ;;  %v407_v6 = vld [vmem:[%s9414_s11 + $0x158] sm:$0xff]  ;;  %v438_v63 = vld [vmem:[%s9414_s11 + $0x250] sm:$0xff]  ;;  %v468_v35 = vld [vmem:[%s9414_s11 + $0x340] sm:$0xff] }
  0x27   : > { %7498 = vmatmul.mubr.msk.f32.gmra.mxu0 %vm501_vm3, %v9473_v24  ;;  %7694 = vmatmul.mubr.msk.f32.gmra.mxu1 %vm501_vm3, %v9473_v24  ;;  %v466_v45 = vld [vmem:[%s9414_s11 + $0x330] sm:$0xff] }
  0x28   : > { %7500 = vmatprep.mubr.msk.f32.mxu0 %vm501_vm3, %v9485_v28  ;;  %7696 = vmatprep.mubr.msk.f32.mxu1 %vm501_vm3, %v9485_v28  ;;  %v470_v21 = vld [vmem:[%s9414_s11 + $0x350] sm:$0xff]  ;;  %v489_v28 = vld [vmem:[%s9414_s11 + $0x3e8] sm:$0xff] }
  0x2b   : > { %7501 = vmatmul.mubr.msk.f32.gmra.mxu0 %vm501_vm3, %v9488_v29  ;;  %7697 = vmatmul.mubr.msk.f32.gmra.mxu1 %vm501_vm3, %v9488_v29 }
  0x2c   : > { %7503 = vmatprep.mubr.msk.f32.mxu0 %vm501_vm3, %v9491_v30  ;;  %7699 = vmatprep.mubr.msk.f32.mxu1 %vm501_vm3, %v9491_v30 }
  0x2f   : > { %7504 = vmatmul.mubr.msk.f32.gmra.mxu0 %vm501_vm3, %v9496_v32  ;;  %7700 = vmatmul.mubr.msk.f32.gmra.mxu1 %vm501_vm3, %v9496_v32 }
  0x30   : > { %7506 = vmatprep.mubr.msk.f32.mxu0 %vm501_vm3, %v9499_v33  ;;  %7702 = vmatprep.mubr.msk.f32.mxu1 %vm501_vm3, %v9499_v33  ;;  %v487_v33 = vld [vmem:[%s9414_s11 + $0x3d8] sm:$0xff] }
  0x33   : > { %7507 = vmatmul.mubr.msk.f32.gmra.mxu0 %vm501_vm3, %v9502_v34  ;;  %7703 = vmatmul.mubr.msk.f32.gmra.mxu1 %vm501_vm3, %v9502_v34 }
  0x34   : > { %7509 = vmatprep.mubr.msk.f32.mxu0 %vm501_vm3, %v9513_v37  ;;  %7705 = vmatprep.mubr.msk.f32.mxu1 %vm501_vm3, %v9513_v37 }
  0x37   : > { %7510 = vmatmul.mubr.msk.f32.gmra.mxu0 %vm501_vm3, %v9516_v38  ;;  %7706 = vmatmul.mubr.msk.f32.gmra.mxu1 %vm501_vm3, %v9516_v38 }
  0x38   : > { %7512 = vmatprep.mubr.msk.f32.mxu0 %vm501_vm3, %v9519_v39  ;;  %7708 = vmatprep.mubr.msk.f32.mxu1 %vm501_vm3, %v9519_v39 }
  0x3b   : > { %7513 = vmatmul.mubr.msk.f32.gmra.mxu0 %vm501_vm3, %v9528_v41  ;;  %7709 = vmatmul.mubr.msk.f32.gmra.mxu1 %vm501_vm3, %v9528_v41  ;;  %v480_v41 = vld [vmem:[%s9414_s11 + $0x3a0] sm:$0xff] }
  0x3c   : > { %7515 = vmatprep.mubr.msk.f32.mxu0 %vm501_vm3, %v9531_v42  ;;  %7711 = vmatprep.mubr.msk.f32.mxu1 %vm501_vm3, %v9531_v42 }
  0x3f   : > { %7516 = vmatmul.mubr.msk.f32.gmra.mxu0 %vm501_vm3, %v9534_v43  ;;  %7712 = vmatmul.mubr.msk.f32.gmra.mxu1 %vm501_vm3, %v9534_v43 }
  0x40   : > { %7518 = vmatprep.mubr.msk.f32.mxu0 %vm501_vm3, %v9541_v46  ;;  %7714 = vmatprep.mubr.msk.f32.mxu1 %vm501_vm3, %v9541_v46  ;;  %v478_v46 = vld [vmem:[%s9414_s11 + $0x390] sm:$0xff] }
  0x43   : > { %7519 = vmatmul.mubr.msk.f32.gmra.mxu0 %vm501_vm3, %v9544_v47  ;;  %7715 = vmatmul.mubr.msk.f32.gmra.mxu1 %vm501_vm3, %v9544_v47 }
  0x44   : > { %7521 = vmatprep.mubr.msk.f32.mxu0 %vm501_vm3, %v9547_v48  ;;  %7717 = vmatprep.mubr.msk.f32.mxu1 %vm501_vm3, %v9547_v48 }
  0x47   : > { %7522 = vmatmul.mubr.msk.f32.gmra.mxu0 %vm501_vm3, %v9552_v50  ;;  %7718 = vmatmul.mubr.msk.f32.gmra.mxu1 %vm501_vm3, %v9552_v50 }
  0x48   : > { %7524 = vmatprep.mubr.msk.f32.mxu0 %vm501_vm3, %v9555_v51  ;;  %7720 = vmatprep.mubr.msk.f32.mxu1 %vm501_vm3, %v9555_v51 }
  0x4b   : > { %7525 = vmatmul.mubr.msk.f32.gmra.mxu0 %vm501_vm3, %v9558_v52  ;;  %7721 = vmatmul.mubr.msk.f32.gmra.mxu1 %vm501_vm3, %v9558_v52 }
  0x4c   : > { %7527 = vmatprep.mubr.msk.f32.mxu0 %vm501_vm3, %v9569_v55  ;;  %7723 = vmatprep.mubr.msk.f32.mxu1 %vm501_vm3, %v9569_v55  ;;  %v476_v55 = vld [vmem:[%s9414_s11 + $0x380] sm:$0xff] }
  0x4f   : > { %7528 = vmatmul.mubr.msk.f32.gmra.mxu0 %vm501_vm3, %v9572_v56  ;;  %7724 = vmatmul.mubr.msk.f32.gmra.mxu1 %vm501_vm3, %v9572_v56  ;;  %v10027_v56 = vld [vmem:[%s12566_s3] ss:$0 sm:$0xff] }
  0x50   : > { %7530 = vmatprep.mubr.msk.f32.mxu0 %vm501_vm3, %v9575_v57  ;;  %7726 = vmatprep.mubr.msk.f32.mxu1 %vm501_vm3, %v9575_v57 }
  0x53   : > { %7531 = vmatmul.mubr.msk.f32.gmra.mxu0 %vm501_vm3, %v9584_v59  ;;  %7727 = vmatmul.mubr.msk.f32.gmra.mxu1 %vm501_vm3, %v9584_v59 }
  0x54   : > { %7533 = vmatprep.mubr.msk.f32.mxu0 %vm501_vm3, %v9587_v60  ;;  %7729 = vmatprep.mubr.msk.f32.mxu1 %vm501_vm3, %v9587_v60  ;;  %v474_v60 = vld [vmem:[%s9414_s11 + $0x370] sm:$0xff] }
  0x57   : > { %7534 = vmatmul.mubr.msk.f32.gmra.mxu0 %vm501_vm3, %v9590_v61  ;;  %7730 = vmatmul.mubr.msk.f32.gmra.mxu1 %vm501_vm3, %v9590_v61 }
  0x58   : > { %7536 = vmatprep.mubr.msk.f32.mxu0 %vm501_vm3, %v9597_v0  ;;  %7732 = vmatprep.mubr.msk.f32.mxu1 %vm501_vm3, %v9597_v0 }
  0x5b   : > { %7537 = vmatmul.mubr.msk.f32.gmra.mxu0 %vm501_vm3, %v9600_v1  ;;  %7733 = vmatmul.mubr.msk.f32.gmra.mxu1 %vm501_vm3, %v9600_v1 }
  0x5c   : > { %7539 = vmatprep.mubr.msk.f32.mxu0 %vm501_vm3, %v9605_v3  ;;  %7735 = vmatprep.mubr.msk.f32.mxu1 %vm501_vm3, %v9605_v3  ;;  %v472_v3 = vld [vmem:[%s9414_s11 + $0x360] sm:$0xff] }
  0x5f   : > { %7540 = vmatmul.mubr.msk.f32.gmra.mxu0 %vm501_vm3, %v9608_v4  ;;  %7736 = vmatmul.mubr.msk.f32.gmra.mxu1 %vm501_vm3, %v9608_v4 }
  0x60   : > { %7542 = vmatprep.mubr.msk.f32.mxu0 %vm501_vm3, %v404_v9  ;;  %7738 = vmatprep.mubr.msk.f32.mxu1 %vm501_vm3, %v404_v9  ;;  %v409_v9 = vld [vmem:[%s9414_s11 + $0x168] sm:$0xff] }
  0x63   : > { %7543 = vmatmul.mubr.msk.f32.gmra.mxu0 %vm501_vm3, %v405_v15  ;;  %7739 = vmatmul.mubr.msk.f32.gmra.mxu1 %vm501_vm3, %v405_v15  ;;  %v411_v15 = vld [vmem:[%s9414_s11 + $0x178] sm:$0xff] }
  0x64   : > { %7545 = vmatprep.mubr.msk.f32.mxu0 %vm501_vm3, %v406_v25  ;;  %7741 = vmatprep.mubr.msk.f32.mxu1 %vm501_vm3, %v406_v25  ;;  %v412_v25 = vld [vmem:[%s9414_s11 + $0x180] sm:$0xff] }
  0x67   : > { %7546 = vmatmul.mubr.msk.f32.gmra.mxu0 %vm501_vm3, %v407_v6  ;;  %7742 = vmatmul.mubr.msk.f32.gmra.mxu1 %vm501_vm3, %v407_v6  ;;  %v414_v6 = vld [vmem:[%s9414_s11 + $0x190] sm:$0xff] }
  0x68   : > { %7548 = vmatprep.mubr.msk.f32.mxu0 %vm501_vm3, %v408_v5  ;;  %7744 = vmatprep.mubr.msk.f32.mxu1 %vm501_vm3, %v408_v5  ;;  %v413_v5 = vld [vmem:[%s9414_s11 + $0x188] sm:$0xff] }
  0x6b   : > { %7549 = vmatmul.mubr.msk.f32.gmra.mxu0 %vm501_vm3, %v409_v9  ;;  %7745 = vmatmul.mubr.msk.f32.gmra.mxu1 %vm501_vm3, %v409_v9  ;;  %v416_v9 = vld [vmem:[%s9414_s11 + $0x1a0] sm:$0xff] }
  0x6c   : > { %7551 = vmatprep.mubr.msk.f32.mxu0 %vm501_vm3, %v410_v2  ;;  %7747 = vmatprep.mubr.msk.f32.mxu1 %vm501_vm3, %v410_v2  ;;  %v415_v2 = vld [vmem:[%s9414_s11 + $0x198] sm:$0xff] }
  0x6f   : > { %7552 = vmatmul.mubr.msk.f32.gmra.mxu0 %vm501_vm3, %v411_v15  ;;  %7748 = vmatmul.mubr.msk.f32.gmra.mxu1 %vm501_vm3, %v411_v15  ;;  %v417_v15 = vld [vmem:[%s9414_s11 + $0x1a8] sm:$0xff] }
  0x70   : > { %7554 = vmatprep.mubr.msk.f32.mxu0 %vm501_vm3, %v412_v25  ;;  %7750 = vmatprep.mubr.msk.f32.mxu1 %vm501_vm3, %v412_v25  ;;  %v418_v25 = vld [vmem:[%s9414_s11 + $0x1b0] sm:$0xff] }
  0x73   : > { %7555 = vmatmul.mubr.msk.f32.gmra.mxu0 %vm501_vm3, %v413_v5  ;;  %7751 = vmatmul.mubr.msk.f32.gmra.mxu1 %vm501_vm3, %v413_v5  ;;  %v419_v5 = vld [vmem:[%s9414_s11 + $0x1b8] sm:$0xff] }
  0x74   : > { %7557 = vmatprep.mubr.msk.f32.mxu0 %vm501_vm3, %v414_v6  ;;  %7753 = vmatprep.mubr.msk.f32.mxu1 %vm501_vm3, %v414_v6  ;;  %v420_v6 = vld [vmem:[%s9414_s11 + $0x1c0] sm:$0xff] }
  0x77   : > { %7558 = vmatmul.mubr.msk.f32.gmra.mxu0 %vm501_vm3, %v415_v2  ;;  %7754 = vmatmul.mubr.msk.f32.gmra.mxu1 %vm501_vm3, %v415_v2  ;;  %v421_v2 = vld [vmem:[%s9414_s11 + $0x1c8] sm:$0xff] }
  0x78   : > { %7560 = vmatprep.mubr.msk.f32.mxu0 %vm501_vm3, %v416_v9  ;;  %7756 = vmatprep.mubr.msk.f32.mxu1 %vm501_vm3, %v416_v9  ;;  %v422_v9 = vld [vmem:[%s9414_s11 + $0x1d0] sm:$0xff] }
  0x7b   : > { %7561 = vmatmul.mubr.msk.f32.gmra.mxu0 %vm501_vm3, %v417_v15  ;;  %7757 = vmatmul.mubr.msk.f32.gmra.mxu1 %vm501_vm3, %v417_v15  ;;  %v423_v15 = vld [vmem:[%s9414_s11 + $0x1d8] sm:$0xff] }
  0x7c   : > { %7563 = vmatprep.mubr.msk.f32.mxu0 %vm501_vm3, %v418_v25  ;;  %7759 = vmatprep.mubr.msk.f32.mxu1 %vm501_vm3, %v418_v25  ;;  %v424_v25 = vld [vmem:[%s9414_s11 + $0x1e0] sm:$0xff] }
  0x7f   : > { %7564 = vmatmul.mubr.msk.f32.gmra.mxu0 %vm501_vm3, %v419_v5  ;;  %7760 = vmatmul.mubr.msk.f32.gmra.mxu1 %vm501_vm3, %v419_v5  ;;  %v425_v5 = vld [vmem:[%s9414_s11 + $0x1e8] sm:$0xff] }
  0x80   : > { %7566 = vmatprep.mubr.msk.f32.mxu0 %vm501_vm3, %v420_v6  ;;  %7762 = vmatprep.mubr.msk.f32.mxu1 %vm501_vm3, %v420_v6  ;;  %v426_v6 = vld [vmem:[%s9414_s11 + $0x1f0] sm:$0xff] }
  0x83   : > { %7567 = vmatmul.mubr.msk.f32.gmra.mxu0 %vm501_vm3, %v421_v2  ;;  %7763 = vmatmul.mubr.msk.f32.gmra.mxu1 %vm501_vm3, %v421_v2  ;;  %v427_v2 = vld [vmem:[%s9414_s11 + $0x1f8] sm:$0xff] }
  0x84   : > { %7569 = vmatprep.mubr.msk.f32.mxu0 %vm501_vm3, %v422_v9  ;;  %7765 = vmatprep.mubr.msk.f32.mxu1 %vm501_vm3, %v422_v9  ;;  %v428_v9 = vld [vmem:[%s9414_s11 + $0x200] sm:$0xff] }
  0x87   : > { %7570 = vmatmul.mubr.msk.f32.gmra.mxu0 %vm501_vm3, %v423_v15  ;;  %7766 = vmatmul.mubr.msk.f32.gmra.mxu1 %vm501_vm3, %v423_v15  ;;  %v429_v15 = vld [vmem:[%s9414_s11 + $0x208] sm:$0xff] }
  0x88   : > { %7572 = vmatprep.mubr.msk.f32.mxu0 %vm501_vm3, %v424_v25  ;;  %7768 = vmatprep.mubr.msk.f32.mxu1 %vm501_vm3, %v424_v25  ;;  %v430_v25 = vld [vmem:[%s9414_s11 + $0x210] sm:$0xff] }
  0x8b   : > { %7573 = vmatmul.mubr.msk.f32.gmra.mxu0 %vm501_vm3, %v425_v5  ;;  %7769 = vmatmul.mubr.msk.f32.gmra.mxu1 %vm501_vm3, %v425_v5  ;;  %v431_v5 = vld [vmem:[%s9414_s11 + $0x218] sm:$0xff] }
  0x8c   : > { %7575 = vmatprep.mubr.msk.f32.mxu0 %vm501_vm3, %v426_v6  ;;  %7771 = vmatprep.mubr.msk.f32.mxu1 %vm501_vm3, %v426_v6  ;;  %v432_v6 = vld [vmem:[%s9414_s11 + $0x220] sm:$0xff] }
  0x8f   : > { %7576 = vmatmul.mubr.msk.f32.gmra.mxu0 %vm501_vm3, %v427_v2  ;;  %7772 = vmatmul.mubr.msk.f32.gmra.mxu1 %vm501_vm3, %v427_v2  ;;  %v9833_v2 = vld [vmem:[%s12570_s7 + $0x38] sm:$0xff]  }
  0x90   : > { %7578 = vmatprep.mubr.msk.f32.mxu0 %vm501_vm3, %v428_v9  ;;  %7774 = vmatprep.mubr.msk.f32.mxu1 %vm501_vm3, %v428_v9  ;;  %v433_v9 = vld [vmem:[%s9414_s11 + $0x228] sm:$0xff] }
  0x91   : > { %8136 = vmatprep.subr.bf16.mxu0 %v9833_v2 }
  0x93   : > { %7579 = vmatmul.mubr.msk.f32.gmra.mxu0 %vm501_vm3, %v429_v15  ;;  %7775 = vmatmul.mubr.msk.f32.gmra.mxu1 %vm501_vm3, %v429_v15  ;;  %v434_v15 = vld [vmem:[%s9414_s11 + $0x230] sm:$0xff] }
  0x94   : > { %7581 = vmatprep.mubr.msk.f32.mxu0 %vm501_vm3, %v430_v25  ;;  %7777 = vmatprep.mubr.msk.f32.mxu1 %vm501_vm3, %v430_v25  ;;  %v435_v25 = vld [vmem:[%s9414_s11 + $0x238] sm:$0xff] }
  0x97   : > { %7582 = vmatmul.mubr.msk.f32.gmra.mxu0 %vm501_vm3, %v431_v5  ;;  %7778 = vmatmul.mubr.msk.f32.gmra.mxu1 %vm501_vm3, %v431_v5  ;;  %v436_v5 = vld [vmem:[%s9414_s11 + $0x240] sm:$0xff] }
  0x98   : > { %7584 = vmatprep.mubr.msk.f32.mxu0 %vm501_vm3, %v432_v6  ;;  %7780 = vmatprep.mubr.msk.f32.mxu1 %vm501_vm3, %v432_v6  ;;  %v437_v6 = vld [vmem:[%s9414_s11 + $0x248] sm:$0xff] }
  0x9b   : > { %7585 = vmatmul.mubr.msk.f32.gmra.mxu0 %vm501_vm3, %v433_v9  ;;  %7781 = vmatmul.mubr.msk.f32.gmra.mxu1 %vm501_vm3, %v433_v9  ;;  %v439_v9 = vld [vmem:[%s9414_s11 + $0x258] sm:$0xff] }
  0x9c   : > { %7587 = vmatprep.mubr.msk.f32.mxu0 %vm501_vm3, %v434_v15  ;;  %7783 = vmatprep.mubr.msk.f32.mxu1 %vm501_vm3, %v434_v15  ;;  %v440_v15 = vld [vmem:[%s9414_s11 + $0x260] sm:$0xff] }
  0x9f   : > { %7588 = vmatmul.mubr.msk.f32.gmra.mxu0 %vm501_vm3, %v435_v25  ;;  %7784 = vmatmul.mubr.msk.f32.gmra.mxu1 %vm501_vm3, %v435_v25  ;;  %v441_v25 = vld [vmem:[%s9414_s11 + $0x268] sm:$0xff] }
  0xa0   : > { %7590 = vmatprep.mubr.msk.f32.mxu0 %vm501_vm3, %v436_v5  ;;  %7786 = vmatprep.mubr.msk.f32.mxu1 %vm501_vm3, %v436_v5  ;;  %v442_v5 = vld [vmem:[%s9414_s11 + $0x270] sm:$0xff] }
  0xa3   : > { %7591 = vmatmul.mubr.msk.f32.gmra.mxu0 %vm501_vm3, %v437_v6  ;;  %7787 = vmatmul.mubr.msk.f32.gmra.mxu1 %vm501_vm3, %v437_v6  ;;  %v444_v6 = vld [vmem:[%s9414_s11 + $0x280] sm:$0xff] }
  0xa4   : > { %7593 = vmatprep.mubr.msk.f32.mxu0 %vm501_vm3, %v438_v63  ;;  %7789 = vmatprep.mubr.msk.f32.mxu1 %vm501_vm3, %v438_v63  ;;  %v443_v63 = vld [vmem:[%s9414_s11 + $0x278] sm:$0xff] }
  0xa7   : > { %7594 = vmatmul.mubr.msk.f32.gmra.mxu0 %vm501_vm3, %v439_v9  ;;  %7790 = vmatmul.mubr.msk.f32.gmra.mxu1 %vm501_vm3, %v439_v9  ;;  %v445_v9 = vld [vmem:[%s9414_s11 + $0x288] sm:$0xff] }
  0xa8   : > { %7596 = vmatprep.mubr.msk.f32.mxu0 %vm501_vm3, %v440_v15  ;;  %7792 = vmatprep.mubr.msk.f32.mxu1 %vm501_vm3, %v440_v15  ;;  %v446_v15 = vld [vmem:[%s9414_s11 + $0x290] sm:$0xff] }
  0xab   : > { %7597 = vmatmul.mubr.msk.f32.gmra.mxu0 %vm501_vm3, %v441_v25  ;;  %7793 = vmatmul.mubr.msk.f32.gmra.mxu1 %vm501_vm3, %v441_v25  ;;  %v447_v25 = vld [vmem:[%s9414_s11 + $0x298] sm:$0xff] }
  0xac   : > { %7599 = vmatprep.mubr.msk.f32.mxu0 %vm501_vm3, %v442_v5  ;;  %7795 = vmatprep.mubr.msk.f32.mxu1 %vm501_vm3, %v442_v5  ;;  %v448_v5 = vld [vmem:[%s9414_s11 + $0x2a0] sm:$0xff] }
  0xaf   : > { %7600 = vmatmul.mubr.msk.f32.gmra.mxu0 %vm501_vm3, %v443_v63  ;;  %7796 = vmatmul.mubr.msk.f32.gmra.mxu1 %vm501_vm3, %v443_v63  ;;  %v449_v63 = vld [vmem:[%s9414_s11 + $0x2a8] sm:$0xff] }
  0xb0   : > { %7602 = vmatprep.mubr.msk.f32.mxu0 %vm501_vm3, %v444_v6  ;;  %7798 = vmatprep.mubr.msk.f32.mxu1 %vm501_vm3, %v444_v6  ;;  %v450_v6 = vld [vmem:[%s9414_s11 + $0x2b0] sm:$0xff] }
  0xb3   : > { %7603 = vmatmul.mubr.msk.f32.gmra.mxu0 %vm501_vm3, %v445_v9  ;;  %7799 = vmatmul.mubr.msk.f32.gmra.mxu1 %vm501_vm3, %v445_v9  ;;  %v451_v9 = vld [vmem:[%s9414_s11 + $0x2b8] sm:$0xff] }
  0xb4   : > { %7605 = vmatprep.mubr.msk.f32.mxu0 %vm501_vm3, %v446_v15  ;;  %7801 = vmatprep.mubr.msk.f32.mxu1 %vm501_vm3, %v446_v15  ;;  %v452_v15 = vld [vmem:[%s9414_s11 + $0x2c0] sm:$0xff] }
  0xb7   : > { %7606 = vmatmul.mubr.msk.f32.gmra.mxu0 %vm501_vm3, %v447_v25  ;;  %7802 = vmatmul.mubr.msk.f32.gmra.mxu1 %vm501_vm3, %v447_v25  ;;  %v453_v25 = vld [vmem:[%s9414_s11 + $0x2c8] sm:$0xff] }
  0xb8   : > { %7608 = vmatprep.mubr.msk.f32.mxu0 %vm501_vm3, %v448_v5  ;;  %7804 = vmatprep.mubr.msk.f32.mxu1 %vm501_vm3, %v448_v5  ;;  %v454_v5 = vld [vmem:[%s9414_s11 + $0x2d0] sm:$0xff] }
  0xbb   : > { %7609 = vmatmul.mubr.msk.f32.gmra.mxu0 %vm501_vm3, %v449_v63  ;;  %7805 = vmatmul.mubr.msk.f32.gmra.mxu1 %vm501_vm3, %v449_v63  ;;  %v455_v63 = vld [vmem:[%s9414_s11 + $0x2d8] sm:$0xff] }
  0xbc   : > { %7611 = vmatprep.mubr.msk.f32.mxu0 %vm501_vm3, %v450_v6  ;;  %7807 = vmatprep.mubr.msk.f32.mxu1 %vm501_vm3, %v450_v6  ;;  %v456_v6 = vld [vmem:[%s9414_s11 + $0x2e0] sm:$0xff] }
  0xbf   : > { %7612 = vmatmul.mubr.msk.f32.gmra.mxu0 %vm501_vm3, %v451_v9  ;;  %7808 = vmatmul.mubr.msk.f32.gmra.mxu1 %vm501_vm3, %v451_v9  ;;  %v457_v9 = vld [vmem:[%s9414_s11 + $0x2e8] sm:$0xff] }
  0xc0   : > { %7614 = vmatprep.mubr.msk.f32.mxu0 %vm501_vm3, %v452_v15  ;;  %7810 = vmatprep.mubr.msk.f32.mxu1 %vm501_vm3, %v452_v15  ;;  %v458_v15 = vld [vmem:[%s9414_s11 + $0x2f0] sm:$0xff] }
  0xc3   : > { %7615 = vmatmul.mubr.msk.f32.gmra.mxu0 %vm501_vm3, %v453_v25  ;;  %7811 = vmatmul.mubr.msk.f32.gmra.mxu1 %vm501_vm3, %v453_v25  ;;  %v459_v25 = vld [vmem:[%s9414_s11 + $0x2f8] sm:$0xff] }
  0xc4   : > { %7617 = vmatprep.mubr.msk.f32.mxu0 %vm501_vm3, %v454_v5  ;;  %7813 = vmatprep.mubr.msk.f32.mxu1 %vm501_vm3, %v454_v5  ;;  %v460_v5 = vld [vmem:[%s9414_s11 + $0x300] sm:$0xff] }
  0xc7   : > { %7618 = vmatmul.mubr.msk.f32.gmra.mxu0 %vm501_vm3, %v455_v63  ;;  %7814 = vmatmul.mubr.msk.f32.gmra.mxu1 %vm501_vm3, %v455_v63  ;;  %v461_v63 = vld [vmem:[%s9414_s11 + $0x308] sm:$0xff] }
  0xc8   : > { %7620 = vmatprep.mubr.msk.f32.mxu0 %vm501_vm3, %v456_v6  ;;  %7816 = vmatprep.mubr.msk.f32.mxu1 %vm501_vm3, %v456_v6  ;;  %v462_v6 = vld [vmem:[%s9414_s11 + $0x310] sm:$0xff] }
  0xcb   : > { %7621 = vmatmul.mubr.msk.f32.gmra.mxu0 %vm501_vm3, %v457_v9  ;;  %7817 = vmatmul.mubr.msk.f32.gmra.mxu1 %vm501_vm3, %v457_v9 }
  0xcc   : > { %7623 = vmatprep.mubr.msk.f32.mxu0 %vm501_vm3, %v458_v15  ;;  %7819 = vmatprep.mubr.msk.f32.mxu1 %vm501_vm3, %v458_v15  ;;  %v463_v15 = vld [vmem:[%s9414_s11 + $0x318] sm:$0xff] }
  0xcf   : > { %7624 = vmatmul.mubr.msk.f32.gmra.mxu0 %vm501_vm3, %v459_v25  ;;  %7820 = vmatmul.mubr.msk.f32.gmra.mxu1 %vm501_vm3, %v459_v25 }
  0xd0   : > { %7626 = vmatprep.mubr.msk.f32.mxu0 %vm501_vm3, %v460_v5  ;;  %7822 = vmatprep.mubr.msk.f32.mxu1 %vm501_vm3, %v460_v5 }
  0xd3   : > { %v9926_v62 = vpop.f32.mrf.mxu0  ;;  %7627 = vmatmul.mubr.msk.f32.gmra.mxu0 %vm501_vm3, %v461_v63  ;;  %v9929_v9 = vpop.f32.mrf.mxu1  ;;  %7823 = vmatmul.mubr.msk.f32.gmra.mxu1 %vm501_vm3, %v461_v63  ;;  %v465_v63 = vld [vmem:[%s9414_s11 + $0x328] sm:$0xff] }
  0xd4   : > { %7629 = vmatprep.mubr.msk.f32.mxu0 %vm501_vm3, %v462_v6  ;;  %7825 = vmatprep.mubr.msk.f32.mxu1 %vm501_vm3, %v462_v6  ;;  %v962_v52 = vadd.f32 %v9926_v62, %v10027_v56  ;;  %v2307_v47 = vmul.f32 1.442695, %v9929_v9  ;;  %v479_v62 = vld [vmem:[%s9414_s11 + $0x398] sm:$0xff] }
  0xd5   : > { %v9935_v25 = vpop.f32.mrf.mxu0  ;;  %v9937_v5 = vpop.f32.mrf.mxu1 }
  0xd6   : > { %v957_v42 = vadd.f32 %v10027_v56, %v9935_v25  ;;  %8455 = vtanh.f32 %v962_v52 }
  0xd7   : > { %v9940_v54 = vpop.f32.mrf.mxu0  ;;  %7630 = vmatmul.mubr.msk.f32.gmra.mxu0 %vm501_vm3, %v463_v15  ;;  %v9943_v53 = vpop.f32.mrf.mxu1  ;;  %7826 = vmatmul.mubr.msk.f32.gmra.mxu1 %vm501_vm3, %v463_v15  ;;  %8457 = vpow2.f32 %v2307_v47 }
  0xd8   : > { %7632 = vmatprep.mubr.msk.f32.mxu0 %vm501_vm3, %v464_v58  ;;  %7828 = vmatprep.mubr.msk.f32.mxu1 %vm501_vm3, %v464_v58  ;;  %v467_v58 = vld [vmem:[%s9414_s11 + $0x338] sm:$0xff]  ;;  %v972_v9 = vadd.f32 %v9940_v54, %v10027_v56  ;;  %8459 = vtanh.f32 %v957_v42  ;;  %v481_v54 = vld [vmem:[%s9414_s11 + $0x3a8] sm:$0xff] }
  0xd9   : > { %v9949_v6 = vpop.f32.mrf.mxu0  ;;  %v9951_v49 = vpop.f32.mrf.mxu1 }
  0xda   : > { %v2309_v52 = vmul.f32 1.442695, %v9951_v49 }
  0xdb   : > { %v9954_v44 = vpop.f32.mrf.mxu0  ;;  %7633 = vmatmul.mubr.msk.f32.gmra.mxu0 %vm501_vm3, %v465_v63  ;;  %v9957_v40 = vpop.f32.mrf.mxu1  ;;  %7829 = vmatmul.mubr.msk.f32.gmra.mxu1 %vm501_vm3, %v465_v63 }
  0xdc   : > { %7635 = vmatprep.mubr.msk.f32.mxu0 %vm501_vm3, %v466_v45  ;;  %7831 = vmatprep.mubr.msk.f32.mxu1 %vm501_vm3, %v466_v45  ;;  %v469_v45 = vld [vmem:[%s9414_s11 + $0x348] sm:$0xff]  ;;  %v982_v49 = vadd.f32 %v9954_v44, %v10027_v56 }
  0xdd   : > { %v9963_v15 = vpop.f32.mrf.mxu0  ;;  %v9965_v36 = vpop.f32.mrf.mxu1 }
  0xde   : > { %v977_v42 = vadd.f32 %v10027_v56, %v9963_v15  ;;  %v2315_v15 = vmul.f32 1.442695, %v9957_v40 }
  0xdf   : > { %v9968_v31 = vpop.f32.mrf.mxu0  ;;  %7636 = vmatmul.mubr.msk.f32.gmra.mxu0 %vm501_vm3, %v467_v58  ;;  %v9971_v27 = vpop.f32.mrf.mxu1  ;;  %7832 = vmatmul.mubr.msk.f32.gmra.mxu1 %vm501_vm3, %v467_v58 }
  0xe0   : > { %7638 = vmatprep.mubr.msk.f32.mxu0 %vm501_vm3, %v468_v35  ;;  %7834 = vmatprep.mubr.msk.f32.mxu1 %vm501_vm3, %v468_v35  ;;  %v471_v35 = vld [vmem:[%s9414_s11 + $0x358] sm:$0xff] }
  0xe1   : > { %v9977_v63 = vpop.f32.mrf.mxu0  ;;  %v9979_v26 = vpop.f32.mrf.mxu1 }
  0xe2   : > { %v987_v40 = vadd.f32 %v10027_v56, %v9977_v63 }
  0xe3   : > { %v9982_v17 = vpop.f32.mrf.mxu0  ;;  %7639 = vmatmul.mubr.msk.f32.gmra.mxu0 %vm501_vm3, %v469_v45  ;;  %v9985_v16 = vpop.f32.mrf.mxu1  ;;  %7835 = vmatmul.mubr.msk.f32.gmra.mxu1 %vm501_vm3, %v469_v45 }
  0xe4   : > { %7641 = vmatprep.mubr.msk.f32.mxu0 %vm501_vm3, %v470_v21  ;;  %7837 = vmatprep.mubr.msk.f32.mxu1 %vm501_vm3, %v470_v21  ;;  %v473_v21 = vld [vmem:[%s9414_s11 + $0x368] sm:$0xff]  ;;  %v8456_v38 = vpop.eup %8455 }
  0xe5   : > { %v9991_v58 = vpop.f32.mrf.mxu0  ;;  %v9993_v11 = vpop.f32.mrf.mxu1 }
  0xe7   : > { %v9996_v4 = vpop.f32.mrf.mxu0  ;;  %7642 = vmatmul.mubr.msk.f32.gmra.mxu0 %vm501_vm3, %v471_v35  ;;  %v9999_v0 = vpop.f32.mrf.mxu1  ;;  %7838 = vmatmul.mubr.msk.f32.gmra.mxu1 %vm501_vm3, %v471_v35 }
  0xe8   : > { %7644 = vmatprep.mubr.msk.f32.mxu0 %vm501_vm3, %v472_v3  ;;  %7840 = vmatprep.mubr.msk.f32.mxu1 %vm501_vm3, %v472_v3  ;;  %v475_v3 = vld [vmem:[%s9414_s11 + $0x378] sm:$0xff] }
  0xe9   : > { %v10005_v45 = vpop.f32.mrf.mxu0  ;;  %v10007_v1 = vpop.f32.mrf.mxu1 }
  0xeb   : > { %v10010_v61 = vpop.f32.mrf.mxu0  ;;  %7645 = vmatmul.mubr.msk.f32.gmra.mxu0 %vm501_vm3, %v473_v21  ;;  %v10013_v57 = vpop.f32.mrf.mxu1  ;;  %7841 = vmatmul.mubr.msk.f32.gmra.mxu1 %vm501_vm3, %v473_v21 }
  0xec   : > { %7647 = vmatprep.mubr.msk.f32.mxu0 %vm501_vm3, %v474_v60  ;;  %7843 = vmatprep.mubr.msk.f32.mxu1 %vm501_vm3, %v474_v60  ;;  %v477_v60 = vld [vmem:[%s9414_s11 + $0x388] sm:$0xff] }
  0xed   : > { %v10019_v35 = vpop.f32.mrf.mxu0  ;;  %v10021_v59 = vpop.f32.mrf.mxu1 }
  0xef   : > { %v10029_v51 = vpop.f32.mrf.mxu0  ;;  %7648 = vmatmul.mubr.msk.f32.gmra.mxu0 %vm501_vm3, %v475_v3  ;;  %v10032_v21 = vpop.f32.mrf.mxu1  ;;  %7844 = vmatmul.mubr.msk.f32.gmra.mxu1 %vm501_vm3, %v475_v3 }
  0xf0   : > { %7650 = vmatprep.mubr.msk.f32.mxu0 %vm501_vm3, %v476_v55  ;;  %7846 = vmatprep.mubr.msk.f32.mxu1 %vm501_vm3, %v476_v55  ;;  %v2305_v55 = vmul.f32 1.442695, %v9937_v5  ;;  %v967_v5 = vadd.f32 %v10027_v56, %v9949_v6  ;;  %v482_v6 = vld [vmem:[%s9414_s11 + $0x3b0] sm:$0xff] }
  0xf1   : > { %v10040_v48 = vpop.f32.mrf.mxu0  ;;  %v10042_v50 = vpop.f32.mrf.mxu1 }
  0xf2   : > { %8461 = vpow2.f32 %v2305_v55  ;;  %v2313_v55 = vmul.f32 1.442695, %v9965_v36  ;;  %v992_v36 = vadd.f32 %v9968_v31, %v10027_v56  ;;  %v2317_v31 = vmul.f32 1.442695, %v9979_v26  ;;  %v8458_v26 = vpop.eup %8457 }
  0xf3   : > { %v10048_v3 = vpop.f32.mrf.mxu0  ;;  %7651 = vmatmul.mubr.msk.f32.gmra.mxu0 %vm501_vm3, %v477_v60  ;;  %v10051_v43 = vpop.f32.mrf.mxu1  ;;  %7847 = vmatmul.mubr.msk.f32.gmra.mxu1 %vm501_vm3, %v477_v60  ;;  %v2311_v60 = vmul.f32 1.442695, %v9943_v53  ;;  %8463 = vtanh.f32 %v972_v9  ;;  %v483_v9 = vld [vmem:[%s9414_s11 + $0x3b8] sm:$0xff] }
  0xf4   : > { %7653 = vmatprep.mubr.msk.f32.mxu0 %vm501_vm3, %v478_v46  ;;  %7849 = vmatprep.mubr.msk.f32.mxu1 %vm501_vm3, %v478_v46 }
  0xf5   : > { %v10060_v25 = vpop.f32.mrf.mxu0  ;;  %v10062_v39 = vpop.f32.mrf.mxu1  ;;  %8465 = vpow2.f32 %v2311_v60 }
  0xf6   : > { %8467 = vtanh.f32 %v967_v5  ;;  %v484_v5 = vld [vmem:[%s9414_s11 + $0x3c0] sm:$0xff] }
  0xf7   : > { %v10068_v37 = vpop.f32.mrf.mxu0  ;;  %7654 = vmatmul.mubr.msk.f32.gmra.mxu0 %vm501_vm3, %v479_v62  ;;  %v10071_v46 = vpop.f32.mrf.mxu1  ;;  %7850 = vmatmul.mubr.msk.f32.gmra.mxu1 %vm501_vm3, %v479_v62  ;;  %8469 = vpow2.f32 %v2309_v52  ;;  %v2319_v52 = vmul.f32 1.442695, %v9971_v27  ;;  %v997_v27 = vadd.f32 %v10027_v56, %v9991_v58 }
  0xf8   : > { %7656 = vmatprep.mubr.msk.f32.mxu0 %vm501_vm3, %v480_v41  ;;  %7852 = vmatprep.mubr.msk.f32.mxu1 %vm501_vm3, %v480_v41  ;;  %8471 = vtanh.f32 %v977_v42 }
  0xf9   : > { %v10080_v47 = vpop.f32.mrf.mxu0  ;;  %v10082_v53 = vpop.f32.mrf.mxu1  ;;  %8473 = vpow2.f32 %v2313_v55 }
  0xfa   : > { %8475 = vtanh.f32 %v982_v49  ;;  %v486_v49 = vld [vmem:[%s9414_s11 + $0x3d0] sm:$0xff] }
  0xfb   : > { %v10088_v62 = vpop.f32.mrf.mxu0  ;;  %7657 = vmatmul.mubr.msk.f32.gmra.mxu0 %vm501_vm3, %v481_v54  ;;  %v10091_v41 = vpop.f32.mrf.mxu1  ;;  %7853 = vmatmul.mubr.msk.f32.gmra.mxu1 %vm501_vm3, %v481_v54  ;;  %8477 = vpow2.f32 %v2315_v15  ;;  %v2321_v15 = vmul.f32 1.442695, %v9993_v11 }
  0xfc   : > { %7659 = vmatprep.mubr.msk.f32.mxu0 %vm501_vm3, %v482_v6  ;;  %7855 = vmatprep.mubr.msk.f32.mxu1 %vm501_vm3, %v482_v6  ;;  %v485_v6 = vld [vmem:[%s9414_s11 + $0x3c8] sm:$0xff]  ;;  %8479 = vtanh.f32 %v992_v36 }
  0xfd   : > { %v10100_v44 = vpop.f32.mrf.mxu0  ;;  %v10102_v60 = vpop.f32.mrf.mxu1  ;;  %8481 = vpow2.f32 %v2319_v52  ;;  %v2323_v52 = vmul.f32 1.442695, %v9985_v16  ;;  %v2327_v16 = vmul.f32 1.442695, %v9999_v0 }
  0xfe   : > { %8483 = vtanh.f32 %v987_v40 }
  0xff   : > { %v10108_v54 = vpop.f32.mrf.mxu0  ;;  %7660 = vmatmul.mubr.msk.f32.gmra.mxu0 %vm501_vm3, %v483_v9  ;;  %v10111_v42 = vpop.f32.mrf.mxu1  ;;  %7856 = vmatmul.mubr.msk.f32.gmra.mxu1 %vm501_vm3, %v483_v9  ;;  %v1002_v9 = vadd.f32 %v9982_v17, %v10027_v56  ;;  %8485 = vpow2.f32 %v2317_v31  ;;  %v1012_v17 = vadd.f32 %v9996_v4, %v10027_v56 }
 0x100   : > { %7662 = vmatprep.mubr.msk.f32.mxu0 %vm501_vm3, %v484_v5  ;;  %7858 = vmatprep.mubr.msk.f32.mxu1 %vm501_vm3, %v484_v5  ;;  %v8460_v5 = vpop.eup %8459  ;;  %8487 = vtanh.f32 %v997_v27 }
 0x101   : > { %v10120_v63 = vpop.f32.mrf.mxu0  ;;  %v10122_v55 = vpop.f32.mrf.mxu1  ;;  %8489 = vpow2.f32 %v2321_v15  ;;  %v2325_v15 = vmul.f32 1.442695, %v10007_v1  ;;  %v2329_v1 = vmul.f32 1.442695, %v10021_v59  ;;  %v2690_v59 = vmul.f32 %v8458_v26, %v8456_v38 }
 0x102   : > { %v8462_v11 = vpop.eup %8461  ;;  %8491 = vtanh.f32 %v1002_v9 }
 0x103   : > { %v10128_v36 = vpop.f32.mrf.mxu0  ;;  %7663 = vmatmul.mubr.msk.f32.gmra.mxu0 %vm501_vm3, %v485_v6  ;;  %v10131_v58 = vpop.f32.mrf.mxu1  ;;  %7859 = vmatmul.mubr.msk.f32.gmra.mxu1 %vm501_vm3, %v485_v6  ;;  %v488_v6 = vld [vmem:[%s9414_s11 + $0x3e0] sm:$0xff]  ;;  %8493 = vpow2.f32 %v2323_v52  ;;  %v2689_v52 = vmul.f32 %v8462_v11, %v8460_v5  ;;  %v1032_v11 = vadd.f32 %v10029_v51, %v10027_v56 }
 0x104   : > { %12630 = vst [vmem:[#allocation30_spill] sm:$0xff] %v10131_v58  ;;  %7665 = vmatprep.mubr.msk.f32.mxu0 %vm501_vm3, %v486_v49  ;;  %7861 = vmatprep.mubr.msk.f32.mxu1 %vm501_vm3, %v486_v49  ;;  %v8464_v30 = vpop.eup %8463  ;;  %v1007_v49 = vadd.f32 %v10027_v56, %v10005_v45  ;;  %8495 = vtanh.f32 %v1012_v17  ;;  %v1017_v45 = vadd.f32 %v10027_v56, %v10019_v35 }
 0x105   : > { %v10140_v40 = vpop.f32.mrf.mxu0  ;;  %v10142_v34 = vpop.f32.mrf.mxu1 }
 0x106   : > { %v8466_v31 = vpop.eup %8465  ;;  %8497 = vpow2.f32 %v2327_v16  ;;  %v2331_v16 = vmul.f32 1.442695, %v10013_v57  ;;  %v2335_v57 = vmul.f32 1.442695, %v10032_v21  ;;  %v2333_v21 = vmul.f32 1.442695, %v10042_v50 }
 0x107   : > { %v10148_v27 = vpop.f32.mrf.mxu0  ;;  %7666 = vmatmul.mubr.msk.f32.gmra.mxu0 %vm501_vm3, %v487_v33  ;;  %v10151_v4 = vpop.f32.mrf.mxu1  ;;  %7862 = vmatmul.mubr.msk.f32.gmra.mxu1 %vm501_vm3, %v487_v33  ;;  %v490_v33 = vld [vmem:[%s9414_s11 + $0x3f0] sm:$0xff] }
 0x108   : > { %12631 = vst [vmem:[#allocation31_spill] sm:$0xff] %v10148_v27  ;;  %12632 = vst [vmem:[#allocation32_spill] sm:$0xff] %v10151_v4  ;;  %v8468_v32 = vpop.eup %8467  ;;  %7668 = vmatprep.mubr.msk.f32.mxu0 %vm501_vm3, %v488_v6  ;;  %7864 = vmatprep.mubr.msk.f32.mxu1 %vm501_vm3, %v488_v6  ;;  %8499 = vtanh.f32 %v1007_v49  ;;  %v1022_v6 = vadd.f32 %v10010_v61, %v10027_v56  ;;  %v8440_v50 = vld [vmem:[%s12570_s7 + $0x30] sm:$0xff]  }
 0x109   : > { %v8470_v0 = vpop.eup %8469  ;;  %v10160_v9 = vpop.f32.mrf.mxu0  ;;  %8501 = vpow2.f32 %v2325_v15  ;;  %v2883_v15 = vpack.c.bf16 %v2690_v59, %v2689_v52 }
 0x10a   : > { %12633 = vst [vmem:[#allocation33_spill] sm:$0xff] %v10160_v9  ;;  %v10162_v27 = vpop.f32.mrf.mxu1  ;;  %v8472_v4 = vpop.eup %8471  ;;  %v491_v9 = vld [vmem:[%s9414_s11 + $0x3f8] sm:$0xff]  ;;  %v2691_v61 = vmul.f32 %v8470_v0, %v8468_v32  ;;  %8503 = vtanh.f32 %v1017_v45  ;;  %v1027_v32 = vadd.f32 %v10027_v56, %v10040_v48 }
 0x10b   : > { %12634 = vst [vmem:[#allocation34_spill] sm:$0xff] %v10162_v27  ;;  %v8474_v29 = vpop.eup %8473  ;;  %v10168_v17 = vpop.f32.mrf.mxu0  ;;  %7669 = vmatmul.mubr.msk.f32.gmra.mxu0 %vm501_vm3, %v489_v28  ;;  %7865 = vmatmul.mubr.msk.f32.gmra.mxu1 %vm501_vm3, %v489_v28  ;;  %8505 = vpow2.f32 %v2329_v1  ;;  %v1042_v1 = vadd.f32 %v10048_v3, %v10027_v56 }
 0x10c   : > { %12635 = vst [vmem:[#allocation35_spill] sm:$0xff] %v10168_v17  ;;  %v10171_v35 = vpop.f32.mrf.mxu1  ;;  %v8476_v27 = vpop.eup %8475  ;;  %7671 = vmatprep.mubr.msk.f32.mxu0 %vm501_vm3, %v490_v33  ;;  %7867 = vmatprep.mubr.msk.f32.mxu1 %vm501_vm3, %v490_v33  ;;  %v2693_v17 = vmul.f32 %v8474_v29, %v8472_v4  ;;  %v2692_v33 = vmul.f32 %v8466_v31, %v8464_v30  ;;  %8507 = vtanh.f32 %v1022_v6 }
 0x10d   : > { %12636 = vst [vmem:[#allocation36_spill] sm:$0xff] %v10171_v35  ;;  %v8478_v5 = vpop.eup %8477  ;;  %v10180_v49 = vpop.f32.mrf.mxu0  ;;  %8509 = vpow2.f32 %v2331_v16  ;;  %v12637_v29 = vpack.c.bf16 %v9423_v8, %v9420_v7  ;;  %v1037_v4 = vadd.f32 %v10027_v56, %v10060_v25  ;;  %v2337_v7 = vmul.f32 1.442695, %v10062_v39 }
 0x10e   : > { %v10182_v35 = vpop.f32.mrf.mxu1  ;;  %v8480_v28 = vpop.eup %8479  ;;  %v2694_v30 = vmul.f32 %v8478_v5, %v8476_v27  ;;  %v2884_v31 = vpack.c.bf16 %v2692_v33, %v2691_v61  ;;  %8511 = vtanh.f32 %v1032_v11  ;;  %v12638_v6 = vpack.c.bf16 %v9436_v12, %v9427_v10 }
 0x10f   : > { %v8482_v58 = vpop.eup %8481  ;;  %v10187_v38 = vpop.f32.mrf.mxu0  ;;  %7672 = vmatmul.mubr.msk.f32.gmra.mxu0 %vm501_vm3, %v491_v9  ;;  %7868 = vmatmul.mubr.msk.f32.gmra.mxu1 %vm501_vm3, %v491_v9  ;;  %8513 = vpow2.f32 %v2335_v57  ;;  %v2339_v39 = vmul.f32 1.442695, %v10051_v43  ;;  %v12639_v10 = vpack.c.bf16 %v9442_v14, %v9439_v13  ;;  %v8441_v43 = vld [vmem:[%s12570_s7 + $0x28] sm:$0xff]   ;;  %v2343_v61 = vmul.f32 1.442695, %v10071_v46 }
 0x110   : > { %v10190_v51 = vpop.f32.mrf.mxu1  ;;  %v8484_v26 = vpop.eup %8483  ;;  %7878 = vmatprep.mubr.msk.bf16.mxu0 %vm2975_vm4, %v2883_v15  ;;  %8008 = vmatprep.mubr.msk.bf16.mxu1 %vm501_vm3, %v12637_v29  ;;  %v2885_v8 = vpack.c.bf16 %v2694_v30, %v2693_v17  ;;  %8515 = vtanh.f32 %v1027_v32  ;;  %v1052_v17 = vadd.f32 %v10068_v37, %v10027_v56  ;;  %v1047_v57 = vadd.f32 %v10027_v56, %v10080_v47 }
 0x111   : > { %v8486_v48 = vpop.eup %8485  ;;  %v10201_v0 = vpop.f32.mrf.mxu0  ;;  %8517 = vpow2.f32 %v2333_v21  ;;  %v2696_v14 = vmul.f32 %v8482_v58, %v8480_v28  ;;  %v2341_v32 = vmul.f32 1.442695, %v10082_v53  ;;  %v1057_v46 = vadd.f32 %v10027_v56, %v10100_v44  ;;  %v8442_v53 = vld [vmem:[%s12570_s7 + $0x20] sm:$0xff]  }
 0x112   : > { %v10203_v45 = vpop.f32.mrf.mxu1  ;;  %v8488_v9 = vpop.eup %8487  ;;  %8519 = vtanh.f32 %v1037_v4  ;;  %v2695_v12 = vmul.f32 %v8486_v48, %v8484_v26  ;;  %v2345_v58 = vmul.f32 1.442695, %v10102_v60  ;;  %v1062_v44 = vadd.f32 %v10088_v62, %v10027_v56 }
 0x113   : > { %v8490_v27 = vpop.eup %8489  ;;  %v10211_v52 = vpop.f32.mrf.mxu0  ;;  %7879 = vmatmul.mubr.msk.bf16.vlgmr.msra.gmra.mxu0 %vm2975_vm4, %v2884_v31  ;;  %8009 = vmatmul.mubr.msk.bf16.vlgmr.msra.gmra.mxu1 %vm501_vm3, %v12638_v6  ;;  %8521 = vpow2.f32 %v2337_v7  ;;  %v2347_v7 = vmul.f32 1.442695, %v10091_v41  ;;  %v12641_v62 = vpack.c.bf16 %v9467_v22, %v9460_v20  ;;  %v2351_v41 = vmul.f32 1.442695, %v10111_v42  ;;  %v8443_v20 = vld [vmem:[%s12570_s7 + $0x18] sm:$0xff]  }
 0x114   : > { %v10213_v25 = vpop.f32.mrf.mxu1  ;;  %v8492_v16 = vpop.eup %8491  ;;  %8137 = vmatpush3.bf16.msra.mxu0 %v9833_v2  ;;  %7882 = vmatprep.mubr.msk.bf16.mxu0 %vm2975_vm4, %v2885_v8  ;;  %v2697_v37 = vmul.f32 %v8490_v27, %v8488_v9  ;;  %8523 = vtanh.f32 %v1042_v1  ;;  %v2886_v47 = vpack.c.bf16 %v2696_v14, %v2695_v12  ;;  %v12640_v9 = vpack.c.bf16 %v9457_v19, %v9454_v18 }
 0x115   : > { %v8494_v3 = vpop.eup %8493  ;;  %v10225_v59 = vpop.f32.mrf.mxu0  ;;  %8012 = vmatprep.mubr.msk.bf16.mxu1 %vm501_vm3, %v12639_v10  ;;  %8138 = vmatprep.subr.bf16.mxu0 %v8440_v50  ;;  %8525 = vpow2.f32 %v2339_v39  ;;  %v1072_v27 = vadd.f32 %v10108_v54, %v10027_v56  ;;  %v1067_v54 = vadd.f32 %v10027_v56, %v10120_v63  ;;  %v2349_v42 = vmul.f32 1.442695, %v10122_v55 }
 0x116   : > { %v10227_v5 = vpop.f32.mrf.mxu1  ;;  %v8496_v2 = vpop.eup %8495  ;;  %v2698_v26 = vmul.f32 %v8494_v3, %v8492_v16  ;;  %8527 = vtanh.f32 %v1052_v17  ;;  %v1082_v55 = vadd.f32 %v10128_v36, %v10027_v56 }
 0x117   : > { %v8498_v11 = vpop.eup %8497  ;;  %v10239_v15 = vpop.f32.mrf.mxu0  ;;  %8529 = vpow2.f32 %v2343_v61  ;;  %v1077_v61 = vadd.f32 %v10027_v56, %v10140_v40 }
 0x118   : > { %v10241_v13 = vpop.f32.mrf.mxu1  ;;  %v8500_v33 = vpop.eup %8499  ;;  %8139 = vmatpush3.bf16.msra.mxu0 %v8440_v50  ;;  %v2887_v28 = vpack.c.bf16 %v2698_v26, %v2697_v37  ;;  %8531 = vtanh.f32 %v1047_v57  ;;  %v2700_v17 = vmul.f32 %v8498_v11, %v8496_v2  ;;  %v2353_v2 = vmul.f32 1.442695, %v10142_v34  ;;  %v12643_v34 = vld [vmem:[#allocation30_spill] sm:$0xff] }
 0x119   : > { %v8502_v21 = vpop.eup %8501  ;;  %v10246_v29 = vpop.f32.mrf.mxu0  ;;  %8140 = vmatprep.subr.bf16.mxu0 %v8441_v43  ;;  %8533 = vpow2.f32 %v2341_v32  ;;  %v12642_v26 = vpack.c.bf16 %v9473_v24, %v9470_v23 }
 0x11a   : > { %v10248_v30 = vpop.f32.mrf.mxu1  ;;  %v8504_v48 = vpop.eup %8503  ;;  %8535 = vtanh.f32 %v1057_v46  ;;  %v2699_v19 = vmul.f32 %v8502_v21, %v8500_v33  ;;  %v2355_v46 = vmul.f32 1.442695, %v12643_v34 }
 0x11b   : > { %v8506_v31 = vpop.eup %8505  ;;  %v10256_v4 = vpop.f32.mrf.mxu0  ;;  %7883 = vmatmul.mubr.msk.bf16.gmra.mxu0 %vm2975_vm4, %v2886_v47  ;;  %8013 = vmatmul.mubr.msk.bf16.gmra.mxu1 %vm501_vm3, %v12640_v9  ;;  %8537 = vpow2.f32 %v2345_v58  ;;  %v12644_v47 = vld [vmem:[#allocation3_spill] sm:$0xff]  ;;  %v12648_v9 = vld [vmem:[#allocation32_spill] sm:$0xff] }
 0x11c   : > { %v10258_v50 = vpop.f32.mrf.mxu1  ;;  %v8508_v60 = vpop.eup %8507  ;;  %7886 = vmatprep.mubr.msk.bf16.mxu0 %vm2975_vm4, %v2887_v28  ;;  %8016 = vmatprep.mubr.msk.bf16.mxu1 %vm501_vm3, %v12641_v62  ;;  %v2701_v16 = vmul.f32 %v8506_v31, %v8504_v48  ;;  %8539 = vtanh.f32 %v1062_v44  ;;  %v2888_v63 = vpack.c.bf16 %v2700_v17, %v2699_v19  ;;  %v12645_v48 = vld [vmem:[#allocation2_spill] sm:$0xff]  ;;  %v12647_v28 = vld [vmem:[#allocation31_spill] sm:$0xff] }
 0x11d   : > { %v8510_v8 = vpop.eup %8509  ;;  %v10273_v1 = vpop.f32.mrf.mxu0  ;;  %8141 = vmatpush3.bf16.msra.mxu0 %v8441_v43  ;;  %8541 = vpow2.f32 %v2347_v7  ;;  %v12646_v36 = vpack.c.bf16 %v12644_v47, %v12645_v48  ;;  %v12650_v17 = vld [vmem:[#allocation34_spill] sm:$0xff]  ;;  %v12656_v48 = vld [vmem:[#allocation7_spill] sm:$0xff] }
 0x11e   : > { %v10275_v18 = vpop.f32.mrf.mxu1  ;;  %v8512_v6 = vpop.eup %8511  ;;  %8142 = vmatprep.subr.bf16.mxu0 %v8442_v53  ;;  %v2702_v12 = vmul.f32 %v8510_v8, %v8508_v60  ;;  %8543 = vtanh.f32 %v1072_v27  ;;  %v2359_v60 = vmul.f32 1.442695, %v12648_v9  ;;  %v12649_v8 = vld [vmem:[#allocation33_spill] sm:$0xff] }
 0x11f   : > { %v8514_v22 = vpop.eup %8513  ;;  %v10283_v39 = vpop.f32.mrf.mxu0  ;;  %8545 = vpow2.f32 %v2351_v41  ;;  %v1087_v27 = vadd.f32 %v10027_v56, %v12649_v8  ;;  %v2367_v8 = vmul.f32 1.442695, %v10190_v51  ;;  %v1117_v51 = vadd.f32 %v10027_v56, %v10225_v59  ;;  %v12659_v59 = vld [vmem:[#allocation9_spill] sm:$0xff] }
 0x120   : > { %v10285_v3 = vpop.f32.mrf.mxu1  ;;  %v8516_v10 = vpop.eup %8515  ;;  %v2889_v11 = vpack.c.bf16 %v2702_v12, %v2701_v16  ;;  %8547 = vtanh.f32 %v1067_v54  ;;  %v2704_v16 = vmul.f32 %v8514_v22, %v8512_v6  ;;  %v1097_v12 = vadd.f32 %v10027_v56, %v10180_v49  ;;  %v12652_v49 = vld [vmem:[#allocation5_spill] sm:$0xff] }
 0x121   : > { %v8518_v43 = vpop.eup %8517  ;;  %v10290_v37 = vpop.f32.mrf.mxu0  ;;  %8143 = vmatpush3.bf16.msra.mxu0 %v8442_v53  ;;  %8549 = vpow2.f32 %v2349_v42  ;;  %v1092_v53 = vadd.f32 %v12647_v28, %v10027_v56 }
 0x122   : > { %v10292_v57 = vpop.f32.mrf.mxu1  ;;  %v8520_v14 = vpop.eup %8519  ;;  %8144 = vmatprep.subr.bf16.mxu0 %v8443_v20  ;;  %8551 = vtanh.f32 %v1077_v61  ;;  %v2703_v24 = vmul.f32 %v8518_v43, %v8516_v10  ;;  %v2357_v10 = vmul.f32 1.442695, %v12650_v17  ;;  %v1107_v17 = vadd.f32 %v10027_v56, %v10201_v0 }
 0x123   : > { %v8522_v33 = vpop.eup %8521  ;;  %v10297_v32 = vpop.f32.mrf.mxu0  ;;  %7887 = vmatmul.mubr.msk.bf16.gmra.mxu0 %vm2975_vm4, %v2888_v63  ;;  %8017 = vmatmul.mubr.msk.bf16.gmra.mxu1 %vm501_vm3, %v12642_v26  ;;  %8553 = vpow2.f32 %v2353_v2  ;;  %v2361_v2 = vmul.f32 1.442695, %v10182_v35  ;;  %v12655_v35 = vld [vmem:[#allocation36_spill] sm:$0xff] }
 0x124   : > { %v10299_v40 = vpop.f32.mrf.mxu1  ;;  %v8524_v21 = vpop.eup %8523  ;;  %7890 = vmatprep.mubr.msk.bf16.mxu0 %vm2975_vm4, %v2889_v11  ;;  %8020 = vmatprep.mubr.msk.bf16.mxu1 %vm501_vm3, %v12646_v36  ;;  %v2705_v7 = vmul.f32 %v8522_v33, %v8520_v14  ;;  %8555 = vtanh.f32 %v1082_v55  ;;  %v2890_v63 = vpack.c.bf16 %v2704_v16, %v2703_v24  ;;  %v12651_v11 = vld [vmem:[#allocation35_spill] sm:$0xff]  ;;  %v2363_v47 = vmul.f32 1.442695, %v12655_v35  ;;  %v12657_v36 = vld [vmem:[#allocation6_spill] sm:$0xff] }
 0x125   : > { %v8526_v58 = vpop.eup %8525  ;;  %v10314_v31 = vpop.f32.mrf.mxu0  ;;  %8145 = vmatpush3.bf16.msra.mxu0 %v8443_v20  ;;  %8557 = vpow2.f32 %v2355_v46  ;;  %v1102_v33 = vadd.f32 %v12651_v11, %v10027_v56  ;;  %v12663_v35 = vld [vmem:[#allocation10_spill] sm:$0xff] }
 0x126   : > { %v10316_v23 = vpop.f32.mrf.mxu1  ;;  %v8528_v44 = vpop.eup %8527  ;;  %v2706_v20 = vmul.f32 %v8526_v58, %v8524_v21  ;;  %8559 = vtanh.f32 %v1092_v53  ;;  %v12653_v21 = vld [vmem:[#allocation4_spill] sm:$0xff]  ;;  %v12658_v58 = vpack.c.bf16 %v12656_v48, %v12657_v36  ;;  %v1112_v53 = vadd.f32 %v10187_v38, %v10027_v56 }
 0x127   : > { %v8530_v62 = vpop.eup %8529  ;;  %v10321_v19 = vpop.f32.mrf.mxu0  ;;  %8561 = vpow2.f32 %v2359_v60  ;;  %v12654_v34 = vpack.c.bf16 %v12652_v49, %v12653_v21  ;;  %v12660_v49 = vld [vmem:[#allocation8_spill] sm:$0xff]  ;;  %v1132_v48 = vadd.f32 %v10239_v15, %v10027_v56 }
 0x128   : > { %v10323_v41 = vpop.f32.mrf.mxu1  ;;  %v8532_v54 = vpop.eup %8531  ;;  %v2891_v6 = vpack.c.bf16 %v2706_v20, %v2705_v7  ;;  %8563 = vtanh.f32 %v1087_v27  ;;  %v2708_v38 = vmul.f32 %v8530_v62, %v8528_v44  ;;  %v12661_v21 = vpack.c.bf16 %v12659_v59, %v12660_v49  ;;  %v12666_v59 = vld [vmem:[#allocation12_spill] sm:$0xff] }
 0x129   : > { %v8534_v42 = vpop.eup %8533  ;;  %v10328_v43 = vpop.f32.mrf.mxu0  ;;  %8565 = vpow2.f32 %v2357_v10 }
 0x12a   : > { %v10330_v61 = vpop.f32.mrf.mxu1  ;;  %v8536_v14 = vpop.eup %8535  ;;  %8567 = vtanh.f32 %v1097_v12  ;;  %v2707_v60 = vmul.f32 %v8534_v42, %v8532_v54 }
 0x12b   : > { %v8538_v22 = vpop.eup %8537  ;;  %v10335_v55 = vpop.f32.mrf.mxu0  ;;  %7891 = vmatmul.mubr.msk.bf16.gmra.mxu0 %vm2975_vm4, %v2890_v63  ;;  %8021 = vmatmul.mubr.msk.bf16.gmra.mxu1 %vm501_vm3, %v12654_v34  ;;  %8569 = vpow2.f32 %v2361_v2  ;;  %v2365_v63 = vmul.f32 1.442695, %v10203_v45  ;;  %v1122_v45 = vadd.f32 %v10211_v52, %v10027_v56 }
 0x12c   : > { %v10337_v26 = vpop.f32.mrf.mxu1  ;;  %v8540_v46 = vpop.eup %8539  ;;  %7894 = vmatprep.mubr.msk.bf16.mxu0 %vm2975_vm4, %v2891_v6  ;;  %8024 = vmatprep.mubr.msk.bf16.mxu1 %vm501_vm3, %v12658_v58  ;;  %v2709_v27 = vmul.f32 %v8538_v22, %v8536_v14  ;;  %8571 = vtanh.f32 %v1102_v33  ;;  %v2892_v0 = vpack.c.bf16 %v2708_v38, %v2707_v60  ;;  %v2369_v22 = vmul.f32 1.442695, %v10227_v5 }
 0x12d   : > { %v8542_v28 = vpop.eup %8541  ;;  %v10352_v24 = vpop.f32.mrf.mxu0  ;;  %8573 = vpow2.f32 %v2363_v47  ;;  %v2371_v5 = vmul.f32 1.442695, %v10213_v25  ;;  %v8444_v25 = vld [vmem:[%s12570_s7 + $0x10] sm:$0xff]   ;;  %v2375_v60 = vmul.f32 1.442695, %v10241_v13  ;;  %v1137_v13 = vadd.f32 %v10027_v56, %v10273_v1  ;;  %v12665_v1 = vld [vmem:[#allocation13_spill] sm:$0xff] }
 0x12e   : > { %v10354_v9 = vpop.f32.mrf.mxu1  ;;  %v8544_v7 = vpop.eup %8543  ;;  %v2710_v54 = vmul.f32 %v8542_v28, %v8540_v46  ;;  %8575 = vtanh.f32 %v1112_v53  ;;  %v12662_v46 = vld [vmem:[#allocation11_spill] sm:$0xff]  ;;  %8146 = vmatprep.subr.bf16.mxu0 %v8444_v25  ;;  %v12667_v49 = vpack.c.bf16 %v12665_v1, %v12666_v59 }
 0x12f   : > { %v8546_v16 = vpop.eup %8545  ;;  %v10359_v10 = vpop.f32.mrf.mxu0  ;;  %8577 = vpow2.f32 %v2367_v8  ;;  %v12664_v52 = vpack.c.bf16 %v12662_v46, %v12663_v35  ;;  %8147 = vmatpush3.bf16.msra.mxu0 %v8444_v25  ;;  %v1152_v35 = vadd.f32 %v10283_v39, %v10027_v56 }
 0x130   : > { %v10361_v20 = vpop.f32.mrf.mxu1  ;;  %v8548_v12 = vpop.eup %8547  ;;  %v2893_v44 = vpack.c.bf16 %v2710_v54, %v2709_v27  ;;  %8579 = vtanh.f32 %v1107_v17  ;;  %v1127_v17 = vadd.f32 %v10027_v56, %v10246_v29  ;;  %v2373_v54 = vmul.f32 1.442695, %v10248_v30 }
 0x131   : > { %v8550_v42 = vpop.eup %8549  ;;  %v10366_v14 = vpop.f32.mrf.mxu0  ;;  %8581 = vpow2.f32 %v2365_v63  ;;  %v2712_v63 = vmul.f32 %v8546_v16, %v8544_v7  ;;  %v2377_v7 = vmul.f32 1.442695, %v10275_v18  ;;  %v1142_v30 = vadd.f32 %v10256_v4, %v10027_v56 }
 0x132   : > { %v10368_v2 = vpop.f32.mrf.mxu1  ;;  %v8552_v6 = vpop.eup %8551  ;;  %8583 = vtanh.f32 %v1117_v51  ;;  %v2711_v28 = vmul.f32 %v8550_v42, %v8548_v12  ;;  %v2379_v18 = vmul.f32 1.442695, %v10258_v50  ;;  %v2383_v50 = vmul.f32 1.442695, %v10285_v3 }
 0x133   : > { %v8554_v62 = vpop.eup %8553  ;;  %v10373_v11 = vpop.f32.mrf.mxu0  ;;  %7895 = vmatmul.mubr.msk.bf16.gmra.mxu0 %vm2975_vm4, %v2892_v0  ;;  %8025 = vmatmul.mubr.msk.bf16.gmra.mxu1 %vm501_vm3, %v12661_v21  ;;  %8585 = vpow2.f32 %v2369_v22  ;;  %v1157_v3 = vadd.f32 %v10027_v56, %v10314_v31  ;;  %v12671_v31 = vld [vmem:[#allocation17_spill] sm:$0xff] }
 0x134   : > { %v10375_v33 = vpop.f32.mrf.mxu1  ;;  %v8556_v34 = vpop.eup %8555  ;;  %7898 = vmatprep.mubr.msk.bf16.mxu0 %vm2975_vm4, %v2893_v44  ;;  %8028 = vmatprep.mubr.msk.bf16.mxu1 %vm501_vm3, %v12664_v52  ;;  %v2713_v8 = vmul.f32 %v8554_v62, %v8552_v6  ;;  %8587 = vtanh.f32 %v1122_v45  ;;  %v2894_v6 = vpack.c.bf16 %v2712_v63, %v2711_v28 }
 0x135   : > { %v8558_v47 = vpop.eup %8557  ;;  %v10390_v36 = vpop.f32.mrf.mxu0  ;;  %8589 = vpow2.f32 %v2371_v5  ;;  %v12669_v5 = vld [vmem:[#allocation14_spill] sm:$0xff] }
 0x136   : > { %v10392_v58 = vpop.f32.mrf.mxu1  ;;  %v8560_v53 = vpop.eup %8559  ;;  %v2714_v42 = vmul.f32 %v8558_v47, %v8556_v34  ;;  %8591 = vtanh.f32 %v1132_v48  ;;  %v12668_v34 = vld [vmem:[#allocation15_spill] sm:$0xff] }
 0x137   : > { %v8562_v27 = vpop.eup %8561  ;;  %v10400_v15 = vpop.f32.mrf.mxu0  ;;  %8593 = vpow2.f32 %v2375_v60  ;;  %v12670_v4 = vpack.c.bf16 %v12668_v34, %v12669_v5  ;;  %v1172_v34 = vadd.f32 %v10321_v19, %v10027_v56 }
 0x138   : > { %v10402_v38 = vpop.f32.mrf.mxu1  ;;  %v8564_v12 = vpop.eup %8563  ;;  %v2895_v16 = vpack.c.bf16 %v2714_v42, %v2713_v8  ;;  %8595 = vtanh.f32 %v1127_v17  ;;  %v1147_v8 = vadd.f32 %v10027_v56, %v10290_v37  ;;  %v2716_v39 = vmul.f32 %v8562_v27, %v8560_v53 }
 0x139   : > { %v8566_v51 = vpop.eup %8565  ;;  %v10407_v0 = vpop.f32.mrf.mxu0  ;;  %8597 = vpow2.f32 %v2373_v54  ;;  %v2381_v42 = vmul.f32 1.442695, %v10292_v57  ;;  %v1162_v57 = vadd.f32 %v10297_v32, %v10027_v56 }
 0x13a   : > { %v10409_v29 = vpop.f32.mrf.mxu1  ;;  %v8568_v22 = vpop.eup %8567  ;;  %8599 = vtanh.f32 %v1137_v13  ;;  %v2715_v48 = vmul.f32 %v8566_v51, %v8564_v12 }
 0x13b   : > { %v8570_v44 = vpop.eup %8569  ;;  %v10414_v62 = vpop.f32.mrf.mxu0  ;;  %7899 = vmatmul.mubr.msk.bf16.gmra.mxu0 %vm2975_vm4, %v2894_v6  ;;  %8029 = vmatmul.mubr.msk.bf16.gmra.mxu1 %vm501_vm3, %v12667_v49  ;;  %8601 = vpow2.f32 %v2377_v7  ;;  %v2385_v7 = vmul.f32 1.442695, %v10316_v23  ;;  %v2387_v23 = vmul.f32 1.442695, %v10299_v40  ;;  %v12674_v49 = vld [vmem:[#allocation19_spill] sm:$0xff] }
 0x13c   : > { %v10416_v45 = vpop.f32.mrf.mxu1  ;;  %v8572_v21 = vpop.eup %8571  ;;  %7902 = vmatprep.mubr.msk.bf16.mxu0 %vm2975_vm4, %v2895_v16  ;;  %8032 = vmatprep.mubr.msk.bf16.mxu1 %vm501_vm3, %v12670_v4  ;;  %v2717_v25 = vmul.f32 %v8570_v44, %v8568_v22  ;;  %8603 = vtanh.f32 %v1142_v30  ;;  %v2896_v37 = vpack.c.bf16 %v2716_v39, %v2715_v48  ;;  %v12672_v30 = vld [vmem:[#allocation16_spill] sm:$0xff]  ;;  %v2391_v40 = vmul.f32 1.442695, %v10323_v41 }
 0x13d   : > { %v8574_v46 = vpop.eup %8573  ;;  %v10431_v52 = vpop.f32.mrf.mxu0  ;;  %8605 = vpow2.f32 %v2379_v18  ;;  %v12673_v1 = vpack.c.bf16 %v12671_v31, %v12672_v30  ;;  %v1177_v41 = vadd.f32 %v10027_v56, %v10352_v24  ;;  %v12677_v24 = vld [vmem:[#allocation21_spill] sm:$0xff] }
 0x13e   : > { %v10433_v47 = vpop.f32.mrf.mxu1  ;;  %v8576_v28 = vpop.eup %8575  ;;  %v2718_v12 = vmul.f32 %v8574_v46, %v8572_v21  ;;  %8607 = vtanh.f32 %v1152_v35  ;;  %v12675_v21 = vld [vmem:[#allocation18_spill] sm:$0xff] }
 0x13f   : > { %v8578_v60 = vpop.eup %8577  ;;  %v10438_v17 = vpop.f32.mrf.mxu0  ;;  %8609 = vpow2.f32 %v2383_v50  ;;  %v12676_v32 = vpack.c.bf16 %v12674_v49, %v12675_v21  ;;  %v1192_v49 = vadd.f32 %v10359_v10, %v10027_v56 }
 0x140   : > { %v10440_v63 = vpop.f32.mrf.mxu1  ;;  %v8580_v54 = vpop.eup %8579  ;;  %v2897_v53 = vpack.c.bf16 %v2718_v12, %v2717_v25  ;;  %8611 = vtanh.f32 %v1147_v8  ;;  %v1167_v25 = vadd.f32 %v10027_v56, %v10328_v43  ;;  %v2720_v19 = vmul.f32 %v8578_v60, %v8576_v28 }
 0x141   : > { %v8582_v51 = vpop.eup %8581  ;;  %v10445_v13 = vpop.f32.mrf.mxu0  ;;  %8613 = vpow2.f32 %v2381_v42  ;;  %v2389_v12 = vmul.f32 1.442695, %v10330_v61  ;;  %v1182_v61 = vadd.f32 %v10335_v55, %v10027_v56 }
 0x142   : > { %v10447_v6 = vpop.f32.mrf.mxu1  ;;  %v8584_v22 = vpop.eup %8583  ;;  %8615 = vtanh.f32 %v1157_v3  ;;  %v2719_v46 = vmul.f32 %v8582_v51, %v8580_v54 }
 0x143   : > { %v8586_v27 = vpop.eup %8585  ;;  %v10452_v16 = vpop.f32.mrf.mxu0  ;;  %7903 = vmatmul.mubr.msk.bf16.gmra.mxu0 %vm2975_vm4, %v2896_v37  ;;  %8033 = vmatmul.mubr.msk.bf16.gmra.mxu1 %vm501_vm3, %v12673_v1  ;;  %8617 = vpow2.f32 %v2385_v7  ;;  %v2393_v7 = vmul.f32 1.442695, %v10354_v9  ;;  %v2395_v9 = vmul.f32 1.442695, %v10337_v26  ;;  %v12680_v1 = vld [vmem:[#allocation23_spill] sm:$0xff] }
 0x144   : > { %v10454_v44 = vpop.f32.mrf.mxu1  ;;  %v8588_v59 = vpop.eup %8587  ;;  %7906 = vmatprep.mubr.msk.bf16.mxu0 %vm2975_vm4, %v2897_v53  ;;  %8036 = vmatprep.mubr.msk.bf16.mxu1 %vm501_vm3, %v12676_v32  ;;  %v2721_v48 = vmul.f32 %v8586_v27, %v8584_v22  ;;  %8619 = vtanh.f32 %v1162_v57  ;;  %v2898_v43 = vpack.c.bf16 %v2720_v19, %v2719_v46  ;;  %v12678_v57 = vld [vmem:[#allocation20_spill] sm:$0xff]  ;;  %v2399_v26 = vmul.f32 1.442695, %v10361_v20 }
 0x145   : > { %v8590_v18 = vpop.eup %8589  ;;  %v10469_v5 = vpop.f32.mrf.mxu0  ;;  %8621 = vpow2.f32 %v2387_v23  ;;  %v12679_v31 = vpack.c.bf16 %v12677_v24, %v12678_v57  ;;  %v2397_v20 = vmul.f32 1.442695, %v10368_v2 }
 0x146   : > { %v10471_v4 = vpop.f32.mrf.mxu1  ;;  %v8592_v35 = vpop.eup %8591  ;;  %v2722_v54 = vmul.f32 %v8590_v18, %v8588_v59  ;;  %8623 = vtanh.f32 %v1172_v34  ;;  %v12681_v59 = vld [vmem:[#allocation22_spill] sm:$0xff] }
 0x147   : > { %v8594_v50 = vpop.eup %8593  ;;  %v10476_v8 = vpop.f32.mrf.mxu0  ;;  %8625 = vpow2.f32 %v2391_v40  ;;  %v12682_v55 = vpack.c.bf16 %v12680_v1, %v12681_v59 }
 0x148   : > { %v10478_v39 = vpop.f32.mrf.mxu1  ;;  %v8596_v42 = vpop.eup %8595  ;;  %v2899_v28 = vpack.c.bf16 %v2722_v54, %v2721_v48  ;;  %8627 = vtanh.f32 %v1167_v25  ;;  %v10515_v48 = vld [vmem:[%s12566_s3] ss:$0 sm:$0xff]  ;;  %v2724_v19 = vmul.f32 %v8594_v50, %v8592_v35 }
 0x149   : > { %v8598_v51 = vpop.eup %8597  ;;  %v10483_v3 = vpop.f32.mrf.mxu0  ;;  %8629 = vpow2.f32 %v2389_v12  ;;  %v1187_v56 = vadd.f32 %v10515_v48, %v10366_v14  ;;  %v1202_v2 = vadd.f32 %v10515_v48, %v10373_v11  ;;  %v1212_v1 = vadd.f32 %v10515_v48, %v10400_v15 }
 0x14a   : > { %v10485_v37 = vpop.f32.mrf.mxu1  ;;  %v8600_v22 = vpop.eup %8599  ;;  %8631 = vtanh.f32 %v1177_v41  ;;  %v2723_v18 = vmul.f32 %v8598_v51, %v8596_v42  ;;  %v1197_v51 = vadd.f32 %v10515_v48, %v10390_v36  ;;  %v12683_v36 = vld [vmem:[#allocation25_spill] sm:$0xff]  ;;  %v1207_v15 = vadd.f32 %v10515_v48, %v10407_v0 }
 0x14b   : > { %v8602_v60 = vpop.eup %8601  ;;  %v10490_v53 = vpop.f32.mrf.mxu0  ;;  %7907 = vmatmul.mubr.msk.bf16.gmra.mxu0 %vm2975_vm4, %v2898_v43  ;;  %8037 = vmatmul.mubr.msk.bf16.gmra.mxu1 %vm501_vm3, %v12679_v31  ;;  %8633 = vpow2.f32 %v2393_v7  ;;  %v2401_v7 = vmul.f32 1.442695, %v10392_v58  ;;  %v2403_v58 = vmul.f32 1.442695, %v10375_v33  ;;  %v12686_v31 = vld [vmem:[#allocation27_spill] sm:$0xff]  ;;  %v1217_v0 = vadd.f32 %v10515_v48, %v10431_v52  ;;  %v12689_v52 = vld [vmem:[#allocation29_spill] sm:$0xff] }
 0x14c   : > { %v10492_v27 = vpop.f32.mrf.mxu1  ;;  %v8604_v30 = vpop.eup %8603  ;;  %7910 = vmatprep.mubr.msk.bf16.mxu0 %vm2975_vm4, %v2899_v28  ;;  %8040 = vmatprep.mubr.msk.bf16.mxu1 %vm501_vm3, %v12682_v55  ;;  %v2725_v46 = vmul.f32 %v8602_v60, %v8600_v22  ;;  %8635 = vtanh.f32 %v1182_v61  ;;  %v2900_v14 = vpack.c.bf16 %v2724_v19, %v2723_v18  ;;  %v12684_v61 = vld [vmem:[#allocation24_spill] sm:$0xff]  ;;  %v8445_v33 = vld [vmem:[%s12570_s7 + $0x8] sm:$0xff]   ;;  %v2407_v18 = vmul.f32 1.442695, %v10402_v38 }
 0x14d   : > { %v8606_v23 = vpop.eup %8605  ;;  %v10507_v21 = vpop.f32.mrf.mxu0  ;;  %8637 = vpow2.f32 %v2395_v9  ;;  %v12685_v24 = vpack.c.bf16 %v12683_v36, %v12684_v61  ;;  %8148 = vmatprep.subr.bf16.mxu0 %v8445_v33 }
 0x14e   : > { %v10509_v32 = vpop.f32.mrf.mxu1  ;;  %v8608_v34 = vpop.eup %8607  ;;  %v2726_v12 = vmul.f32 %v8606_v23, %v8604_v30  ;;  %8639 = vtanh.f32 %v1192_v49  ;;  %v12687_v30 = vld [vmem:[#allocation26_spill] sm:$0xff]  ;;  %8149 = vmatpush3.bf16.msra.mxu0 %v8445_v33 }
 0x14f   : > { %v8610_v40 = vpop.eup %8609  ;;  %v10519_v10 = vpop.f32.mrf.mxu0  ;;  %8641 = vpow2.f32 %v2399_v26  ;;  %v12688_v11 = vpack.c.bf16 %v12686_v31, %v12687_v30  ;;  %v1232_v30 = vadd.f32 %v10515_v48, %v10438_v17  ;;  %v1227_v17 = vadd.f32 %v10515_v48, %v10445_v13 }
 0x150   : > { %v10521_v25 = vpop.f32.mrf.mxu1  ;;  %v8612_v42 = vpop.eup %8611  ;;  %v2901_v35 = vpack.c.bf16 %v2726_v12, %v2725_v46  ;;  %8643 = vtanh.f32 %v1187_v56  ;;  %v9224_v12 = vld [vmem:[%s9414_s11 + $0x140] sm:$0xff] }
 0x151   : > { %v8614_v54 = vpop.eup %8613  ;;  %v10526_v41 = vpop.f32.mrf.mxu0  ;;  %8645 = vpow2.f32 %v2397_v20  ;;  %v2728_v20 = vmul.f32 %v8610_v40, %v8608_v34 }
 0x152   : > { %v10528_v43 = vpop.f32.mrf.mxu1  ;;  %v8616_v22 = vpop.eup %8615  ;;  %8647 = vtanh.f32 %v1197_v51  ;;  %v2727_v23 = vmul.f32 %v8614_v54, %v8612_v42  ;;  %v9225_v54 = vld [vmem:[%s9414_s11 + $0x148] sm:$0xff] }
 0x153   : > { %v8618_v50 = vpop.eup %8617  ;;  %v10533_v28 = vpop.f32.mrf.mxu0  ;;  %7911 = vmatmul.mubr.msk.bf16.gmra.mxu0 %vm2975_vm4, %v2900_v14  ;;  %8041 = vmatmul.mubr.msk.bf16.gmra.mxu1 %vm501_vm3, %v12685_v24  ;;  %8649 = vpow2.f32 %v2401_v7  ;;  %v2837_v51 = vpack.c.bf16 %v9225_v54, %v9224_v12  ;;  %v2405_v14 = vmul.f32 1.442695, %v10409_v29  ;;  %v1222_v29 = vadd.f32 %v10515_v48, %v10414_v62 }
 0x154   : > { %v10535_v60 = vpop.f32.mrf.mxu1  ;;  %v8620_v57 = vpop.eup %8619  ;;  %7914 = vmatprep.mubr.msk.bf16.mxu0 %vm2975_vm4, %v2901_v35  ;;  %8044 = vmatprep.mubr.msk.bf16.mxu1 %vm501_vm3, %v12688_v11  ;;  %v2729_v26 = vmul.f32 %v8618_v50, %v8616_v22  ;;  %8651 = vtanh.f32 %v1202_v2  ;;  %v2902_v34 = vpack.c.bf16 %v2728_v20, %v2727_v23  ;;  %v2409_v50 = vmul.f32 1.442695, %v10433_v47 }
 0x155   : > { %v8622_v9 = vpop.eup %8621  ;;  %v10550_v59 = vpop.f32.mrf.mxu0  ;;  %8653 = vpow2.f32 %v2403_v58  ;;  %v2411_v47 = vmul.f32 1.442695, %v10416_v45  ;;  %v2415_v45 = vmul.f32 1.442695, %v10440_v63  ;;  %v2413_v63 = vmul.f32 1.442695, %v10447_v6 }
 0x156   : > { %v10552_v55 = vpop.f32.mrf.mxu1  ;;  %v8624_v49 = vpop.eup %8623  ;;  %v2730_v38 = vmul.f32 %v8622_v9, %v8620_v57  ;;  %8655 = vtanh.f32 %v1212_v1  ;;  %v12690_v57 = vld [vmem:[#allocation28_spill] sm:$0xff]  ;;  %v1242_v6 = vadd.f32 %v10515_v48, %v10452_v16  ;;  %v1252_v16 = vadd.f32 %v10515_v48, %v10476_v8  ;;  %v9231_v8 = vld [vmem:[%s9414_s11 + $0x178] sm:$0xff] }
 0x157   : > { %v8626_v46 = vpop.eup %8625  ;;  %v10560_v56 = vpop.f32.mrf.mxu0  ;;  %8657 = vpow2.f32 %v2407_v18  ;;  %v12691_v58 = vpack.c.bf16 %v12689_v52, %v12690_v57 }
 0x158   : > { %v10562_v19 = vpop.f32.mrf.mxu1  ;;  %v8628_v42 = vpop.eup %8627  ;;  %v2903_v2 = vpack.c.bf16 %v2730_v38, %v2729_v26  ;;  %8659 = vtanh.f32 %v1207_v15  ;;  %v9226_v26 = vld [vmem:[%s9414_s11 + $0x150] sm:$0xff]  ;;  %v9227_v15 = vld [vmem:[%s9414_s11 + $0x158] sm:$0xff]  ;;  %v9229_v38 = vld [vmem:[%s9414_s11 + $0x168] sm:$0xff] }
 0x159   : > { %v8630_v22 = vpop.eup %8629  ;;  %v10569_v7 = vpop.f32.mrf.mxu0  ;;  %8661 = vpow2.f32 %v2405_v14  ;;  %v2838_v20 = vpack.c.bf16 %v9227_v15, %v9226_v26  ;;  %v9228_v14 = vld [vmem:[%s9414_s11 + $0x160] sm:$0xff]  ;;  %v9230_v26 = vld [vmem:[%s9414_s11 + $0x170] sm:$0xff] }
 0x15a   : > { %v10571_v35 = vpop.f32.mrf.mxu1  ;;  %v8632_v40 = vpop.eup %8631  ;;  %8663 = vtanh.f32 %v1217_v0  ;;  %v2731_v1 = vmul.f32 %v8630_v22, %v8628_v42  ;;  %v2839_v22 = vpack.c.bf16 %v9229_v38, %v9228_v14  ;;  %v2840_v15 = vpack.c.bf16 %v9231_v8, %v9230_v26  ;;  %v9233_v38 = vld [vmem:[%s9414_s11 + $0x188] sm:$0xff]  ;;  %v9235_v26 = vld [vmem:[%s9414_s11 + $0x198] sm:$0xff] }
 0x15b   : > { %v8634_v36 = vpop.eup %8633  ;;  %v10576_v61 = vpop.f32.mrf.mxu0  ;;  %7915 = vmatmul.mubr.msk.bf16.gmra.mxu0 %vm2975_vm4, %v2902_v34  ;;  %8045 = vmatmul.mubr.msk.bf16.gmra.mxu1 %vm501_vm3, %v12691_v58  ;;  %8665 = vpow2.f32 %v2409_v50  ;;  %v2419_v58 = vmul.f32 1.442695, %v10454_v44  ;;  %v2423_v44 = vmul.f32 1.442695, %v10478_v39  ;;  %v9232_v39 = vld [vmem:[%s9414_s11 + $0x180] sm:$0xff] }
 0x15c   : > { %v10578_v24 = vpop.f32.mrf.mxu1  ;;  %v8636_v31 = vpop.eup %8635  ;;  %7918 = vmatprep.mubr.msk.bf16.mxu0 %vm2975_vm4, %v2903_v2  ;;  %8048 = vmatprep.mubr.msk.bf16.mxu1 %vm501_vm3, %v2837_v51  ;;  %v2733_v33 = vmul.f32 %v8634_v36, %v8632_v40  ;;  %8667 = vtanh.f32 %v1222_v29  ;;  %v2732_v51 = vmul.f32 %v8626_v46, %v8624_v49  ;;  %v1237_v40 = vadd.f32 %v10515_v48, %v10469_v5 }
 0x15d   : > { %v8638_v62 = vpop.eup %8637  ;;  %v10590_v11 = vpop.f32.mrf.mxu0  ;;  %8669 = vpow2.f32 %v2411_v47  ;;  %v2417_v49 = vmul.f32 1.442695, %v10471_v4 }
 0x15e   : > { %v10592_v9 = vpop.f32.mrf.mxu1  ;;  %v8640_v23 = vpop.eup %8639  ;;  %v2734_v0 = vmul.f32 %v8638_v62, %v8636_v31  ;;  %8671 = vtanh.f32 %v1232_v30  ;;  %v2904_v2 = vpack.c.bf16 %v2732_v51, %v2731_v1 }
 0x15f   : > { %v8642_v18 = vpop.eup %8641  ;;  %v10599_v12 = vpop.f32.mrf.mxu0  ;;  %8673 = vpow2.f32 %v2415_v45  ;;  %v8446_v45 = vld [vmem:[%s12572_s9 + $0x38] sm:$0xff]  }
 0x160   : > { %v10601_v54 = vpop.f32.mrf.mxu1  ;;  %v8644_v42 = vpop.eup %8643  ;;  %v2905_v46 = vpack.c.bf16 %v2734_v0, %v2733_v33  ;;  %8675 = vtanh.f32 %v1227_v17  ;;  %8280 = vmatprep.subr.bf16.mxu1 %v8446_v45 }
 0x161   : > { %v8646_v34 = vpop.eup %8645  ;;  %v10608_v50 = vpop.f32.mrf.mxu0  ;;  %8677 = vpow2.f32 %v2413_v63  ;;  %v2421_v63 = vmul.f32 1.442695, %v10485_v37  ;;  %8281 = vmatpush3.bf16.msra.mxu1 %v8446_v45  ;;  %v1262_v37 = vadd.f32 %v10515_v48, %v10490_v53  ;;  %v1272_v53 = vadd.f32 %v10515_v48, %v10519_v10  ;;  %v9234_v45 = vld [vmem:[%s9414_s11 + $0x190] sm:$0xff] }
 0x162   : > { %v10610_v13 = vpop.f32.mrf.mxu1  ;;  %v8648_v36 = vpop.eup %8647  ;;  %8679 = vtanh.f32 %v1237_v40  ;;  %v2735_v62 = vmul.f32 %v8646_v34, %v8644_v42  ;;  %v2736_v42 = vmul.f32 %v8642_v18, %v8640_v23  ;;  %v1257_v40 = vadd.f32 %v10515_v48, %v10507_v21 }
 0x163   : > { %v8650_v29 = vpop.eup %8649  ;;  %v10615_v52 = vpop.f32.mrf.mxu0  ;;  %7919 = vmatmul.mubr.msk.bf16.gmra.mxu0 %vm2975_vm4, %v2904_v2  ;;  %8049 = vmatmul.mubr.msk.bf16.gmra.mxu1 %vm501_vm3, %v2838_v20  ;;  %8681 = vpow2.f32 %v2417_v49  ;;  %v1247_v20 = vadd.f32 %v10515_v48, %v10483_v3  ;;  %v2425_v18 = vmul.f32 1.442695, %v10509_v32  ;;  %v2427_v32 = vmul.f32 1.442695, %v10492_v27 }
 0x164   : > { %v10617_v57 = vpop.f32.mrf.mxu1  ;;  %v8652_v5 = vpop.eup %8651  ;;  %7922 = vmatprep.mubr.msk.bf16.mxu0 %vm2975_vm4, %v2905_v46  ;;  %8052 = vmatprep.mubr.msk.bf16.mxu1 %vm501_vm3, %v2839_v22  ;;  %v2737_v1 = vmul.f32 %v8650_v29, %v8648_v36  ;;  %8683 = vtanh.f32 %v1242_v6  ;;  %v2841_v22 = vpack.c.bf16 %v9233_v38, %v9232_v39  ;;  %v2906_v36 = vpack.c.bf16 %v2736_v42, %v2735_v62  ;;  %v9236_v39 = vld [vmem:[%s9414_s11 + $0x1a0] sm:$0xff]  ;;  %v9237_v38 = vld [vmem:[%s9414_s11 + $0x1a8] sm:$0xff] }
 0x165   : > { %v8654_v4 = vpop.eup %8653  ;;  %v10626_v31 = vpop.f32.mrf.mxu0  ;;  %8685 = vpow2.f32 %v2419_v58  ;;  %v2431_v27 = vmul.f32 1.442695, %v10521_v25  ;;  %v2842_v8 = vpack.c.bf16 %v9235_v26, %v9234_v45  ;;  %v1267_v10 = vadd.f32 %v10515_v48, %v10526_v41  ;;  %v9238_v45 = vld [vmem:[%s9414_s11 + $0x1b0] sm:$0xff] }
 0x166   : > { %v10628_v47 = vpop.f32.mrf.mxu1  ;;  %v10630_v30 = vpop.eup %8655  ;;  %v2738_v0 = vmul.f32 %v8654_v4, %v8652_v5  ;;  %8687 = vtanh.f32 %v1252_v16  ;;  %v2429_v25 = vmul.f32 1.442695, %v10528_v43  ;;  %v1282_v43 = vadd.f32 %v10515_v48, %v10533_v28 }
 0x167   : > { %v8658_v33 = vpop.eup %8657  ;;  %v10640_v17 = vpop.f32.mrf.mxu0  ;;  %8689 = vpow2.f32 %v2423_v44  ;;  %v1292_v28 = vadd.f32 %v10515_v48, %v10560_v56  ;;  %v9239_v56 = vld [vmem:[%s9414_s11 + $0x1b8] sm:$0xff] }
 0x168   : > { %v10642_v51 = vpop.f32.mrf.mxu1  ;;  %v8660_v14 = vpop.eup %8659  ;;  %v2907_v49 = vpack.c.bf16 %v2738_v0, %v2737_v1  ;;  %8691 = vtanh.f32 %v1247_v20  ;;  %v2740_v42 = vmul.f32 %v8658_v33, %v10630_v30  ;;  %v2433_v30 = vmul.f32 1.442695, %v10552_v55 }
 0x169   : > { %v8662_v34 = vpop.eup %8661  ;;  %v10649_v3 = vpop.f32.mrf.mxu0  ;;  %8693 = vpow2.f32 %v2421_v63  ;;  %v2844_v26 = vpack.c.bf16 %v9239_v56, %v9238_v45  ;;  %v9243_v45 = vld [vmem:[%s9414_s11 + $0x1d8] sm:$0xff] }
 0x16a   : > { %v10651_v2 = vpop.f32.mrf.mxu1  ;;  %v8664_v23 = vpop.eup %8663  ;;  %8695 = vtanh.f32 %v1257_v40  ;;  %v2739_v16 = vmul.f32 %v8662_v34, %v8660_v14  ;;  %v1277_v34 = vadd.f32 %v10515_v48, %v10550_v59 }
 0x16b   : > { %v8666_v46 = vpop.eup %8665  ;;  %v10656_v29 = vpop.f32.mrf.mxu0  ;;  %7923 = vmatmul.mubr.msk.bf16.gmra.mxu0 %vm2975_vm4, %v2906_v36  ;;  %8053 = vmatmul.mubr.msk.bf16.gmra.mxu1 %vm501_vm3, %v2840_v15  ;;  %8697 = vpow2.f32 %v2425_v18 }
 0x16c   : > { %v10658_v6 = vpop.f32.mrf.mxu1  ;;  %v8668_v21 = vpop.eup %8667  ;;  %7926 = vmatprep.mubr.msk.bf16.mxu0 %vm2975_vm4, %v2907_v49  ;;  %8056 = vmatprep.mubr.msk.bf16.mxu1 %vm501_vm3, %v2841_v22  ;;  %v2741_v44 = vmul.f32 %v8666_v46, %v8664_v23  ;;  %8699 = vtanh.f32 %v1262_v37  ;;  %v2843_v22 = vpack.c.bf16 %v9237_v38, %v9236_v39  ;;  %v2908_v36 = vpack.c.bf16 %v2740_v42, %v2739_v16  ;;  %v9241_v38 = vld [vmem:[%s9414_s11 + $0x1c8] sm:$0xff] }
 0x16d   : > { %v8670_v5 = vpop.eup %8669  ;;  %v10667_v58 = vpop.f32.mrf.mxu0  ;;  %8701 = vpow2.f32 %v2427_v32  ;;  %v2435_v37 = vmul.f32 1.442695, %v10535_v60  ;;  %v2439_v60 = vmul.f32 1.442695, %v10562_v19  ;;  %v9240_v19 = vld [vmem:[%s9414_s11 + $0x1c0] sm:$0xff] }
 0x16e   : > { %v10669_v4 = vpop.f32.mrf.mxu1  ;;  %v8672_v62 = vpop.eup %8671  ;;  %v2742_v63 = vmul.f32 %v8670_v5, %v8668_v21  ;;  %8703 = vtanh.f32 %v1272_v53 }
 0x16f   : > { %v8674_v1 = vpop.eup %8673  ;;  %v10676_v15 = vpop.f32.mrf.mxu0  ;;  %8705 = vpow2.f32 %v2431_v27  ;;  %v8447_v27 = vld [vmem:[%s12570_s7] sm:$0xff]  }
 0x170   : > { %v10678_v20 = vpop.f32.mrf.mxu1  ;;  %v8676_v14 = vpop.eup %8675  ;;  %v2909_v33 = vpack.c.bf16 %v2742_v63, %v2741_v44  ;;  %8707 = vtanh.f32 %v1267_v10  ;;  %8150 = vmatprep.subr.bf16.mxu0 %v8447_v27 }
 0x171   : > { %v8678_v0 = vpop.eup %8677  ;;  %v10686_v41 = vpop.f32.mrf.mxu0  ;;  %8709 = vpow2.f32 %v2429_v25  ;;  %v2437_v25 = vmul.f32 1.442695, %v10571_v35  ;;  %8151 = vmatpush3.bf16.msra.mxu0 %v8447_v27  ;;  %v1302_v35 = vadd.f32 %v10515_v48, %v10576_v61  ;;  %v1312_v61 = vadd.f32 %v10515_v48, %v10599_v12  ;;  %v9242_v27 = vld [vmem:[%s9414_s11 + $0x1d0] sm:$0xff] }
 0x172   : > { %v10688_v40 = vpop.f32.mrf.mxu1  ;;  %v8680_v23 = vpop.eup %8679  ;;  %8711 = vtanh.f32 %v1277_v34  ;;  %v2743_v5 = vmul.f32 %v8678_v0, %v8676_v14  ;;  %v2744_v14 = vmul.f32 %v8674_v1, %v8672_v62  ;;  %v1297_v34 = vadd.f32 %v10515_v48, %v10590_v11 }
 0x173   : > { %v8682_v18 = vpop.eup %8681  ;;  %v10693_v49 = vpop.f32.mrf.mxu0  ;;  %7927 = vmatmul.mubr.msk.bf16.gmra.mxu0 %vm2975_vm4, %v2908_v36  ;;  %8057 = vmatmul.mubr.msk.bf16.gmra.mxu1 %vm501_vm3, %v2842_v8  ;;  %8713 = vpow2.f32 %v2433_v30  ;;  %v1287_v8 = vadd.f32 %v10515_v48, %v10569_v7  ;;  %v2441_v1 = vmul.f32 1.442695, %v10592_v9  ;;  %v2443_v9 = vmul.f32 1.442695, %v10578_v24 }
 0x174   : > { %v10695_v46 = vpop.f32.mrf.mxu1  ;;  %v8684_v59 = vpop.eup %8683  ;;  %7930 = vmatprep.mubr.msk.bf16.mxu0 %vm2975_vm4, %v2909_v33  ;;  %8060 = vmatprep.mubr.msk.bf16.mxu1 %vm501_vm3, %v2843_v22  ;;  %v2745_v16 = vmul.f32 %v8682_v18, %v8680_v23  ;;  %8715 = vtanh.f32 %v1282_v43  ;;  %v2845_v22 = vpack.c.bf16 %v9241_v38, %v9240_v19  ;;  %v2910_v23 = vpack.c.bf16 %v2744_v14, %v2743_v5  ;;  %v9244_v19 = vld [vmem:[%s9414_s11 + $0x1e0] sm:$0xff]  ;;  %v9245_v38 = vld [vmem:[%s9414_s11 + $0x1e8] sm:$0xff] }
 0x175   : > { %v8686_v55 = vpop.eup %8685  ;;  %v10704_v21 = vpop.f32.mrf.mxu0  ;;  %8717 = vpow2.f32 %v2435_v37  ;;  %v2447_v24 = vmul.f32 1.442695, %v10601_v54  ;;  %v2846_v56 = vpack.c.bf16 %v9243_v45, %v9242_v27  ;;  %v1307_v12 = vadd.f32 %v10515_v48, %v10608_v50  ;;  %v9246_v27 = vld [vmem:[%s9414_s11 + $0x1f0] sm:$0xff] }
 0x176   : > { %v10706_v32 = vpop.f32.mrf.mxu1  ;;  %v10708_v53 = vpop.eup %8687  ;;  %v2746_v63 = vmul.f32 %v8686_v55, %v8684_v59  ;;  %8719 = vtanh.f32 %v1292_v28  ;;  %v2445_v54 = vmul.f32 1.442695, %v10610_v13  ;;  %v1322_v13 = vadd.f32 %v10515_v48, %v10615_v52 }
 0x177   : > { %v8690_v44 = vpop.eup %8689  ;;  %v10718_v10 = vpop.f32.mrf.mxu0  ;;  %8721 = vpow2.f32 %v2439_v60  ;;  %v1332_v52 = vadd.f32 %v10515_v48, %v10640_v17  ;;  %v9247_v17 = vld [vmem:[%s9414_s11 + $0x1f8] sm:$0xff] }
 0x178   : > { %v10720_v42 = vpop.f32.mrf.mxu1  ;;  %v8692_v39 = vpop.eup %8691  ;;  %v2911_v30 = vpack.c.bf16 %v2746_v63, %v2745_v16  ;;  %8723 = vtanh.f32 %v1287_v8  ;;  %v2748_v14 = vmul.f32 %v8690_v44, %v10708_v53  ;;  %v2449_v53 = vmul.f32 1.442695, %v10628_v47 }
 0x179   : > { %v8694_v0 = vpop.eup %8693  ;;  %v10727_v7 = vpop.f32.mrf.mxu0  ;;  %8725 = vpow2.f32 %v2437_v25  ;;  %v2848_v45 = vpack.c.bf16 %v9247_v17, %v9246_v27  ;;  %v9251_v27 = vld [vmem:[%s9414_s11 + $0x218] sm:$0xff] }
 0x17a   : > { %v10729_v36 = vpop.f32.mrf.mxu1  ;;  %v8696_v62 = vpop.eup %8695  ;;  %8727 = vtanh.f32 %v1297_v34  ;;  %v2747_v28 = vmul.f32 %v8694_v0, %v8692_v39  ;;  %v1317_v0 = vadd.f32 %v10515_v48, %v10626_v31 }
 0x17b   : > { %v8698_v33 = vpop.eup %8697  ;;  %v10734_v18 = vpop.f32.mrf.mxu0  ;;  %7931 = vmatmul.mubr.msk.bf16.gmra.mxu0 %vm2975_vm4, %v2910_v23  ;;  %8061 = vmatmul.mubr.msk.bf16.gmra.mxu1 %vm501_vm3, %v2844_v26  ;;  %8729 = vpow2.f32 %v2441_v1 }
 0x17c   : > { %v10736_v43 = vpop.f32.mrf.mxu1  ;;  %v8700_v11 = vpop.eup %8699  ;;  %7934 = vmatprep.mubr.msk.bf16.mxu0 %vm2975_vm4, %v2911_v30  ;;  %8064 = vmatprep.mubr.msk.bf16.mxu1 %vm501_vm3, %v2845_v22  ;;  %v2749_v60 = vmul.f32 %v8698_v33, %v8696_v62  ;;  %8731 = vtanh.f32 %v1302_v35  ;;  %v2847_v22 = vpack.c.bf16 %v9245_v38, %v9244_v19  ;;  %v2912_v23 = vpack.c.bf16 %v2748_v14, %v2747_v28  ;;  %v9249_v38 = vld [vmem:[%s9414_s11 + $0x208] sm:$0xff] }
 0x17d   : > { %v8702_v59 = vpop.eup %8701  ;;  %v10745_v37 = vpop.f32.mrf.mxu0  ;;  %8733 = vpow2.f32 %v2443_v9  ;;  %v2451_v35 = vmul.f32 1.442695, %v10617_v57  ;;  %v2455_v57 = vmul.f32 1.442695, %v10642_v51  ;;  %v9248_v51 = vld [vmem:[%s9414_s11 + $0x200] sm:$0xff] }
 0x17e   : > { %v10747_v55 = vpop.f32.mrf.mxu1  ;;  %v8704_v5 = vpop.eup %8703  ;;  %v2750_v25 = vmul.f32 %v8702_v59, %v8700_v11  ;;  %8735 = vtanh.f32 %v1312_v61 }
 0x17f   : > { %v8706_v16 = vpop.eup %8705  ;;  %v10754_v26 = vpop.f32.mrf.mxu0  ;;  %8737 = vpow2.f32 %v2447_v24  ;;  %v8448_v24 = vld [vmem:[%s12572_s9 + $0x30] sm:$0xff]  }
 0x180   : > { %v10756_v8 = vpop.f32.mrf.mxu1  ;;  %v8708_v39 = vpop.eup %8707  ;;  %v2913_v44 = vpack.c.bf16 %v2750_v25, %v2749_v60  ;;  %8739 = vtanh.f32 %v1307_v12  ;;  %8282 = vmatprep.subr.bf16.mxu1 %v8448_v24 }
 0x181   : > { %v8710_v63 = vpop.eup %8709  ;;  %v10764_v50 = vpop.f32.mrf.mxu0  ;;  %8741 = vpow2.f32 %v2445_v54  ;;  %v2453_v54 = vmul.f32 1.442695, %v10651_v2  ;;  %8283 = vmatpush3.bf16.msra.mxu1 %v8448_v24  ;;  %v1342_v2 = vadd.f32 %v10515_v48, %v10656_v29  ;;  %v1352_v29 = vadd.f32 %v10515_v48, %v10676_v15  ;;  %v9250_v24 = vld [vmem:[%s9414_s11 + $0x210] sm:$0xff] }
 0x182   : > { %v10766_v34 = vpop.f32.mrf.mxu1  ;;  %v8712_v62 = vpop.eup %8711  ;;  %8743 = vtanh.f32 %v1317_v0  ;;  %v2751_v59 = vmul.f32 %v8710_v63, %v8708_v39  ;;  %v2752_v39 = vmul.f32 %v8706_v16, %v8704_v5  ;;  %v1337_v0 = vadd.f32 %v10515_v48, %v10667_v58 }
 0x183   : > { %v8714_v1 = vpop.eup %8713  ;;  %v10771_v30 = vpop.f32.mrf.mxu0  ;;  %7935 = vmatmul.mubr.msk.bf16.gmra.mxu0 %vm2975_vm4, %v2912_v23  ;;  %8065 = vmatmul.mubr.msk.bf16.gmra.mxu1 %vm501_vm3, %v2846_v56  ;;  %8745 = vpow2.f32 %v2449_v53  ;;  %v1327_v56 = vadd.f32 %v10515_v48, %v10649_v3  ;;  %v2457_v16 = vmul.f32 1.442695, %v10669_v4  ;;  %v2459_v4 = vmul.f32 1.442695, %v10658_v6 }
 0x184   : > { %v10773_v33 = vpop.f32.mrf.mxu1  ;;  %v8716_v31 = vpop.eup %8715  ;;  %7938 = vmatprep.mubr.msk.bf16.mxu0 %vm2975_vm4, %v2913_v44  ;;  %8068 = vmatprep.mubr.msk.bf16.mxu1 %vm501_vm3, %v2847_v22  ;;  %v2753_v28 = vmul.f32 %v8714_v1, %v8712_v62  ;;  %8747 = vtanh.f32 %v1322_v13  ;;  %v2849_v22 = vpack.c.bf16 %v9249_v38, %v9248_v51  ;;  %v2914_v62 = vpack.c.bf16 %v2752_v39, %v2751_v59  ;;  %v9252_v51 = vld [vmem:[%s9414_s11 + $0x220] sm:$0xff]  ;;  %v9253_v38 = vld [vmem:[%s9414_s11 + $0x228] sm:$0xff] }
 0x185   : > { %v8718_v47 = vpop.eup %8717  ;;  %v10782_v11 = vpop.f32.mrf.mxu0  ;;  %8749 = vpow2.f32 %v2451_v35  ;;  %v2463_v6 = vmul.f32 1.442695, %v10678_v20  ;;  %v2850_v17 = vpack.c.bf16 %v9251_v27, %v9250_v24  ;;  %v1347_v15 = vadd.f32 %v10515_v48, %v10686_v41  ;;  %v9255_v24 = vld [vmem:[%s9414_s11 + $0x238] sm:$0xff] }
 0x186   : > { %v10784_v9 = vpop.f32.mrf.mxu1  ;;  %v10786_v61 = vpop.eup %8719  ;;  %v2754_v25 = vmul.f32 %v8718_v47, %v8716_v31  ;;  %8751 = vtanh.f32 %v1332_v52  ;;  %v2461_v20 = vmul.f32 1.442695, %v10688_v40  ;;  %v1362_v40 = vadd.f32 %v10515_v48, %v10693_v49 }
 0x187   : > { %v8722_v60 = vpop.eup %8721  ;;  %v10796_v12 = vpop.f32.mrf.mxu0  ;;  %8753 = vpow2.f32 %v2455_v57  ;;  %v1372_v49 = vadd.f32 %v10515_v48, %v10718_v10  ;;  %v1367_v10 = vadd.f32 %v10515_v48, %v10727_v7 }
 0x188   : > { %v10798_v14 = vpop.f32.mrf.mxu1  ;;  %v8724_v19 = vpop.eup %8723  ;;  %v2915_v53 = vpack.c.bf16 %v2754_v25, %v2753_v28  ;;  %8755 = vtanh.f32 %v1327_v56  ;;  %v2756_v39 = vmul.f32 %v8722_v60, %v10786_v61  ;;  %v2465_v61 = vmul.f32 1.442695, %v10706_v32 }
 0x189   : > { %v8726_v63 = vpop.eup %8725  ;;  %v10805_v3 = vpop.f32.mrf.mxu0  ;;  %8757 = vpow2.f32 %v2453_v54  ;;  %v2467_v32 = vmul.f32 1.442695, %v10695_v46  ;;  %v2471_v46 = vmul.f32 1.442695, %v10720_v42  ;;  %v2469_v42 = vmul.f32 1.442695, %v10729_v36 }
 0x18a   : > { %v10807_v23 = vpop.f32.mrf.mxu1  ;;  %v8728_v5 = vpop.eup %8727  ;;  %8759 = vtanh.f32 %v1337_v0  ;;  %v2755_v52 = vmul.f32 %v8726_v63, %v8724_v19  ;;  %v1357_v63 = vadd.f32 %v10515_v48, %v10704_v21  ;;  %v1382_v36 = vadd.f32 %v10515_v48, %v10734_v18 }
 0x18b   : > { %v8730_v44 = vpop.eup %8729  ;;  %v10812_v1 = vpop.f32.mrf.mxu0  ;;  %7939 = vmatmul.mubr.msk.bf16.gmra.mxu0 %vm2975_vm4, %v2914_v62  ;;  %8069 = vmatmul.mubr.msk.bf16.gmra.mxu1 %vm501_vm3, %v2848_v45  ;;  %8761 = vpow2.f32 %v2457_v16  ;;  %v1392_v18 = vadd.f32 %v10515_v48, %v10754_v26  ;;  %v1387_v26 = vadd.f32 %v10515_v48, %v10764_v50 }
 0x18c   : > { %v10814_v13 = vpop.f32.mrf.mxu1  ;;  %v8732_v58 = vpop.eup %8731  ;;  %7942 = vmatprep.mubr.msk.bf16.mxu0 %vm2975_vm4, %v2915_v53  ;;  %8072 = vmatprep.mubr.msk.bf16.mxu1 %vm501_vm3, %v2849_v22  ;;  %v2757_v57 = vmul.f32 %v8730_v44, %v8728_v5  ;;  %8763 = vtanh.f32 %v1342_v2  ;;  %v2851_v22 = vpack.c.bf16 %v9253_v38, %v9252_v51  ;;  %v2916_v62 = vpack.c.bf16 %v2756_v39, %v2755_v52  ;;  %v9256_v51 = vld [vmem:[%s9414_s11 + $0x240] sm:$0xff]  ;;  %v9257_v38 = vld [vmem:[%s9414_s11 + $0x248] sm:$0xff] }
 0x18d   : > { %v8734_v31 = vpop.eup %8733  ;;  %v10823_v35 = vpop.f32.mrf.mxu0  ;;  %8765 = vpow2.f32 %v2459_v4 }
 0x18e   : > { %v10825_v47 = vpop.f32.mrf.mxu1  ;;  %v8736_v59 = vpop.eup %8735  ;;  %v2758_v54 = vmul.f32 %v8734_v31, %v8732_v58  ;;  %8767 = vtanh.f32 %v1352_v29 }
 0x18f   : > { %v8738_v28 = vpop.eup %8737  ;;  %v10832_v45 = vpop.f32.mrf.mxu0  ;;  %8769 = vpow2.f32 %v2463_v6 }
 0x190   : > { %v10834_v56 = vpop.f32.mrf.mxu1  ;;  %v8740_v19 = vpop.eup %8739  ;;  %v2917_v60 = vpack.c.bf16 %v2758_v54, %v2757_v57  ;;  %8771 = vtanh.f32 %v1347_v15  ;;  %v9254_v57 = vld [vmem:[%s9414_s11 + $0x230] sm:$0xff]  ;;  %v2760_v39 = vmul.f32 %v8738_v28, %v8736_v59  ;;  %v2473_v59 = vmul.f32 1.442695, %v10747_v55 }
 0x191   : > { %v8742_v25 = vpop.eup %8741  ;;  %v10842_v41 = vpop.f32.mrf.mxu0  ;;  %8773 = vpow2.f32 %v2461_v20  ;;  %v2852_v27 = vpack.c.bf16 %v9255_v24, %v9254_v57  ;;  %v2475_v55 = vmul.f32 1.442695, %v10736_v43  ;;  %v2479_v43 = vmul.f32 1.442695, %v10756_v8  ;;  %v9259_v57 = vld [vmem:[%s9414_s11 + $0x258] sm:$0xff] }
 0x192   : > { %v10844_v0 = vpop.f32.mrf.mxu1  ;;  %v8744_v5 = vpop.eup %8743  ;;  %8775 = vtanh.f32 %v1357_v63  ;;  %v2759_v31 = vmul.f32 %v8742_v25, %v8740_v19  ;;  %v1377_v25 = vadd.f32 %v10515_v48, %v10745_v37  ;;  %v2477_v8 = vmul.f32 1.442695, %v10766_v34 }
 0x193   : > { %v8746_v16 = vpop.eup %8745  ;;  %v10849_v53 = vpop.f32.mrf.mxu0  ;;  %7943 = vmatmul.mubr.msk.bf16.gmra.mxu0 %vm2975_vm4, %v2916_v62  ;;  %8073 = vmatmul.mubr.msk.bf16.gmra.mxu1 %vm501_vm3, %v2850_v17  ;;  %8777 = vpow2.f32 %v2465_v61  ;;  %v1402_v34 = vadd.f32 %v10515_v48, %v10771_v30  ;;  %v1412_v30 = vadd.f32 %v10515_v48, %v10796_v12  ;;  %v9263_v12 = vld [vmem:[%s9414_s11 + $0x278] sm:$0xff] }
 0x194   : > { %v10851_v44 = vpop.f32.mrf.mxu1  ;;  %v8748_v21 = vpop.eup %8747  ;;  %7946 = vmatprep.mubr.msk.bf16.mxu0 %vm2975_vm4, %v2917_v60  ;;  %8076 = vmatprep.mubr.msk.bf16.mxu1 %vm501_vm3, %v2851_v22  ;;  %v2761_v52 = vmul.f32 %v8746_v16, %v8744_v5  ;;  %8779 = vtanh.f32 %v1362_v40  ;;  %v2853_v22 = vpack.c.bf16 %v9257_v38, %v9256_v51  ;;  %v2918_v62 = vpack.c.bf16 %v2760_v39, %v2759_v31  ;;  %v9260_v51 = vld [vmem:[%s9414_s11 + $0x260] sm:$0xff]  ;;  %v9261_v38 = vld [vmem:[%s9414_s11 + $0x268] sm:$0xff] }
 0x195   : > { %v8750_v2 = vpop.eup %8749  ;;  %v10860_v58 = vpop.f32.mrf.mxu0  ;;  %8781 = vpow2.f32 %v2467_v32 }
 0x196   : > { %v10862_v4 = vpop.f32.mrf.mxu1  ;;  %v8752_v29 = vpop.eup %8751  ;;  %v2762_v20 = vmul.f32 %v8750_v2, %v8748_v21  ;;  %8783 = vtanh.f32 %v1372_v49 }
 0x197   : > { %v8754_v6 = vpop.eup %8753  ;;  %v10869_v17 = vpop.f32.mrf.mxu0  ;;  %8785 = vpow2.f32 %v2471_v46 }
 0x198   : > { %v10871_v15 = vpop.f32.mrf.mxu1  ;;  %v8756_v19 = vpop.eup %8755  ;;  %v2919_v28 = vpack.c.bf16 %v2762_v20, %v2761_v52  ;;  %8787 = vtanh.f32 %v1367_v10  ;;  %v9258_v52 = vld [vmem:[%s9414_s11 + $0x250] sm:$0xff]  ;;  %v2764_v39 = vmul.f32 %v8754_v6, %v8752_v29  ;;  %v2481_v29 = vmul.f32 1.442695, %v10784_v9 }
 0x199   : > { %v8758_v54 = vpop.eup %8757  ;;  %v10878_v63 = vpop.f32.mrf.mxu0  ;;  %8789 = vpow2.f32 %v2469_v42  ;;  %v2854_v24 = vpack.c.bf16 %v9259_v57, %v9258_v52  ;;  %v9262_v52 = vld [vmem:[%s9414_s11 + $0x270] sm:$0xff] }
 0x19a   : > { %v10880_v7 = vpop.f32.mrf.mxu1  ;;  %v8760_v5 = vpop.eup %8759  ;;  %8791 = vtanh.f32 %v1377_v25  ;;  %v2763_v2 = vmul.f32 %v8758_v54, %v8756_v19  ;;  %v1397_v54 = vadd.f32 %v10515_v48, %v10782_v11  ;;  %v2856_v57 = vpack.c.bf16 %v9263_v12, %v9262_v52  ;;  %v9268_v52 = vld [vmem:[%s9414_s11 + $0x298] sm:$0xff] }
 0x19b   : > { %v8762_v61 = vpop.eup %8761  ;;  %v10885_v60 = vpop.f32.mrf.mxu0  ;;  %7947 = vmatmul.mubr.msk.bf16.gmra.mxu0 %vm2975_vm4, %v2918_v62  ;;  %8077 = vmatmul.mubr.msk.bf16.gmra.mxu1 %vm501_vm3, %v2852_v27  ;;  %8793 = vpow2.f32 %v2473_v59 }
 0x19c   : > { %v10887_v16 = vpop.f32.mrf.mxu1  ;;  %v8764_v37 = vpop.eup %8763  ;;  %7950 = vmatprep.mubr.msk.bf16.mxu0 %vm2975_vm4, %v2919_v28  ;;  %8080 = vmatprep.mubr.msk.bf16.mxu1 %vm501_vm3, %v2853_v22  ;;  %v2765_v31 = vmul.f32 %v8762_v61, %v8760_v5  ;;  %8795 = vtanh.f32 %v1382_v36  ;;  %v2855_v22 = vpack.c.bf16 %v9261_v38, %v9260_v51  ;;  %v2920_v62 = vpack.c.bf16 %v2764_v39, %v2763_v2  ;;  %v9265_v38 = vld [vmem:[%s9414_s11 + $0x288] sm:$0xff] }
 0x19d   : > { %v8766_v40 = vpop.eup %8765  ;;  %v10896_v21 = vpop.f32.mrf.mxu0  ;;  %8797 = vpow2.f32 %v2475_v55  ;;  %v2483_v36 = vmul.f32 1.442695, %v10773_v33  ;;  %v2487_v33 = vmul.f32 1.442695, %v10798_v14  ;;  %v9264_v14 = vld [vmem:[%s9414_s11 + $0x280] sm:$0xff] }
 0x19e   : > { %v10898_v32 = vpop.f32.mrf.mxu1  ;;  %v8768_v49 = vpop.eup %8767  ;;  %v2766_v42 = vmul.f32 %v8766_v40, %v8764_v37  ;;  %8799 = vtanh.f32 %v1392_v18 }
 0x19f   : > { %v8770_v46 = vpop.eup %8769  ;;  %v10905_v27 = vpop.f32.mrf.mxu0  ;;  %8801 = vpow2.f32 %v2479_v43  ;;  %v8449_v43 = vld [vmem:[%s12572_s9 + $0x28] sm:$0xff]  }
 0x1a0   : > { %v10907_v10 = vpop.f32.mrf.mxu1  ;;  %v8772_v19 = vpop.eup %8771  ;;  %v2921_v6 = vpack.c.bf16 %v2766_v42, %v2765_v31  ;;  %8803 = vtanh.f32 %v1387_v26  ;;  %8284 = vmatprep.subr.bf16.mxu1 %v8449_v43 }
 0x1a1   : > { %v8774_v20 = vpop.eup %8773  ;;  %v10914_v25 = vpop.f32.mrf.mxu0  ;;  %8805 = vpow2.f32 %v2477_v8  ;;  %v2485_v8 = vmul.f32 1.442695, %v10807_v23  ;;  %8285 = vmatpush3.bf16.msra.mxu1 %v8449_v43  ;;  %v10963_v23 = vld [vmem:[%s12566_s3] ss:$0 sm:$0xff]  ;;  %v9267_v43 = vld [vmem:[%s9414_s11 + $0x290] sm:$0xff] }
 0x1a2   : > { %v10916_v50 = vpop.f32.mrf.mxu1  ;;  %v8776_v5 = vpop.eup %8775  ;;  %8807 = vtanh.f32 %v1397_v54  ;;  %v2767_v40 = vmul.f32 %v8774_v20, %v8772_v19  ;;  %v2768_v19 = vmul.f32 %v8770_v46, %v8768_v49  ;;  %v1417_v54 = vadd.f32 %v10515_v48, %v10823_v35 }
 0x1a3   : > { %v8778_v59 = vpop.eup %8777  ;;  %v10921_v28 = vpop.f32.mrf.mxu0  ;;  %7951 = vmatmul.mubr.msk.bf16.gmra.mxu0 %vm2975_vm4, %v2920_v62  ;;  %8081 = vmatmul.mubr.msk.bf16.gmra.mxu1 %vm501_vm3, %v2854_v24  ;;  %8809 = vpow2.f32 %v2481_v29  ;;  %v1407_v24 = vadd.f32 %v10515_v48, %v10805_v3  ;;  %v2489_v46 = vmul.f32 1.442695, %v10825_v47  ;;  %v1422_v48 = vadd.f32 %v10963_v23, %v10812_v1 }
 0x1a4   : > { %v10923_v61 = vpop.f32.mrf.mxu1  ;;  %v8780_v11 = vpop.eup %8779  ;;  %7954 = vmatprep.mubr.msk.bf16.mxu0 %vm2975_vm4, %v2921_v6  ;;  %8084 = vmatprep.mubr.msk.bf16.mxu1 %vm501_vm3, %v2855_v22  ;;  %v2769_v2 = vmul.f32 %v8778_v59, %v8776_v5  ;;  %8811 = vtanh.f32 %v1402_v34  ;;  %v2857_v22 = vpack.c.bf16 %v9265_v38, %v9264_v14  ;;  %v2922_v5 = vpack.c.bf16 %v2768_v19, %v2767_v40  ;;  %v9269_v14 = vld [vmem:[%s9414_s11 + $0x2a0] sm:$0xff]  ;;  %v9270_v38 = vld [vmem:[%s9414_s11 + $0x2a8] sm:$0xff] }
 0x1a5   : > { %v8782_v9 = vpop.eup %8781  ;;  %v10932_v37 = vpop.f32.mrf.mxu0  ;;  %8813 = vpow2.f32 %v2483_v36  ;;  %v2491_v34 = vmul.f32 1.442695, %v10814_v13  ;;  %v1432_v1 = vadd.f32 %v10963_v23, %v10832_v45  ;;  %v2495_v13 = vmul.f32 1.442695, %v10834_v56 }
 0x1a6   : > { %v10934_v55 = vpop.f32.mrf.mxu1  ;;  %v10936_v18 = vpop.eup %8783  ;;  %v2770_v42 = vmul.f32 %v8782_v9, %v8780_v11  ;;  %8815 = vtanh.f32 %v1412_v30  ;;  %v2858_v12 = vpack.c.bf16 %v9268_v52, %v9267_v43  ;;  %v1427_v45 = vadd.f32 %v10963_v23, %v10842_v41  ;;  %v9272_v43 = vld [vmem:[%s9414_s11 + $0x2b8] sm:$0xff] }
 0x1a7   : > { %v8786_v31 = vpop.eup %8785  ;;  %v10946_v26 = vpop.f32.mrf.mxu0  ;;  %8817 = vpow2.f32 %v2487_v33  ;;  %v2493_v56 = vmul.f32 1.442695, %v10844_v0  ;;  %v1442_v0 = vadd.f32 %v10963_v23, %v10849_v53  ;;  %v1452_v53 = vadd.f32 %v10963_v23, %v10869_v17 }
 0x1a8   : > { %v10948_v39 = vpop.f32.mrf.mxu1  ;;  %v8788_v51 = vpop.eup %8787  ;;  %v2923_v29 = vpack.c.bf16 %v2770_v42, %v2769_v2  ;;  %8819 = vtanh.f32 %v1407_v24  ;;  %v2772_v19 = vmul.f32 %v8786_v31, %v10936_v18  ;;  %v2497_v18 = vmul.f32 1.442695, %v10862_v4 }
 0x1a9   : > { %v8790_v20 = vpop.eup %8789  ;;  %v10955_v3 = vpop.f32.mrf.mxu0  ;;  %8821 = vpow2.f32 %v2485_v8  ;;  %v2499_v4 = vmul.f32 1.442695, %v10851_v44  ;;  %v2503_v44 = vmul.f32 1.442695, %v10871_v15  ;;  %v1447_v17 = vadd.f32 %v10963_v23, %v10878_v63 }
 0x1aa   : > { %v10957_v62 = vpop.f32.mrf.mxu1  ;;  %v8792_v49 = vpop.eup %8791  ;;  %8823 = vtanh.f32 %v1417_v54  ;;  %v2771_v30 = vmul.f32 %v8790_v20, %v8788_v51  ;;  %v1437_v20 = vadd.f32 %v10963_v23, %v10860_v58  ;;  %v2501_v15 = vmul.f32 1.442695, %v10880_v7 }
 0x1ab   : > { %v8794_v6 = vpop.eup %8793  ;;  %v10967_v35 = vpop.f32.mrf.mxu0  ;;  %7955 = vmatmul.mubr.msk.bf16.gmra.mxu0 %vm2975_vm4, %v2922_v5  ;;  %8085 = vmatmul.mubr.msk.bf16.gmra.mxu1 %vm501_vm3, %v2856_v57  ;;  %8825 = vpow2.f32 %v2489_v46  ;;  %v1462_v7 = vadd.f32 %v10963_v23, %v10885_v60  ;;  %v1472_v60 = vadd.f32 %v10963_v23, %v10905_v27  ;;  %v1467_v27 = vadd.f32 %v10963_v23, %v10914_v25 }
 0x1ac   : > { %v10969_v59 = vpop.f32.mrf.mxu1  ;;  %v8796_v47 = vpop.eup %8795  ;;  %7958 = vmatprep.mubr.msk.bf16.mxu0 %vm2975_vm4, %v2923_v29  ;;  %8088 = vmatprep.mubr.msk.bf16.mxu1 %vm501_vm3, %v2857_v22  ;;  %v2773_v33 = vmul.f32 %v8794_v6, %v8792_v49  ;;  %8827 = vtanh.f32 %v1422_v48  ;;  %v2859_v22 = vpack.c.bf16 %v9270_v38, %v9269_v14  ;;  %v2924_v5 = vpack.c.bf16 %v2772_v19, %v2771_v30  ;;  %v9273_v14 = vld [vmem:[%s9414_s11 + $0x2c0] sm:$0xff]  ;;  %v9274_v38 = vld [vmem:[%s9414_s11 + $0x2c8] sm:$0xff] }
 0x1ad   : > { %v8798_v11 = vpop.eup %8797  ;;  %v10978_v36 = vpop.f32.mrf.mxu0  ;;  %8829 = vpow2.f32 %v2491_v34 }
 0x1ae   : > { %v10980_v9 = vpop.f32.mrf.mxu1  ;;  %v8800_v40 = vpop.eup %8799  ;;  %v2774_v8 = vmul.f32 %v8798_v11, %v8796_v47  ;;  %8831 = vtanh.f32 %v1432_v1 }
 0x1af   : > { %v8802_v2 = vpop.eup %8801  ;;  %v10987_v57 = vpop.f32.mrf.mxu0  ;;  %8833 = vpow2.f32 %v2495_v13 }
 0x1b0   : > { %v10989_v24 = vpop.f32.mrf.mxu1  ;;  %v8804_v51 = vpop.eup %8803  ;;  %v2925_v31 = vpack.c.bf16 %v2774_v8, %v2773_v33  ;;  %8835 = vtanh.f32 %v1427_v45  ;;  %v9271_v33 = vld [vmem:[%s9414_s11 + $0x2b0] sm:$0xff]  ;;  %v2776_v19 = vmul.f32 %v8802_v2, %v8800_v40  ;;  %v2505_v40 = vmul.f32 1.442695, %v10898_v32 }
 0x1b1   : > { %v8806_v42 = vpop.eup %8805  ;;  %v10997_v41 = vpop.f32.mrf.mxu0  ;;  %8837 = vpow2.f32 %v2493_v56  ;;  %v2860_v52 = vpack.c.bf16 %v9272_v43, %v9271_v33  ;;  %v2507_v32 = vmul.f32 1.442695, %v10887_v16  ;;  %v2511_v16 = vmul.f32 1.442695, %v10907_v10  ;;  %v9276_v33 = vld [vmem:[%s9414_s11 + $0x2d8] sm:$0xff] }
 0x1b2   : > { %v10999_v54 = vpop.f32.mrf.mxu1  ;;  %v8808_v49 = vpop.eup %8807  ;;  %8839 = vtanh.f32 %v1437_v20  ;;  %v2775_v11 = vmul.f32 %v8806_v42, %v8804_v51  ;;  %v1457_v42 = vadd.f32 %v10963_v23, %v10896_v21  ;;  %v2509_v10 = vmul.f32 1.442695, %v10916_v50 }
 0x1b3   : > { %v8810_v46 = vpop.eup %8809  ;;  %v11004_v29 = vpop.f32.mrf.mxu0  ;;  %7959 = vmatmul.mubr.msk.bf16.gmra.mxu0 %vm2975_vm4, %v2924_v5  ;;  %8089 = vmatmul.mubr.msk.bf16.gmra.mxu1 %vm501_vm3, %v2858_v12  ;;  %8841 = vpow2.f32 %v2497_v18  ;;  %v1482_v50 = vadd.f32 %v10963_v23, %v10921_v28  ;;  %v1492_v28 = vadd.f32 %v10963_v23, %v10946_v26  ;;  %v9280_v26 = vld [vmem:[%s9414_s11 + $0x2f8] sm:$0xff] }
 0x1b4   : > { %v11006_v6 = vpop.f32.mrf.mxu1  ;;  %v8812_v58 = vpop.eup %8811  ;;  %7962 = vmatprep.mubr.msk.bf16.mxu0 %vm2975_vm4, %v2925_v31  ;;  %8092 = vmatprep.mubr.msk.bf16.mxu1 %vm501_vm3, %v2859_v22  ;;  %v2777_v30 = vmul.f32 %v8810_v46, %v8808_v49  ;;  %8843 = vtanh.f32 %v1442_v0  ;;  %v2861_v22 = vpack.c.bf16 %v9274_v38, %v9273_v14  ;;  %v2926_v5 = vpack.c.bf16 %v2776_v19, %v2775_v11  ;;  %v9277_v14 = vld [vmem:[%s9414_s11 + $0x2e0] sm:$0xff]  ;;  %v9278_v38 = vld [vmem:[%s9414_s11 + $0x2e8] sm:$0xff] }
 0x1b5   : > { %v8814_v48 = vpop.eup %8813  ;;  %v11015_v47 = vpop.f32.mrf.mxu0  ;;  %8845 = vpow2.f32 %v2499_v4 }
 0x1b6   : > { %v11017_v34 = vpop.f32.mrf.mxu1  ;;  %v8816_v1 = vpop.eup %8815  ;;  %v2778_v56 = vmul.f32 %v8814_v48, %v8812_v58  ;;  %8847 = vtanh.f32 %v1452_v53 }
 0x1b7   : > { %v8818_v13 = vpop.eup %8817  ;;  %v11024_v12 = vpop.f32.mrf.mxu0  ;;  %8849 = vpow2.f32 %v2503_v44 }
 0x1b8   : > { %v11026_v45 = vpop.f32.mrf.mxu1  ;;  %v8820_v51 = vpop.eup %8819  ;;  %v2927_v2 = vpack.c.bf16 %v2778_v56, %v2777_v30  ;;  %8851 = vtanh.f32 %v1447_v17  ;;  %v9275_v30 = vld [vmem:[%s9414_s11 + $0x2d0] sm:$0xff]  ;;  %v2780_v19 = vmul.f32 %v8818_v13, %v8816_v1  ;;  %v2513_v1 = vmul.f32 1.442695, %v10934_v55 }
 0x1b9   : > { %v8822_v8 = vpop.eup %8821  ;;  %v11033_v20 = vpop.f32.mrf.mxu0  ;;  %8853 = vpow2.f32 %v2501_v15  ;;  %v2862_v43 = vpack.c.bf16 %v9276_v33, %v9275_v30  ;;  %v9279_v30 = vld [vmem:[%s9414_s11 + $0x2f0] sm:$0xff] }
 0x1ba   : > { %v11035_v63 = vpop.f32.mrf.mxu1  ;;  %v8824_v49 = vpop.eup %8823  ;;  %8855 = vtanh.f32 %v1457_v42  ;;  %v2779_v48 = vmul.f32 %v8822_v8, %v8820_v51  ;;  %v1477_v8 = vadd.f32 %v10963_v23, %v10932_v37  ;;  %v2864_v33 = vpack.c.bf16 %v9280_v26, %v9279_v30  ;;  %v9284_v30 = vld [vmem:[%s9414_s11 + $0x318] sm:$0xff] }
 0x1bb   : > { %v8826_v18 = vpop.eup %8825  ;;  %v11040_v31 = vpop.f32.mrf.mxu0  ;;  %7963 = vmatmul.mubr.msk.bf16.gmra.mxu0 %vm2975_vm4, %v2926_v5  ;;  %8093 = vmatmul.mubr.msk.bf16.gmra.mxu1 %vm501_vm3, %v2860_v52  ;;  %8857 = vpow2.f32 %v2505_v40 }
 0x1bc   : > { %v11042_v46 = vpop.f32.mrf.mxu1  ;;  %v8828_v21 = vpop.eup %8827  ;;  %7966 = vmatprep.mubr.msk.bf16.mxu0 %vm2975_vm4, %v2927_v2  ;;  %8096 = vmatprep.mubr.msk.bf16.mxu1 %vm501_vm3, %v2861_v22  ;;  %v2781_v11 = vmul.f32 %v8826_v18, %v8824_v49  ;;  %8859 = vtanh.f32 %v1462_v7  ;;  %v2863_v22 = vpack.c.bf16 %v9278_v38, %v9277_v14  ;;  %v2928_v5 = vpack.c.bf16 %v2780_v19, %v2779_v48  ;;  %v9282_v38 = vld [vmem:[%s9414_s11 + $0x308] sm:$0xff] }
 0x1bd   : > { %v8830_v0 = vpop.eup %8829  ;;  %v11051_v58 = vpop.f32.mrf.mxu0  ;;  %8861 = vpow2.f32 %v2507_v32  ;;  %v2515_v7 = vmul.f32 1.442695, %v10923_v61  ;;  %v2519_v61 = vmul.f32 1.442695, %v10948_v39  ;;  %v9281_v39 = vld [vmem:[%s9414_s11 + $0x300] sm:$0xff] }
 0x1be   : > { %v11053_v4 = vpop.f32.mrf.mxu1  ;;  %v8832_v53 = vpop.eup %8831  ;;  %v2782_v15 = vmul.f32 %v8830_v0, %v8828_v21  ;;  %8863 = vtanh.f32 %v1472_v60 }
 0x1bf   : > { %v8834_v44 = vpop.eup %8833  ;;  %v11060_v52 = vpop.f32.mrf.mxu0  ;;  %8865 = vpow2.f32 %v2511_v16  ;;  %v8450_v16 = vld [vmem:[%s12572_s9 + $0x20] sm:$0xff]  }
 0x1c0   : > { %v11062_v17 = vpop.f32.mrf.mxu1  ;;  %v8836_v51 = vpop.eup %8835  ;;  %v2929_v13 = vpack.c.bf16 %v2782_v15, %v2781_v11  ;;  %8867 = vtanh.f32 %v1467_v27  ;;  %8286 = vmatprep.subr.bf16.mxu1 %v8450_v16 }
 0x1c1   : > { %v8838_v56 = vpop.eup %8837  ;;  %v11069_v42 = vpop.f32.mrf.mxu0  ;;  %8869 = vpow2.f32 %v2509_v10  ;;  %v2517_v10 = vmul.f32 1.442695, %v10957_v62  ;;  %8287 = vmatpush3.bf16.msra.mxu1 %v8450_v16  ;;  %v1502_v62 = vadd.f32 %v10963_v23, %v10967_v35  ;;  %v1512_v35 = vadd.f32 %v10963_v23, %v10987_v57  ;;  %v9283_v16 = vld [vmem:[%s9414_s11 + $0x310] sm:$0xff] }
 0x1c2   : > { %v11071_v25 = vpop.f32.mrf.mxu1  ;;  %v8840_v49 = vpop.eup %8839  ;;  %8871 = vtanh.f32 %v1477_v8  ;;  %v2783_v0 = vmul.f32 %v8838_v56, %v8836_v51  ;;  %v2784_v51 = vmul.f32 %v8834_v44, %v8832_v53  ;;  %v1497_v8 = vadd.f32 %v10963_v23, %v10978_v36 }
 0x1c3   : > { %v8842_v40 = vpop.eup %8841  ;;  %v11076_v2 = vpop.f32.mrf.mxu0  ;;  %7967 = vmatmul.mubr.msk.bf16.gmra.mxu0 %vm2975_vm4, %v2928_v5  ;;  %8097 = vmatmul.mubr.msk.bf16.gmra.mxu1 %vm501_vm3, %v2862_v43  ;;  %8873 = vpow2.f32 %v2513_v1  ;;  %v1487_v43 = vadd.f32 %v10963_v23, %v10955_v3  ;;  %v2521_v44 = vmul.f32 1.442695, %v10980_v9  ;;  %v2523_v9 = vmul.f32 1.442695, %v10969_v59 }
 0x1c4   : > { %v11078_v18 = vpop.f32.mrf.mxu1  ;;  %v8844_v37 = vpop.eup %8843  ;;  %7970 = vmatprep.mubr.msk.bf16.mxu0 %vm2975_vm4, %v2929_v13  ;;  %8100 = vmatprep.mubr.msk.bf16.mxu1 %vm501_vm3, %v2863_v22  ;;  %v2785_v48 = vmul.f32 %v8842_v40, %v8840_v49  ;;  %8875 = vtanh.f32 %v1482_v50  ;;  %v2865_v22 = vpack.c.bf16 %v9282_v38, %v9281_v39  ;;  %v2930_v49 = vpack.c.bf16 %v2784_v51, %v2783_v0  ;;  %v9285_v39 = vld [vmem:[%s9414_s11 + $0x320] sm:$0xff]  ;;  %v9286_v38 = vld [vmem:[%s9414_s11 + $0x328] sm:$0xff] }
 0x1c5   : > { %v8846_v55 = vpop.eup %8845  ;;  %v11087_v21 = vpop.f32.mrf.mxu0  ;;  %8877 = vpow2.f32 %v2515_v7  ;;  %v2527_v59 = vmul.f32 1.442695, %v10989_v24  ;;  %v2866_v26 = vpack.c.bf16 %v9284_v30, %v9283_v16  ;;  %v1507_v57 = vadd.f32 %v10963_v23, %v10997_v41  ;;  %v9288_v16 = vld [vmem:[%s9414_s11 + $0x338] sm:$0xff] }
 0x1c6   : > { %v11089_v32 = vpop.f32.mrf.mxu1  ;;  %v11091_v60 = vpop.eup %8847  ;;  %v2786_v15 = vmul.f32 %v8846_v55, %v8844_v37  ;;  %8879 = vtanh.f32 %v1492_v28  ;;  %v2525_v24 = vmul.f32 1.442695, %v10999_v54  ;;  %v1522_v54 = vadd.f32 %v10963_v23, %v11004_v29 }
 0x1c7   : > { %v8850_v11 = vpop.eup %8849  ;;  %v11101_v27 = vpop.f32.mrf.mxu0  ;;  %8881 = vpow2.f32 %v2519_v61  ;;  %v1532_v29 = vadd.f32 %v10963_v23, %v11024_v12  ;;  %v1527_v12 = vadd.f32 %v10963_v23, %v11033_v20 }
 0x1c8   : > { %v11103_v19 = vpop.f32.mrf.mxu1  ;;  %v8852_v14 = vpop.eup %8851  ;;  %v2931_v1 = vpack.c.bf16 %v2786_v15, %v2785_v48  ;;  %8883 = vtanh.f32 %v1487_v43  ;;  %v2788_v51 = vmul.f32 %v8850_v11, %v11091_v60  ;;  %v2529_v60 = vmul.f32 1.442695, %v11017_v34 }
 0x1c9   : > { %v8854_v56 = vpop.eup %8853  ;;  %v11110_v3 = vpop.f32.mrf.mxu0  ;;  %8885 = vpow2.f32 %v2517_v10  ;;  %v2531_v34 = vmul.f32 1.442695, %v11006_v6  ;;  %v2535_v6 = vmul.f32 1.442695, %v11026_v45  ;;  %v2533_v45 = vmul.f32 1.442695, %v11035_v63 }
 0x1ca   : > { %v11112_v5 = vpop.f32.mrf.mxu1  ;;  %v8856_v53 = vpop.eup %8855  ;;  %8887 = vtanh.f32 %v1497_v8  ;;  %v2787_v28 = vmul.f32 %v8854_v56, %v8852_v14  ;;  %v1517_v56 = vadd.f32 %v10963_v23, %v11015_v47  ;;  %v1542_v63 = vadd.f32 %v10963_v23, %v11040_v31 }
 0x1cb   : > { %v8858_v13 = vpop.eup %8857  ;;  %v11117_v40 = vpop.f32.mrf.mxu0  ;;  %7971 = vmatmul.mubr.msk.bf16.gmra.mxu0 %vm2975_vm4, %v2930_v49  ;;  %8101 = vmatmul.mubr.msk.bf16.gmra.mxu1 %vm501_vm3, %v2864_v33  ;;  %8889 = vpow2.f32 %v2521_v44  ;;  %v1552_v31 = vadd.f32 %v10963_v23, %v11060_v52  ;;  %v1547_v52 = vadd.f32 %v10963_v23, %v11069_v42 }
 0x1cc   : > { %v11119_v50 = vpop.f32.mrf.mxu1  ;;  %v8860_v36 = vpop.eup %8859  ;;  %7974 = vmatprep.mubr.msk.bf16.mxu0 %vm2975_vm4, %v2931_v1  ;;  %8104 = vmatprep.mubr.msk.bf16.mxu1 %vm501_vm3, %v2865_v22  ;;  %v2789_v61 = vmul.f32 %v8858_v13, %v8856_v53  ;;  %8891 = vtanh.f32 %v1502_v62  ;;  %v2867_v22 = vpack.c.bf16 %v9286_v38, %v9285_v39  ;;  %v2932_v49 = vpack.c.bf16 %v2788_v51, %v2787_v28  ;;  %v9289_v39 = vld [vmem:[%s9414_s11 + $0x340] sm:$0xff]  ;;  %v9290_v38 = vld [vmem:[%s9414_s11 + $0x348] sm:$0xff] }
 0x1cd   : > { %v8862_v37 = vpop.eup %8861  ;;  %v11128_v7 = vpop.f32.mrf.mxu0  ;;  %8893 = vpow2.f32 %v2523_v9 }
 0x1ce   : > { %v11130_v55 = vpop.f32.mrf.mxu1  ;;  %v8864_v0 = vpop.eup %8863  ;;  %v2790_v10 = vmul.f32 %v8862_v37, %v8860_v36  ;;  %8895 = vtanh.f32 %v1512_v35 }
 0x1cf   : > { %v8866_v48 = vpop.eup %8865  ;;  %v11137_v33 = vpop.f32.mrf.mxu0  ;;  %8897 = vpow2.f32 %v2527_v59 }
 0x1d0   : > { %v11139_v43 = vpop.f32.mrf.mxu1  ;;  %v8868_v14 = vpop.eup %8867  ;;  %v2933_v11 = vpack.c.bf16 %v2790_v10, %v2789_v61  ;;  %8899 = vtanh.f32 %v1507_v57  ;;  %v9287_v61 = vld [vmem:[%s9414_s11 + $0x330] sm:$0xff]  ;;  %v2792_v51 = vmul.f32 %v8866_v48, %v8864_v0  ;;  %v2537_v0 = vmul.f32 1.442695, %v11053_v4 }
 0x1d1   : > { %v8870_v15 = vpop.eup %8869  ;;  %v11147_v41 = vpop.f32.mrf.mxu0  ;;  %8901 = vpow2.f32 %v2525_v24  ;;  %v2868_v30 = vpack.c.bf16 %v9288_v16, %v9287_v61  ;;  %v2539_v4 = vmul.f32 1.442695, %v11042_v46  ;;  %v2543_v46 = vmul.f32 1.442695, %v11062_v17  ;;  %v9292_v61 = vld [vmem:[%s9414_s11 + $0x358] sm:$0xff] }
 0x1d2   : > { %v11149_v8 = vpop.f32.mrf.mxu1  ;;  %v8872_v53 = vpop.eup %8871  ;;  %8903 = vtanh.f32 %v1517_v56  ;;  %v2791_v37 = vmul.f32 %v8870_v15, %v8868_v14  ;;  %v1537_v15 = vadd.f32 %v10963_v23, %v11051_v58  ;;  %v2541_v17 = vmul.f32 1.442695, %v11071_v25 }
 0x1d3   : > { %v8874_v44 = vpop.eup %8873  ;;  %v11154_v1 = vpop.f32.mrf.mxu0  ;;  %7975 = vmatmul.mubr.msk.bf16.gmra.mxu0 %vm2975_vm4, %v2932_v49  ;;  %8105 = vmatmul.mubr.msk.bf16.gmra.mxu1 %vm501_vm3, %v2866_v26  ;;  %8905 = vpow2.f32 %v2529_v60  ;;  %v1562_v25 = vadd.f32 %v10963_v23, %v11076_v2  ;;  %v1572_v2 = vadd.f32 %v10963_v23, %v11101_v27 }
 0x1d4   : > { %v11157_v47 = vpop.f32.mrf.mxu1  ;;  %v8876_v13 = vpop.eup %8875  ;;  %7978 = vmatprep.mubr.msk.bf16.mxu0 %vm2975_vm4, %v2933_v11  ;;  %8108 = vmatprep.mubr.msk.bf16.mxu1 %vm501_vm3, %v2867_v22  ;;  %v2793_v28 = vmul.f32 %v8874_v44, %v8872_v53  ;;  %8907 = vtanh.f32 %v1522_v54  ;;  %v2869_v22 = vpack.c.bf16 %v9290_v38, %v9289_v39  ;;  %v2934_v49 = vpack.c.bf16 %v2792_v51, %v2791_v37  ;;  %v9293_v39 = vld [vmem:[%s9414_s11 + $0x360] sm:$0xff]  ;;  %v9294_v38 = vld [vmem:[%s9414_s11 + $0x368] sm:$0xff] }
 0x1d5   : > { %v8878_v62 = vpop.eup %8877  ;;  %v11165_v36 = vpop.f32.mrf.mxu0  ;;  %8909 = vpow2.f32 %v2531_v34 }
 0x1d6   : > { %v11167_v9 = vpop.f32.mrf.mxu1  ;;  %v8880_v35 = vpop.eup %8879  ;;  %v2794_v24 = vmul.f32 %v8878_v62, %v8876_v13  ;;  %8911 = vtanh.f32 %v1532_v29 }
 0x1d7   : > { %v8882_v59 = vpop.eup %8881  ;;  %v11174_v26 = vpop.f32.mrf.mxu0  ;;  %8913 = vpow2.f32 %v2535_v6 }
 0x1d8   : > { %v11176_v57 = vpop.f32.mrf.mxu1  ;;  %v8884_v14 = vpop.eup %8883  ;;  %v2935_v48 = vpack.c.bf16 %v2794_v24, %v2793_v28  ;;  %8915 = vtanh.f32 %v1527_v12  ;;  %v9291_v28 = vld [vmem:[%s9414_s11 + $0x350] sm:$0xff]  ;;  %v2796_v51 = vmul.f32 %v8882_v59, %v8880_v35  ;;  %v2545_v35 = vmul.f32 1.442695, %v11089_v32 }
 0x1d9   : > { %v8886_v10 = vpop.eup %8885  ;;  %v11183_v56 = vpop.f32.mrf.mxu0  ;;  %8917 = vpow2.f32 %v2533_v45  ;;  %v2870_v16 = vpack.c.bf16 %v9292_v61, %v9291_v28  ;;  %v9295_v28 = vld [vmem:[%s9414_s11 + $0x370] sm:$0xff]  ;;  %v9296_v61 = vld [vmem:[%s9414_s11 + $0x378] sm:$0xff] }
 0x1da   : > { %v11185_v20 = vpop.f32.mrf.mxu1  ;;  %v8888_v53 = vpop.eup %8887  ;;  %8919 = vtanh.f32 %v1537_v15  ;;  %v2795_v62 = vmul.f32 %v8886_v10, %v8884_v14  ;;  %v1557_v10 = vadd.f32 %v10963_v23, %v11087_v21  ;;  %v2872_v27 = vpack.c.bf16 %v9296_v61, %v9295_v28 }
 0x1db   : > { %v8890_v60 = vpop.eup %8889  ;;  %v11190_v11 = vpop.f32.mrf.mxu0  ;;  %7979 = vmatmul.mubr.msk.bf16.gmra.mxu0 %vm2975_vm4, %v2934_v49  ;;  %8109 = vmatmul.mubr.msk.bf16.gmra.mxu1 %vm501_vm3, %v2868_v30  ;;  %8921 = vpow2.f32 %v2537_v0 }
 0x1dc   : > { %v11193_v58 = vpop.f32.mrf.mxu1  ;;  %v8892_v44 = vpop.eup %8891  ;;  %7982 = vmatprep.mubr.msk.bf16.mxu0 %vm2975_vm4, %v2935_v48  ;;  %8112 = vmatprep.mubr.msk.bf16.mxu1 %vm501_vm3, %v2869_v22  ;;  %v2797_v37 = vmul.f32 %v8890_v60, %v8888_v53  ;;  %8923 = vtanh.f32 %v1542_v63  ;;  %v2871_v22 = vpack.c.bf16 %v9294_v38, %v9293_v39  ;;  %v2936_v49 = vpack.c.bf16 %v2796_v51, %v2795_v62  ;;  %v9298_v38 = vld [vmem:[%s9414_s11 + $0x388] sm:$0xff] }
 0x1dd   : > { %v8894_v54 = vpop.eup %8893  ;;  %v11201_v13 = vpop.f32.mrf.mxu0  ;;  %8925 = vpow2.f32 %v2539_v4  ;;  %v2547_v63 = vmul.f32 1.442695, %v11078_v18  ;;  %v2551_v18 = vmul.f32 1.442695, %v11103_v19  ;;  %v9297_v19 = vld [vmem:[%s9414_s11 + $0x380] sm:$0xff] }
 0x1de   : > { %v11203_v34 = vpop.f32.mrf.mxu1  ;;  %v8896_v29 = vpop.eup %8895  ;;  %v2798_v45 = vmul.f32 %v8894_v54, %v8892_v44  ;;  %8927 = vtanh.f32 %v1552_v31 }
 0x1df   : > { %v8898_v6 = vpop.eup %8897  ;;  %v11210_v30 = vpop.f32.mrf.mxu0  ;;  %8929 = vpow2.f32 %v2543_v46  ;;  %v8451_v46 = vld [vmem:[%s12572_s9 + $0x18] sm:$0xff]  }
 0x1e0   : > { %v11212_v12 = vpop.f32.mrf.mxu1  ;;  %v8900_v14 = vpop.eup %8899  ;;  %v2937_v59 = vpack.c.bf16 %v2798_v45, %v2797_v37  ;;  %8931 = vtanh.f32 %v1547_v52  ;;  %8288 = vmatprep.subr.bf16.mxu1 %v8451_v46 }
 0x1e1   : > { %v8902_v24 = vpop.eup %8901  ;;  %v11219_v15 = vpop.f32.mrf.mxu0  ;;  %8933 = vpow2.f32 %v2541_v17  ;;  %v2549_v17 = vmul.f32 1.442695, %v11112_v5  ;;  %8289 = vmatpush3.bf16.msra.mxu1 %v8451_v46  ;;  %v1582_v5 = vadd.f32 %v10963_v23, %v11117_v40  ;;  %v9300_v46 = vld [vmem:[%s9414_s11 + $0x398] sm:$0xff] }
 0x1e2   : > { %v11221_v42 = vpop.f32.mrf.mxu1  ;;  %v8904_v53 = vpop.eup %8903  ;;  %8935 = vtanh.f32 %v1557_v10  ;;  %v2799_v54 = vmul.f32 %v8902_v24, %v8900_v14  ;;  %v2800_v14 = vmul.f32 %v8898_v6, %v8896_v29  ;;  %v1577_v10 = vadd.f32 %v10963_v23, %v11128_v7 }
 0x1e3   : > { %v8906_v0 = vpop.eup %8905  ;;  %v11226_v48 = vpop.f32.mrf.mxu0  ;;  %7983 = vmatmul.mubr.msk.bf16.gmra.mxu0 %vm2975_vm4, %v2936_v49  ;;  %8113 = vmatmul.mubr.msk.bf16.gmra.mxu1 %vm501_vm3, %v2870_v16  ;;  %8937 = vpow2.f32 %v2545_v35  ;;  %v1567_v16 = vadd.f32 %v10963_v23, %v11110_v3  ;;  %v2553_v6 = vmul.f32 1.442695, %v11130_v55  ;;  %v2555_v55 = vmul.f32 1.442695, %v11119_v50 }
 0x1e4   : > { %v11229_v21 = vpop.f32.mrf.mxu1  ;;  %v8908_v60 = vpop.eup %8907  ;;  %7986 = vmatprep.mubr.msk.bf16.mxu0 %vm2975_vm4, %v2937_v59  ;;  %8116 = vmatprep.mubr.msk.bf16.mxu1 %vm501_vm3, %v2871_v22  ;;  %v2801_v62 = vmul.f32 %v8906_v0, %v8904_v53  ;;  %8939 = vtanh.f32 %v1562_v25  ;;  %v2873_v22 = vpack.c.bf16 %v9298_v38, %v9297_v19  ;;  %v2938_v53 = vpack.c.bf16 %v2800_v14, %v2799_v54  ;;  %v9301_v14 = vld [vmem:[%s9414_s11 + $0x3a0] sm:$0xff]  ;;  %v9302_v19 = vld [vmem:[%s9414_s11 + $0x3a8] sm:$0xff] }
 0x1e5   : > { %v8910_v32 = vpop.eup %8909  ;;  %v11237_v44 = vpop.f32.mrf.mxu0  ;;  %8941 = vpow2.f32 %v2547_v63  ;;  %v2875_v38 = vpack.c.bf16 %v9302_v19, %v9301_v14  ;;  %v9305_v19 = vld [vmem:[%s9414_s11 + $0x3c0] sm:$0xff] }
 0x1e6   : > { %v11239_v4 = vpop.f32.mrf.mxu1  ;;  %v8912_v31 = vpop.eup %8911  ;;  %v2802_v45 = vmul.f32 %v8910_v32, %v8908_v60  ;;  %8943 = vtanh.f32 %v1572_v2 }
 0x1e7   : > { %v8914_v37 = vpop.eup %8913  ;;  %v11249_v52 = vpop.f32.mrf.mxu0  ;;  %8945 = vpow2.f32 %v2551_v18 }
 0x1e8   : > { %v11251_v51 = vpop.f32.mrf.mxu1  ;;  %v8916_v39 = vpop.eup %8915  ;;  %v2939_v35 = vpack.c.bf16 %v2802_v45, %v2801_v62  ;;  %8947 = vtanh.f32 %v1567_v16  ;;  %v9299_v62 = vld [vmem:[%s9414_s11 + $0x390] sm:$0xff]  ;;  %v2557_v45 = vmul.f32 1.442695, %v11149_v8 }
 0x1e9   : > { %v8918_v24 = vpop.eup %8917  ;;  %v11258_v3 = vpop.f32.mrf.mxu0  ;;  %8949 = vpow2.f32 %v2549_v17  ;;  %v2874_v50 = vpack.c.bf16 %v9300_v46, %v9299_v62 }
 0x1ea   : > { %v11260_v49 = vpop.f32.mrf.mxu1  ;;  %v8920_v29 = vpop.eup %8919  ;;  %8951 = vtanh.f32 %v1577_v10  ;;  %v2803_v32 = vmul.f32 %v8918_v24, %v8916_v39  ;;  %v1587_v39 = vadd.f32 %v10963_v23, %v11147_v41 }
 0x1eb   : > { %v8922_v59 = vpop.eup %8921  ;;  %v11265_v0 = vpop.f32.mrf.mxu0  ;;  %7987 = vmatmul.mubr.msk.bf16.gmra.mxu0 %vm2975_vm4, %v2938_v53  ;;  %8117 = vmatmul.mubr.msk.bf16.gmra.mxu1 %vm501_vm3, %v2872_v27  ;;  %8953 = vpow2.f32 %v2553_v6  ;;  %v2804_v27 = vmul.f32 %v8914_v37, %v8912_v31  ;;  %v1592_v31 = vadd.f32 %v10963_v23, %v11137_v33 }
 0x1ec   : > { %v11268_v7 = vpop.f32.mrf.mxu1  ;;  %v8924_v25 = vpop.eup %8923  ;;  %7990 = vmatprep.mubr.msk.bf16.mxu0 %vm2975_vm4, %v2939_v35  ;;  %8120 = vmatprep.mubr.msk.bf16.mxu1 %vm501_vm3, %v2873_v22  ;;  %v2805_v54 = vmul.f32 %v8922_v59, %v8920_v29  ;;  %8955 = vtanh.f32 %v1582_v5  ;;  %v2559_v35 = vmul.f32 1.442695, %v11139_v43 }
 0x1ed   : > { %v8926_v60 = vpop.eup %8925  ;;  %v11274_v40 = vpop.f32.mrf.mxu0  ;;  %8957 = vpow2.f32 %v2555_v55  ;;  %v2940_v53 = vpack.c.bf16 %v2804_v27, %v2803_v32  ;;  %v9303_v32 = vld [vmem:[%s9414_s11 + $0x3b0] sm:$0xff] }
 0x1ee   : > { %v11276_v63 = vpop.f32.mrf.mxu1  ;;  %v8928_v2 = vpop.eup %8927  ;;  %v2806_v22 = vmul.f32 %v8926_v60, %v8924_v25  ;;  %8959 = vtanh.f32 %v1587_v39 }
 0x1ef   : > { %v8930_v18 = vpop.eup %8929  ;;  %v11280_v28 = vpop.f32.mrf.mxu0  ;;  %8961 = vpow2.f32 %v2557_v45 }
 0x1f0   : > { %v11282_v61 = vpop.f32.mrf.mxu1  ;;  %v8932_v16 = vpop.eup %8931  ;;  %v2941_v37 = vpack.c.bf16 %v2806_v22, %v2805_v54  ;;  %8963 = vtanh.f32 %v1592_v31  ;;  %v9304_v54 = vld [vmem:[%s9414_s11 + $0x3b8] sm:$0xff]  ;;  %v2808_v27 = vmul.f32 %v8930_v18, %v8928_v2 }
 0x1f1   : > { %v8934_v17 = vpop.eup %8933  ;;  %v11289_v24 = vpop.f32.mrf.mxu0  ;;  %v2876_v62 = vpack.c.bf16 %v9304_v54, %v9303_v32  ;;  %8965 = vpow2.f32 %v2559_v35  ;;  %v9307_v54 = vld [vmem:[%s9414_s11 + $0x3d0] sm:$0xff] }
 0x1f2   : > { %v11291_v10 = vpop.f32.mrf.mxu1  ;;  %v8936_v29 = vpop.eup %8935  ;;  %v2807_v5 = vmul.f32 %v8934_v17, %v8932_v16 }
 0x1f3   : > { %v8938_v6 = vpop.eup %8937  ;;  %v11296_v59 = vpop.f32.mrf.mxu0  ;;  %7991 = vmatmul.mubr.msk.bf16.gmra.mxu0 %vm2975_vm4, %v2940_v53  ;;  %8121 = vmatmul.mubr.msk.bf16.gmra.mxu1 %vm501_vm3, %v2874_v50 }
 0x1f4   : > { %v11299_v41 = vpop.f32.mrf.mxu1  ;;  %v8940_v8 = vpop.eup %8939  ;;  %7994 = vmatprep.mubr.msk.bf16.mxu0 %vm2975_vm4, %v2941_v37  ;;  %8124 = vmatprep.mubr.msk.bf16.mxu1 %vm501_vm3, %v2875_v38  ;;  %v2809_v55 = vmul.f32 %v8938_v6, %v8936_v29  ;;  %v9306_v38 = vld [vmem:[%s9414_s11 + $0x3c8] sm:$0xff]  ;;  %v2942_v53 = vpack.c.bf16 %v2808_v27, %v2807_v5  ;;  %v9308_v27 = vld [vmem:[%s9414_s11 + $0x3d8] sm:$0xff] }
 0x1f5   : > { %v8942_v23 = vpop.eup %8941  ;;  %v11304_v33 = vpop.f32.mrf.mxu0  ;;  %v2877_v39 = vpack.c.bf16 %v9306_v38, %v9305_v19 }
 0x1f6   : > { %v11306_v43 = vpop.f32.mrf.mxu1  ;;  %v8944_v25 = vpop.eup %8943  ;;  %v2810_v22 = vmul.f32 %v8942_v23, %v8940_v8 }
 0x1f7   : > { %v8946_v60 = vpop.eup %8945  ;;  %v11310_v46 = vpop.f32.mrf.mxu0 }
 0x1f8   : > { %v11312_v50 = vpop.f32.mrf.mxu1  ;;  %v8948_v14 = vpop.eup %8947  ;;  %v2943_v31 = vpack.c.bf16 %v2810_v22, %v2809_v55  ;;  %v3956_v55 = vadd.f32 %v11185_v20, %v11183_v56  ;;  %v2812_v22 = vmul.f32 %v8946_v60, %v8944_v25  ;;  %v11347_v56 = vld [vmem:[%s12569_s6] ss:$0 sm:$0xff] }
 0x1f9   : > { %v8950_v45 = vpop.eup %8949  ;;  %v11316_v16 = vpop.f32.mrf.mxu0 }
 0x1fa   : > { %v11318_v17 = vpop.f32.mrf.mxu1  ;;  %v8952_v29 = vpop.eup %8951  ;;  %v2811_v5 = vmul.f32 %v8950_v45, %v8948_v14  ;;  %v4471_v25 = vadd.f32 %v11347_v56, %v3956_v55 }
 0x1fb   : > { %v8954_v37 = vpop.eup %8953  ;;  %v11320_v6 = vpop.f32.mrf.mxu0  ;;  %7995 = vmatmul.mubr.msk.bf16.gmra.mxu0 %vm2975_vm4, %v2942_v53  ;;  %8125 = vmatmul.mubr.msk.bf16.gmra.mxu1 %vm501_vm3, %v2876_v62  ;;  %v2878_v62 = vpack.c.bf16 %v9308_v27, %v9307_v54  ;;  %v9309_v53 = vld [vmem:[%s9414_s11 + $0x3e0] sm:$0xff] }
 0x1fc   : > { %12692 = vst [vmem:[#allocation30_spill] sm:$0xff] %v11320_v6  ;;  %v11323_v2 = vpop.f32.mrf.mxu1  ;;  %v8956_v18 = vpop.eup %8955  ;;  %7998 = vmatprep.mubr.msk.bf16.mxu0 %vm2975_vm4, %v2943_v31  ;;  %8128 = vmatprep.mubr.msk.bf16.mxu1 %vm501_vm3, %v2877_v39  ;;  %v2813_v32 = vmul.f32 %v8954_v37, %v8952_v29  ;;  %v9310_v39 = vld [vmem:[%s9414_s11 + $0x3e8] sm:$0xff]  ;;  %v2944_v29 = vpack.c.bf16 %v2812_v22, %v2811_v5 }
 0x1fd   : > { %12693 = vst [vmem:[#allocation3_spill] sm:$0xff] %v11323_v2  ;;  %v8958_v35 = vpop.eup %8957  ;;  %v11328_v8 = vpop.f32.mrf.mxu0  ;;  %v2879_v31 = vpack.c.bf16 %v9310_v39, %v9309_v53  ;;  %v3953_v2 = vadd.f32 %v11167_v9, %v11165_v36  ;;  %v3972_v22 = vadd.f32 %v11221_v42, %v11219_v15  ;;  %v9312_v53 = vld [vmem:[%s9414_s11 + $0x3f8] sm:$0xff] }
 0x1fe   : > { %v11330_v23 = vpop.f32.mrf.mxu1  ;;  %v2814_v6 = vmul.f32 %v8958_v35, %v8956_v18  ;;  %v8960_v14 = vpop.eup %8959 }
 0x1ff   : > { %v11336_v19 = vpop.f32.mrf.mxu0  ;;  %v8962_v37 = vpop.eup %8961  ;;  %v4470_v18 = vadd.f32 %v11347_v56, %v3953_v2  ;;  %v8452_v2 = vld [vmem:[%s12572_s9 + $0x10] sm:$0xff]  }
 0x200   : > { %v11338_v38 = vpop.f32.mrf.mxu1  ;;  %v2945_v60 = vpack.c.bf16 %v2814_v6, %v2813_v32  ;;  %v8964_v54 = vpop.eup %8963  ;;  %v3964_v6 = vadd.f32 %v11176_v57, %v11174_v26  ;;  %v2815_v55 = vmul.f32 %v8962_v37, %v8960_v14  ;;  %v4599_v32 = vmax.f32 %v4471_v25, 0.0  ;;  %8290 = vmatprep.subr.bf16.mxu1 %v8452_v2 }
 0x201   : > { %v11349_v20 = vpop.f32.mrf.mxu0  ;;  %v8966_v9 = vpop.eup %8965  ;;  %v4598_v14 = vmax.f32 %v4470_v18, 0.0  ;;  %v3969_v37 = vadd.f32 %v11203_v34, %v11201_v13  ;;  %8291 = vmatpush3.bf16.msra.mxu1 %v8452_v2  ;;  %v3977_v2 = vadd.f32 %v11193_v58, %v11190_v11 }
 0x202   : > { %v11351_v45 = vpop.f32.mrf.mxu1  ;;  %v4473_v15 = vadd.f32 %v11347_v56, %v3964_v6 }
 0x203   : > { %v11354_v27 = vpop.f32.mrf.mxu0  ;;  %7999 = vmatmul.mubr.msk.bf16.gmra.mxu0 %vm2975_vm4, %v2944_v29  ;;  %8129 = vmatmul.mubr.msk.bf16.gmra.mxu1 %vm501_vm3, %v2878_v62  ;;  %v9311_v62 = vld [vmem:[%s9414_s11 + $0x3f0] sm:$0xff]  ;;  %v2816_v29 = vmul.f32 %v8966_v9, %v8964_v54  ;;  %v4474_v13 = vadd.f32 %v11347_v56, %v3969_v37  ;;  %v3980_v9 = vadd.f32 %v11212_v12, %v11210_v30 }
 0x204   : > { %v11357_v36 = vpop.f32.mrf.mxu1  ;;  %8002 = vmatprep.mubr.msk.bf16.mxu0 %vm2975_vm4, %v2945_v60  ;;  %8132 = vmatprep.mubr.msk.bf16.mxu1 %vm501_vm3, %v2879_v31  ;;  %v2880_v39 = vpack.c.bf16 %v9312_v53, %v9311_v62  ;;  %v3961_v31 = vadd.f32 %v11157_v47, %v11154_v1  ;;  %v4475_v1 = vadd.f32 %v11347_v56, %v3972_v22  ;;  %v4601_v34 = vmax.f32 %v4473_v15, 0.0 }
 0x205   : > { %v11365_v35 = vpop.f32.mrf.mxu0  ;;  %v2946_v60 = vpack.c.bf16 %v2816_v29, %v2815_v55  ;;  %v4726_v47 = vpack.c.bf16 %v4599_v32, %v4598_v14  ;;  %v3988_v32 = vadd.f32 %v11260_v49, %v11258_v3  ;;  %v4602_v29 = vmax.f32 %v4474_v13, 0.0 }
 0x206   : > { %v11367_v5 = vpop.f32.mrf.mxu1  ;;  %v4472_v62 = vadd.f32 %v11347_v56, %v3961_v31  ;;  %v4603_v55 = vmax.f32 %v4475_v1, 0.0  ;;  %v3985_v30 = vadd.f32 %v11239_v4, %v11237_v44  ;;  %v4477_v14 = vadd.f32 %v11347_v56, %v3980_v9 }
 0x207   : > { %v11378_v26 = vpop.f32.mrf.mxu0  ;;  %v4479_v3 = vadd.f32 %v11347_v56, %v3988_v32  ;;  %v4476_v11 = vadd.f32 %v11347_v56, %v3977_v2  ;;  %v3996_v4 = vadd.f32 %v11251_v51, %v11249_v52  ;;  %v4001_v52 = vadd.f32 %v11276_v63, %v11274_v40 }
 0x208   : > { %v11380_v57 = vpop.f32.mrf.mxu1  ;;  %v4600_v22 = vmax.f32 %v4472_v62, 0.0  ;;  %v4728_v49 = vpack.c.bf16 %v4603_v55, %v4602_v29  ;;  %v4478_v1 = vadd.f32 %v11347_v56, %v3985_v30  ;;  %v4605_v44 = vmax.f32 %v4477_v14, 0.0 }
 0x209   : > { %v11385_v42 = vpop.f32.mrf.mxu0  ;;  %v4607_v13 = vmax.f32 %v4479_v3, 0.0  ;;  %v4604_v9 = vmax.f32 %v4476_v11, 0.0  ;;  %v3993_v55 = vadd.f32 %v11229_v21, %v11226_v48  ;;  %v4481_v29 = vadd.f32 %v11347_v56, %v3996_v4 }
 0x20a   : > { %v11387_v25 = vpop.f32.mrf.mxu1  ;;  %v4727_v12 = vpack.c.bf16 %v4601_v34, %v4600_v22  ;;  %v4004_v34 = vadd.f32 %v11291_v10, %v11289_v24  ;;  %v4606_v2 = vmax.f32 %v4478_v1, 0.0  ;;  %v4482_v3 = vadd.f32 %v11347_v56, %v4001_v52 }
 0x20b   : > { %v11391_v53 = vpop.f32.mrf.mxu0  ;;  %8003 = vmatmul.mubr.msk.bf16.gmra.mxu0 %vm2975_vm4, %v2946_v60  ;;  %8133 = vmatmul.mubr.msk.bf16.gmra.mxu1 %vm501_vm3, %v2880_v39  ;;  %v4729_v51 = vpack.c.bf16 %v4605_v44, %v4604_v9  ;;  %v4480_v48 = vadd.f32 %v11347_v56, %v3993_v55  ;;  %v4609_v40 = vmax.f32 %v4481_v29, 0.0  ;;  %v4012_v63 = vadd.f32 %v11282_v61, %v11280_v28 }
 0x20c   : > { %v11394_v54 = vpop.f32.mrf.mxu1  ;;  %8152 = vmatprep.mubr.bf16.mxu0 %v4726_v47  ;;  %v4483_v24 = vadd.f32 %v11347_v56, %v4004_v34  ;;  %v4730_v10 = vpack.c.bf16 %v4607_v13, %v4606_v2  ;;  %v4020_v44 = vadd.f32 %v11318_v17, %v11316_v16  ;;  %v4009_v13 = vadd.f32 %v11268_v7, %v11265_v0 }
 0x20d   : > { %v11400_v18 = vpop.f32.mrf.mxu0  ;;  %v4608_v4 = vmax.f32 %v4480_v48, 0.0  ;;  %v4610_v55 = vmax.f32 %v4482_v3, 0.0  ;;  %v4017_v28 = vadd.f32 %v11306_v43, %v11304_v33  ;;  %v4485_v2 = vadd.f32 %v11347_v56, %v4012_v63  ;;  %v8453_v63 = vld [vmem:[%s12572_s9 + $0x8] sm:$0xff]  }
 0x20e   : > { %v11402_v6 = vpop.f32.mrf.mxu1  ;;  %v4611_v1 = vmax.f32 %v4483_v24, 0.0  ;;  %v4487_v16 = vadd.f32 %v11347_v56, %v4020_v44  ;;  %v4484_v0 = vadd.f32 %v11347_v56, %v4009_v13  ;;  %v4028_v43 = vadd.f32 %v11312_v50, %v11310_v46  ;;  %8292 = vmatprep.subr.bf16.mxu1 %v8453_v63 }
 0x20f   : > { %v11408_v39 = vpop.f32.mrf.mxu0  ;;  %v4731_v61 = vpack.c.bf16 %v4609_v40, %v4608_v4  ;;  %v4486_v24 = vadd.f32 %v11347_v56, %v4017_v28  ;;  %v4613_v33 = vmax.f32 %v4485_v2, 0.0  ;;  %v4036_v40 = vadd.f32 %v11351_v45, %v11349_v20  ;;  %8293 = vmatpush3.bf16.msra.mxu1 %v8453_v63  ;;  %v12695_v63 = vld [vmem:[#allocation3_spill] sm:$0xff] }
 0x210   : > { %v11410_v31 = vpop.f32.mrf.mxu1  ;;  %v4732_v17 = vpack.c.bf16 %v4611_v1, %v4610_v55  ;;  %v4615_v3 = vmax.f32 %v4487_v16, 0.0  ;;  %v4612_v1 = vmax.f32 %v4484_v0, 0.0  ;;  %v4025_v44 = vadd.f32 %v11299_v41, %v11296_v59 }
 0x211   : > { %v11415_v37 = vpop.f32.mrf.mxu0  ;;  %v4614_v46 = vmax.f32 %v4486_v24, 0.0  ;;  %v4033_v50 = vadd.f32 %v11330_v23, %v11328_v8  ;;  %v4489_v20 = vadd.f32 %v11347_v56, %v4028_v43  ;;  %v4052_v43 = vadd.f32 %v11387_v25, %v11385_v42 }
 0x212   : > { %v11417_v15 = vpop.f32.mrf.mxu1  ;;  %v4733_v55 = vpack.c.bf16 %v4613_v33, %v4612_v1  ;;  %v4488_v41 = vadd.f32 %v11347_v56, %v4025_v44 }
 0x213   : > { %v11421_v58 = vpop.f32.mrf.mxu0  ;;  %8153 = vmatmul.mubr.bf16.vlgmr.msra.gmra.mxu0 %v4727_v12  ;;  %v4734_v59 = vpack.c.bf16 %v4615_v3, %v4614_v46  ;;  %v4490_v8 = vadd.f32 %v11347_v56, %v4033_v50  ;;  %v4617_v23 = vmax.f32 %v4489_v20, 0.0  ;;  %v4495_v42 = vadd.f32 %v11347_v56, %v4052_v43 }
 0x214   : > { %v11423_v60 = vpop.f32.mrf.mxu1  ;;  %8156 = vmatprep.mubr.bf16.mxu0 %v4728_v49  ;;  %v4616_v3 = vmax.f32 %v4488_v41, 0.0 }
 0x215   : > { %v11428_v47 = vpop.f32.mrf.mxu0  ;;  %v4618_v50 = vmax.f32 %v4490_v8, 0.0  ;;  %v4623_v43 = vmax.f32 %v4495_v42, 0.0 }
 0x216   : > { %v11430_v62 = vpop.f32.mrf.mxu1 }
 0x217   : > { %v11436_v32 = vpop.f32.mrf.mxu0 }
 0x218   : > { %v11438_v22 = vpop.f32.mrf.mxu1 }
 0x219   : > { %v11443_v30 = vpop.f32.mrf.mxu0 }
 0x21a   : > { %v11445_v12 = vpop.f32.mrf.mxu1 }
 0x21b   : > { %v11449_v21 = vpop.f32.mrf.mxu0  ;;  %8157 = vmatmul.mubr.bf16.gmra.mxu0 %v4729_v51 }
 0x21c   : > { %v11451_v14 = vpop.f32.mrf.mxu1  ;;  %8160 = vmatprep.mubr.bf16.mxu0 %v4730_v10 }
 0x21d   : > { %v11456_v49 = vpop.f32.mrf.mxu0 }
 0x21e   : > { %v11458_v11 = vpop.f32.mrf.mxu1 }
 0x21f   : > { %v11464_v34 = vpop.f32.mrf.mxu0 }
 0x220   : > { %v11466_v9 = vpop.f32.mrf.mxu1 }
 0x221   : > { %v11471_v52 = vpop.f32.mrf.mxu0 }
 0x222   : > { %v11473_v51 = vpop.f32.mrf.mxu1 }
 0x223   : > { %v11477_v7 = vpop.f32.mrf.mxu0  ;;  %8161 = vmatmul.mubr.bf16.gmra.mxu0 %v4731_v61  ;;  %v4491_v61 = vadd.f32 %v11347_v56, %v4036_v40  ;;  %v12694_v40 = vld [vmem:[#allocation30_spill] sm:$0xff] }
 0x224   : > { %v11479_v29 = vpop.f32.mrf.mxu1  ;;  %8164 = vmatprep.mubr.bf16.mxu0 %v4732_v17  ;;  %v4044_v17 = vadd.f32 %v11338_v38, %v11336_v19  ;;  %v4041_v1 = vadd.f32 %v12695_v63, %v12694_v40  ;;  %v4049_v19 = vadd.f32 %v11367_v5, %v11365_v35  ;;  %v4735_v38 = vpack.c.bf16 %v4617_v23, %v4616_v3 }
 0x225   : > { %v11484_v10 = vpop.f32.mrf.mxu0  ;;  %v4619_v33 = vmax.f32 %v4491_v61, 0.0  ;;  %v4060_v5 = vadd.f32 %v11380_v57, %v11378_v26  ;;  %v4057_v63 = vadd.f32 %v11357_v36, %v11354_v27  ;;  %v4065_v26 = vadd.f32 %v11402_v6, %v11400_v18 }
 0x226   : > { %v11486_v48 = vpop.f32.mrf.mxu1  ;;  %v4494_v8 = vadd.f32 %v11347_v56, %v4049_v19  ;;  %v4076_v6 = vadd.f32 %v11410_v31, %v11408_v39  ;;  %v4081_v39 = vadd.f32 %v11430_v62, %v11428_v47  ;;  %v4092_v62 = vadd.f32 %v11438_v22, %v11436_v32 }
 0x227   : > { %v11495_v4 = vpop.f32.mrf.mxu0  ;;  %v4736_v25 = vpack.c.bf16 %v4619_v33, %v4618_v50  ;;  %v4068_v33 = vadd.f32 %v11417_v15, %v11415_v37  ;;  %v4496_v27 = vadd.f32 %v11347_v56, %v4057_v63  ;;  %v4097_v22 = vadd.f32 %v11458_v11, %v11456_v49 }
 0x228   : > { %v11497_v13 = vpop.f32.mrf.mxu1  ;;  %v4622_v19 = vmax.f32 %v4494_v8, 0.0 }
 0x229   : > { %v11502_v45 = vpop.f32.mrf.mxu0  ;;  %v4499_v37 = vadd.f32 %v11347_v56, %v4068_v33  ;;  %v4624_v33 = vmax.f32 %v4496_v27, 0.0  ;;  %v4502_v27 = vadd.f32 %v11347_v56, %v4081_v39  ;;  %v4506_v49 = vadd.f32 %v11347_v56, %v4097_v22 }
 0x22a   : > { %v11504_v28 = vpop.f32.mrf.mxu1  ;;  %v4738_v15 = vpack.c.bf16 %v4623_v43, %v4622_v19  ;;  %v4084_v43 = vadd.f32 %v11445_v12, %v11443_v30 }
 0x22b   : > { %v11508_v2 = vpop.f32.mrf.mxu0  ;;  %8165 = vmatmul.mubr.bf16.gmra.mxu0 %v4733_v55  ;;  %v4493_v55 = vadd.f32 %v11347_v56, %v4044_v17  ;;  %v4630_v32 = vmax.f32 %v4502_v27, 0.0  ;;  %v4108_v27 = vadd.f32 %v11466_v9, %v11464_v34  ;;  %v4634_v22 = vmax.f32 %v4506_v49, 0.0 }
 0x22c   : > { %v11510_v16 = vpop.f32.mrf.mxu1  ;;  %8168 = vmatprep.mubr.bf16.mxu0 %v4734_v59  ;;  %v4492_v59 = vadd.f32 %v11347_v56, %v4041_v1  ;;  %v4503_v30 = vadd.f32 %v11347_v56, %v4084_v43  ;;  %v8454_v43 = vld [vmem:[%s12572_s9] sm:$0xff]   ;;  %v4113_v34 = vadd.f32 %v11486_v48, %v11484_v10  ;;  %v4124_v48 = vadd.f32 %v11497_v13, %v11495_v4 }
 0x22d   : > { %v11515_v0 = vpop.f32.mrf.mxu0  ;;  %v4621_v35 = vmax.f32 %v4493_v55, 0.0  ;;  %8294 = vmatprep.subr.bf16.mxu1 %v8454_v43 }
 0x22e   : > { %v11517_v24 = vpop.f32.mrf.mxu1  ;;  %v4620_v3 = vmax.f32 %v4492_v59, 0.0  ;;  %v4498_v59 = vadd.f32 %v11347_v56, %v4065_v26  ;;  %8295 = vmatpush3.bf16.msra.mxu1 %v8454_v43 }
 0x22f   : > { %v11523_v44 = vpop.f32.mrf.mxu0  ;;  %v4129_v4 = vadd.f32 %v11517_v24, %v11515_v0 }
 0x230   : > { %v11525_v46 = vpop.f32.mrf.mxu1  ;;  %v4737_v57 = vpack.c.bf16 %v4621_v35, %v4620_v3  ;;  %v4073_v3 = vadd.f32 %v11394_v54, %v11391_v53  ;;  %v4626_v26 = vmax.f32 %v4498_v59, 0.0 }
 0x231   : > { %v11530_v20 = vpop.f32.mrf.mxu0  ;;  %v4140_v24 = vadd.f32 %v11525_v46, %v11523_v44 }
 0x232   : > { %v11532_v61 = vpop.f32.mrf.mxu1  ;;  %v4500_v53 = vadd.f32 %v11347_v56, %v4073_v3  ;;  %v4089_v3 = vadd.f32 %v11423_v60, %v11421_v58 }
 0x233   : > { %v11536_v41 = vpop.f32.mrf.mxu0  ;;  %8169 = vmatmul.mubr.bf16.gmra.mxu0 %v4735_v38  ;;  %v4497_v38 = vadd.f32 %v11347_v56, %v4060_v5  ;;  %v4627_v5 = vmax.f32 %v4499_v37, 0.0 }
 0x234   : > { %v11538_v40 = vpop.f32.mrf.mxu1  ;;  %8172 = vmatprep.mubr.bf16.mxu0 %v4736_v25  ;;  %v4504_v60 = vadd.f32 %v11347_v56, %v4089_v3 }
 0x235   : > { %v11543_v23 = vpop.f32.mrf.mxu0  ;;  %v4625_v18 = vmax.f32 %v4497_v38, 0.0  ;;  %v4740_v12 = vpack.c.bf16 %v4627_v5, %v4626_v26  ;;  %v4100_v5 = vadd.f32 %v11473_v51, %v11471_v52  ;;  %v4505_v52 = vadd.f32 %v11347_v56, %v4092_v62 }
 0x236   : > { %v11545_v17 = vpop.f32.mrf.mxu1  ;;  %v4632_v43 = vmax.f32 %v4504_v60, 0.0  ;;  %v4510_v60 = vadd.f32 %v11347_v56, %v4113_v34 }
 0x237   : > { %v11551_v1 = vpop.f32.mrf.mxu0  ;;  %v4739_v31 = vpack.c.bf16 %v4625_v18, %v4624_v33  ;;  %v4628_v33 = vmax.f32 %v4500_v53, 0.0  ;;  %v4633_v11 = vmax.f32 %v4505_v52, 0.0  ;;  %v4145_v44 = vadd.f32 %v11545_v17, %v11543_v23 }
 0x238   : > { %v11553_v50 = vpop.f32.mrf.mxu1  ;;  %v4638_v34 = vmax.f32 %v4510_v60, 0.0 }
 0x239   : > { %v11558_v55 = vpop.f32.mrf.mxu0  ;;  %v4743_v9 = vpack.c.bf16 %v4633_v11, %v4632_v43  ;;  %v4121_v43 = vadd.f32 %v11479_v29, %v11477_v7  ;;  %v4156_v17 = vadd.f32 %v11553_v50, %v11551_v1 }
 0x23a   : > { %v11560_v42 = vpop.f32.mrf.mxu1 }
 0x23b   : > { %v11564_v36 = vpop.f32.mrf.mxu0  ;;  %8173 = vmatmul.mubr.bf16.gmra.mxu0 %v4737_v57  ;;  %v4501_v57 = vadd.f32 %v11347_v56, %v4076_v6  ;;  %v4631_v6 = vmax.f32 %v4503_v30, 0.0  ;;  %v4507_v30 = vadd.f32 %v11347_v56, %v4100_v5  ;;  %v4512_v7 = vadd.f32 %v11347_v56, %v4121_v43 }
 0x23c   : > { %v11566_v25 = vpop.f32.mrf.mxu1  ;;  %8176 = vmatprep.mubr.bf16.mxu0 %v4738_v15 }
 0x23d   : > { %v11571_v8 = vpop.f32.mrf.mxu0  ;;  %v4629_v47 = vmax.f32 %v4501_v57, 0.0  ;;  %v4742_v58 = vpack.c.bf16 %v4631_v6, %v4630_v32  ;;  %v4635_v5 = vmax.f32 %v4507_v30, 0.0  ;;  %v4116_v6 = vadd.f32 %v11504_v28, %v11502_v45 }
 0x23e   : > { %v11573_v35 = vpop.f32.mrf.mxu1 }
 0x23f   : > { %v11579_v63 = vpop.f32.mrf.mxu0  ;;  %v4511_v45 = vadd.f32 %v11347_v56, %v4116_v6  ;;  %v4744_v28 = vpack.c.bf16 %v4635_v5, %v4634_v22  ;;  %v4132_v5 = vadd.f32 %v11532_v61, %v11530_v20  ;;  %v4161_v1 = vadd.f32 %v11573_v35, %v11571_v8 }
 0x240   : > { %v11581_v19 = vpop.f32.mrf.mxu1 }
 0x241   : > { %v11586_v38 = vpop.f32.mrf.mxu0  ;;  %v4515_v20 = vadd.f32 %v11347_v56, %v4132_v5  ;;  %v4640_v5 = vmax.f32 %v4512_v7, 0.0  ;;  %v4518_v7 = vadd.f32 %v11347_v56, %v4145_v44  ;;  %v4172_v35 = vadd.f32 %v11581_v19, %v11579_v63 }
 0x242   : > { %v11588_v37 = vpop.f32.mrf.mxu1 }
 0x243   : > { %v11592_v54 = vpop.f32.mrf.mxu0  ;;  %8177 = vmatmul.mubr.bf16.gmra.mxu0 %v4739_v31  ;;  %v4741_v31 = vpack.c.bf16 %v4629_v47, %v4628_v33  ;;  %v4105_v33 = vadd.f32 %v11451_v14, %v11449_v21  ;;  %v4646_v44 = vmax.f32 %v4518_v7, 0.0 }
 0x244   : > { %v11594_v15 = vpop.f32.mrf.mxu1  ;;  %8180 = vmatprep.mubr.bf16.mxu0 %v4740_v12 }
 0x245   : > { %v11599_v59 = vpop.f32.mrf.mxu0  ;;  %v4508_v21 = vadd.f32 %v11347_v56, %v4105_v33 }
 0x246   : > { %v11601_v18 = vpop.f32.mrf.mxu1 }
 0x247   : > { %v11610_v26 = vpop.f32.mrf.mxu0  ;;  %v4636_v6 = vmax.f32 %v4508_v21, 0.0  ;;  %v4514_v21 = vadd.f32 %v11347_v56, %v4129_v4  ;;  %v4177_v63 = vadd.f32 %v11601_v18, %v11599_v59 }
 0x248   : > { %v11612_v39 = vpop.f32.mrf.mxu1 }
 0x249   : > { %v11617_v51 = vpop.f32.mrf.mxu0  ;;  %v4642_v4 = vmax.f32 %v4514_v21, 0.0  ;;  %v4188_v18 = vadd.f32 %v11612_v39, %v11610_v26 }
 0x24a   : > { %v11619_v57 = vpop.f32.mrf.mxu1 }
 0x24b   : > { %v11623_v12 = vpop.f32.mrf.mxu0  ;;  %8181 = vmatmul.mubr.bf16.gmra.mxu0 %v4741_v31  ;;  %v4509_v31 = vadd.f32 %v11347_v56, %v4108_v27  ;;  %v4639_v27 = vmax.f32 %v4511_v45, 0.0 }
 0x24c   : > { %v11625_v53 = vpop.f32.mrf.mxu1  ;;  %8184 = vmatprep.mubr.bf16.mxu0 %v4742_v58 }
 0x24d   : > { %v11630_v47 = vpop.f32.mrf.mxu0  ;;  %v4637_v10 = vmax.f32 %v4509_v31, 0.0  ;;  %v4746_v61 = vpack.c.bf16 %v4639_v27, %v4638_v34  ;;  %v4148_v27 = vadd.f32 %v11560_v42, %v11558_v55 }
 0x24e   : > { %v11632_v62 = vpop.f32.mrf.mxu1 }
 0x24f   : > { %v11638_v3 = vpop.f32.mrf.mxu0  ;;  %v4745_v13 = vpack.c.bf16 %v4637_v10, %v4636_v6  ;;  %v4137_v6 = vadd.f32 %v11510_v16, %v11508_v2  ;;  %v4519_v55 = vadd.f32 %v11347_v56, %v4148_v27  ;;  %v4193_v26 = vadd.f32 %v11632_v62, %v11630_v47 }
 0x250   : > { %v11640_v32 = vpop.f32.mrf.mxu1 }
 0x251   : > { %v11645_v52 = vpop.f32.mrf.mxu0  ;;  %v4516_v2 = vadd.f32 %v11347_v56, %v4137_v6  ;;  %v4204_v62 = vadd.f32 %v11640_v32, %v11638_v3 }
 0x252   : > { %v11647_v30 = vpop.f32.mrf.mxu1 }
 0x253   : > { %v11651_v14 = vpop.f32.mrf.mxu0  ;;  %8185 = vmatmul.mubr.bf16.gmra.mxu0 %v4743_v9  ;;  %v4513_v9 = vadd.f32 %v11347_v56, %v4124_v48  ;;  %v4643_v48 = vmax.f32 %v4515_v20, 0.0  ;;  %v4644_v27 = vmax.f32 %v4516_v2, 0.0  ;;  %v4522_v2 = vadd.f32 %v11347_v56, %v4161_v1 }
 0x254   : > { %v11653_v58 = vpop.f32.mrf.mxu1  ;;  %8188 = vmatprep.mubr.bf16.mxu0 %v4744_v28 }
 0x255   : > { %v11658_v49 = vpop.f32.mrf.mxu0  ;;  %v4641_v0 = vmax.f32 %v4513_v9, 0.0  ;;  %v4748_v42 = vpack.c.bf16 %v4643_v48, %v4642_v4  ;;  %v4164_v48 = vadd.f32 %v11588_v37, %v11586_v38  ;;  %v4650_v1 = vmax.f32 %v4522_v2, 0.0 }
 0x256   : > { %v11660_v11 = vpop.f32.mrf.mxu1 }
 0x257   : > { %v11666_v33 = vpop.f32.mrf.mxu0  ;;  %v4747_v46 = vpack.c.bf16 %v4641_v0, %v4640_v5  ;;  %v4153_v5 = vadd.f32 %v11538_v40, %v11536_v41  ;;  %v4523_v38 = vadd.f32 %v11347_v56, %v4164_v48  ;;  %v4209_v3 = vadd.f32 %v11660_v11, %v11658_v49 }
 0x258   : > { %v11668_v22 = vpop.f32.mrf.mxu1 }
 0x259   : > { %v11673_v31 = vpop.f32.mrf.mxu0  ;;  %v4520_v41 = vadd.f32 %v11347_v56, %v4153_v5  ;;  %v4220_v11 = vadd.f32 %v11668_v22, %v11666_v33 }
 0x25a   : > { %v11675_v45 = vpop.f32.mrf.mxu1 }
 0x25b   : > { %v11679_v29 = vpop.f32.mrf.mxu0  ;;  %8189 = vmatmul.mubr.bf16.gmra.mxu0 %v4745_v13  ;;  %v4517_v13 = vadd.f32 %v11347_v56, %v4140_v24  ;;  %v4647_v24 = vmax.f32 %v4519_v55, 0.0  ;;  %v4648_v48 = vmax.f32 %v4520_v41, 0.0  ;;  %v4526_v41 = vadd.f32 %v11347_v56, %v4177_v63 }
 0x25c   : > { %v11681_v28 = vpop.f32.mrf.mxu1  ;;  %8192 = vmatprep.mubr.bf16.mxu0 %v4746_v61 }
 0x25d   : > { %v11686_v60 = vpop.f32.mrf.mxu0  ;;  %v4645_v23 = vmax.f32 %v4517_v13, 0.0  ;;  %v4750_v37 = vpack.c.bf16 %v4647_v24, %v4646_v44  ;;  %v4180_v24 = vadd.f32 %v11619_v57, %v11617_v51  ;;  %v4654_v63 = vmax.f32 %v4526_v41, 0.0 }
 0x25e   : > { %v11688_v10 = vpop.f32.mrf.mxu1 }
 0x25f   : > { %v11694_v43 = vpop.f32.mrf.mxu0  ;;  %v4749_v50 = vpack.c.bf16 %v4645_v23, %v4644_v27  ;;  %v4169_v27 = vadd.f32 %v11566_v25, %v11564_v36  ;;  %v4527_v51 = vadd.f32 %v11347_v56, %v4180_v24  ;;  %v4225_v33 = vadd.f32 %v11688_v10, %v11686_v60 }
 0x260   : > { %v11696_v34 = vpop.f32.mrf.mxu1 }
 0x261   : > { %v11701_v9 = vpop.f32.mrf.mxu0  ;;  %v4524_v36 = vadd.f32 %v11347_v56, %v4169_v27  ;;  %v4236_v10 = vadd.f32 %v11696_v34, %v11694_v43 }
 0x262   : > { %v11703_v20 = vpop.f32.mrf.mxu1 }
 0x263   : > { %v11707_v16 = vpop.f32.mrf.mxu0  ;;  %8193 = vmatmul.mubr.bf16.gmra.mxu0 %v4747_v46  ;;  %v4521_v46 = vadd.f32 %v11347_v56, %v4156_v17  ;;  %v4651_v17 = vmax.f32 %v4523_v38, 0.0  ;;  %v4652_v24 = vmax.f32 %v4524_v36, 0.0  ;;  %v4530_v36 = vadd.f32 %v11347_v56, %v4193_v26 }
 0x264   : > { %v11709_v61 = vpop.f32.mrf.mxu1  ;;  %8196 = vmatprep.mubr.bf16.mxu0 %v4748_v42 }
 0x265   : > { %v11714_v21 = vpop.f32.mrf.mxu0  ;;  %v4649_v8 = vmax.f32 %v4521_v46, 0.0  ;;  %v4752_v57 = vpack.c.bf16 %v4651_v17, %v4650_v1  ;;  %v4196_v17 = vadd.f32 %v11647_v30, %v11645_v52  ;;  %v4658_v26 = vmax.f32 %v4530_v36, 0.0 }
 0x266   : > { %v11716_v0 = vpop.f32.mrf.mxu1 }
 0x267   : > { %v11722_v6 = vpop.f32.mrf.mxu0  ;;  %v4751_v19 = vpack.c.bf16 %v4649_v8, %v4648_v48  ;;  %v4185_v48 = vadd.f32 %v11594_v15, %v11592_v54  ;;  %v4531_v52 = vadd.f32 %v11347_v56, %v4196_v17  ;;  %v4241_v43 = vadd.f32 %v11716_v0, %v11714_v21 }
 0x268   : > { %v11724_v4 = vpop.f32.mrf.mxu1 }
 0x269   : > { %v11729_v13 = vpop.f32.mrf.mxu0  ;;  %v4528_v54 = vadd.f32 %v11347_v56, %v4185_v48  ;;  %v4252_v0 = vadd.f32 %v11724_v4, %v11722_v6 }
 0x26a   : > { %v11731_v55 = vpop.f32.mrf.mxu1 }
 0x26b   : > { %v11735_v40 = vpop.f32.mrf.mxu0  ;;  %8197 = vmatmul.mubr.bf16.gmra.mxu0 %v4749_v50  ;;  %v4525_v50 = vadd.f32 %v11347_v56, %v4172_v35  ;;  %v4655_v35 = vmax.f32 %v4527_v51, 0.0  ;;  %v4656_v17 = vmax.f32 %v4528_v54, 0.0  ;;  %v4534_v54 = vadd.f32 %v11347_v56, %v4209_v3 }
 0x26c   : > { %v11737_v42 = vpop.f32.mrf.mxu1  ;;  %8200 = vmatprep.mubr.bf16.mxu0 %v4750_v37 }
 0x26d   : > { %v11742_v7 = vpop.f32.mrf.mxu0  ;;  %v4653_v59 = vmax.f32 %v4525_v50, 0.0  ;;  %v4754_v30 = vpack.c.bf16 %v4655_v35, %v4654_v63  ;;  %v4212_v35 = vadd.f32 %v11675_v45, %v11673_v31  ;;  %v4662_v3 = vmax.f32 %v4534_v54, 0.0 }
 0x26e   : > { %v11744_v23 = vpop.f32.mrf.mxu1 }
 0x26f   : > { %v11750_v5 = vpop.f32.mrf.mxu0  ;;  %v4753_v39 = vpack.c.bf16 %v4653_v59, %v4652_v24  ;;  %v4201_v24 = vadd.f32 %v11625_v53, %v11623_v12  ;;  %v4535_v31 = vadd.f32 %v11347_v56, %v4212_v35  ;;  %v4257_v6 = vadd.f32 %v11744_v23, %v11742_v7 }
 0x270   : > { %v11752_v44 = vpop.f32.mrf.mxu1 }
 0x271   : > { %v11757_v46 = vpop.f32.mrf.mxu0  ;;  %v4532_v12 = vadd.f32 %v11347_v56, %v4201_v24  ;;  %v4268_v23 = vadd.f32 %v11752_v44, %v11750_v5 }
 0x272   : > { %v11759_v38 = vpop.f32.mrf.mxu1 }
 0x273   : > { %v11763_v25 = vpop.f32.mrf.mxu0  ;;  %8201 = vmatmul.mubr.bf16.gmra.mxu0 %v4751_v19  ;;  %v4529_v19 = vadd.f32 %v11347_v56, %v4188_v18  ;;  %v4659_v18 = vmax.f32 %v4531_v52, 0.0  ;;  %v4660_v35 = vmax.f32 %v4532_v12, 0.0  ;;  %v4538_v12 = vadd.f32 %v11347_v56, %v4225_v33 }
 0x274   : > { %v11765_v37 = vpop.f32.mrf.mxu1  ;;  %8204 = vmatprep.mubr.bf16.mxu0 %v4752_v57 }
 0x275   : > { %v11770_v2 = vpop.f32.mrf.mxu0  ;;  %v4657_v47 = vmax.f32 %v4529_v19, 0.0  ;;  %v4756_v45 = vpack.c.bf16 %v4659_v18, %v4658_v26  ;;  %v4228_v18 = vadd.f32 %v11703_v20, %v11701_v9  ;;  %v4666_v33 = vmax.f32 %v4538_v12, 0.0 }
 0x276   : > { %v11772_v8 = vpop.f32.mrf.mxu1 }
 0x277   : > { %v11778_v27 = vpop.f32.mrf.mxu0  ;;  %v4755_v32 = vpack.c.bf16 %v4657_v47, %v4656_v17  ;;  %v4217_v17 = vadd.f32 %v11653_v58, %v11651_v14  ;;  %v4539_v9 = vadd.f32 %v11347_v56, %v4228_v18  ;;  %v4273_v5 = vadd.f32 %v11772_v8, %v11770_v2 }
 0x278   : > { %v11780_v1 = vpop.f32.mrf.mxu1 }
 0x279   : > { %v11785_v50 = vpop.f32.mrf.mxu0  ;;  %v4536_v14 = vadd.f32 %v11347_v56, %v4217_v17  ;;  %v4284_v8 = vadd.f32 %v11780_v1, %v11778_v27 }
 0x27a   : > { %v11787_v51 = vpop.f32.mrf.mxu1 }
 0x27b   : > { %v11791_v15 = vpop.f32.mrf.mxu0  ;;  %8205 = vmatmul.mubr.bf16.gmra.mxu0 %v4753_v39  ;;  %v4533_v39 = vadd.f32 %v11347_v56, %v4204_v62  ;;  %v4663_v62 = vmax.f32 %v4535_v31, 0.0  ;;  %v4664_v18 = vmax.f32 %v4536_v14, 0.0  ;;  %v4542_v14 = vadd.f32 %v11347_v56, %v4241_v43 }
 0x27c   : > { %v11793_v57 = vpop.f32.mrf.mxu1  ;;  %8208 = vmatprep.mubr.bf16.mxu0 %v4754_v30 }
 0x27d   : > { %v11798_v41 = vpop.f32.mrf.mxu0  ;;  %v4661_v49 = vmax.f32 %v4533_v39, 0.0  ;;  %v4758_v20 = vpack.c.bf16 %v4663_v62, %v4662_v3  ;;  %v4244_v62 = vadd.f32 %v11731_v55, %v11729_v13  ;;  %v4670_v43 = vmax.f32 %v4542_v14, 0.0 }
 0x27e   : > { %v11800_v59 = vpop.f32.mrf.mxu1 }
 0x27f   : > { %v11806_v48 = vpop.f32.mrf.mxu0  ;;  %v4757_v22 = vpack.c.bf16 %v4661_v49, %v4660_v35  ;;  %v4233_v35 = vadd.f32 %v11681_v28, %v11679_v29  ;;  %v4543_v13 = vadd.f32 %v11347_v56, %v4244_v62  ;;  %v4289_v27 = vadd.f32 %v11800_v59, %v11798_v41 }
 0x280   : > { %v11808_v63 = vpop.f32.mrf.mxu1 }
 0x281   : > { %v11813_v19 = vpop.f32.mrf.mxu0  ;;  %v4540_v29 = vadd.f32 %v11347_v56, %v4233_v35 }
 0x282   : > { %v11815_v52 = vpop.f32.mrf.mxu1 }
 0x283   : > { %v11819_v53 = vpop.f32.mrf.mxu0  ;;  %8209 = vmatmul.mubr.bf16.gmra.mxu0 %v4755_v32  ;;  %v4537_v32 = vadd.f32 %v11347_v56, %v4220_v11  ;;  %v4667_v11 = vmax.f32 %v4539_v9, 0.0  ;;  %v4668_v62 = vmax.f32 %v4540_v29, 0.0  ;;  %v4546_v29 = vadd.f32 %v11347_v56, %v4257_v6 }
 0x284   : > { %v11821_v30 = vpop.f32.mrf.mxu1  ;;  %8212 = vmatprep.mubr.bf16.mxu0 %v4756_v45 }
 0x285   : > { %v11826_v36 = vpop.f32.mrf.mxu0  ;;  %v4665_v60 = vmax.f32 %v4537_v32, 0.0  ;;  %v4760_v55 = vpack.c.bf16 %v4667_v11, %v4666_v33  ;;  %v4260_v11 = vadd.f32 %v11759_v38, %v11757_v46  ;;  %v4674_v6 = vmax.f32 %v4546_v29, 0.0 }
 0x286   : > { %v11828_v47 = vpop.f32.mrf.mxu1 }
 0x287   : > { %v11834_v24 = vpop.f32.mrf.mxu0  ;;  %v4759_v34 = vpack.c.bf16 %v4665_v60, %v4664_v18  ;;  %v4249_v18 = vadd.f32 %v11709_v61, %v11707_v16  ;;  %v4547_v46 = vadd.f32 %v11347_v56, %v4260_v11 }
 0x288   : > { %v11836_v26 = vpop.f32.mrf.mxu1 }
 0x289   : > { %v11841_v39 = vpop.f32.mrf.mxu0  ;;  %v4544_v16 = vadd.f32 %v11347_v56, %v4249_v18 }
 0x28a   : > { %v11843_v31 = vpop.f32.mrf.mxu1 }
 0x28b   : > { %v11847_v58 = vpop.f32.mrf.mxu0  ;;  %8213 = vmatmul.mubr.bf16.gmra.mxu0 %v4757_v22  ;;  %v4541_v22 = vadd.f32 %v11347_v56, %v4236_v10  ;;  %v4671_v10 = vmax.f32 %v4543_v13, 0.0  ;;  %v4672_v11 = vmax.f32 %v4544_v16, 0.0  ;;  %v4550_v16 = vadd.f32 %v11347_v56, %v4273_v5  ;;  %v11955_v5 = vld [vmem:[%s12569_s6] ss:$0 sm:$0xff] }
 0x28c   : > { %v11849_v45 = vpop.f32.mrf.mxu1  ;;  %8216 = vmatprep.mubr.bf16.mxu0 %v4758_v20  ;;  %v4554_v59 = vadd.f32 %v11955_v5, %v4289_v27 }
 0x28d   : > { %v11854_v54 = vpop.f32.mrf.mxu0  ;;  %v4669_v21 = vmax.f32 %v4541_v22, 0.0  ;;  %v4762_v38 = vpack.c.bf16 %v4671_v10, %v4670_v43  ;;  %v4276_v10 = vadd.f32 %v11787_v51, %v11785_v50 }
 0x28e   : > { %v11856_v49 = vpop.f32.mrf.mxu1  ;;  %v4682_v27 = vmax.f32 %v4554_v59, 0.0 }
 0x28f   : > { %v11862_v17 = vpop.f32.mrf.mxu0  ;;  %v4761_v4 = vpack.c.bf16 %v4669_v21, %v4668_v62  ;;  %v4265_v62 = vadd.f32 %v11737_v42, %v11735_v40  ;;  %v4551_v50 = vadd.f32 %v11347_v56, %v4276_v10 }
 0x290   : > { %v11864_v3 = vpop.f32.mrf.mxu1 }
 0x291   : > { %v11869_v32 = vpop.f32.mrf.mxu0  ;;  %v4548_v40 = vadd.f32 %v11347_v56, %v4265_v62 }
 0x292   : > { %v11871_v9 = vpop.f32.mrf.mxu1 }
 0x293   : > { %v11875_v28 = vpop.f32.mrf.mxu0  ;;  %8217 = vmatmul.mubr.bf16.gmra.mxu0 %v4759_v34  ;;  %v4545_v34 = vadd.f32 %v11347_v56, %v4252_v0  ;;  %v4675_v0 = vmax.f32 %v4547_v46, 0.0  ;;  %v4676_v10 = vmax.f32 %v4548_v40, 0.0  ;;  %v4300_v40 = vadd.f32 %v11808_v63, %v11806_v48 }
 0x294   : > { %v11877_v20 = vpop.f32.mrf.mxu1  ;;  %8220 = vmatprep.mubr.bf16.mxu0 %v4760_v55  ;;  %v4305_v48 = vadd.f32 %v11828_v47, %v11826_v36  ;;  %v4316_v36 = vadd.f32 %v11836_v26, %v11834_v24 }
 0x295   : > { %v11882_v12 = vpop.f32.mrf.mxu0  ;;  %v4673_v7 = vmax.f32 %v4545_v34, 0.0  ;;  %v4764_v51 = vpack.c.bf16 %v4675_v0, %v4674_v6  ;;  %v4292_v0 = vadd.f32 %v11815_v52, %v11813_v19  ;;  %v4678_v6 = vmax.f32 %v4550_v16, 0.0 }
 0x296   : > { %v11884_v60 = vpop.f32.mrf.mxu1  ;;  %v4553_v19 = vadd.f32 %v11955_v5, %v4284_v8  ;;  %v4561_v24 = vadd.f32 %v11955_v5, %v4316_v36 }
 0x297   : > { %v11890_v35 = vpop.f32.mrf.mxu0  ;;  %v4763_v44 = vpack.c.bf16 %v4673_v7, %v4672_v11  ;;  %v4281_v11 = vadd.f32 %v11765_v37, %v11763_v25  ;;  %v4555_v25 = vadd.f32 %v11955_v5, %v4292_v0 }
 0x298   : > { %v11892_v33 = vpop.f32.mrf.mxu1 }
 0x299   : > { %v11897_v22 = vpop.f32.mrf.mxu0  ;;  %v4683_v8 = vmax.f32 %v4555_v25, 0.0 }
 0x29a   : > { %v11899_v13 = vpop.f32.mrf.mxu1 }
 0x29b   : > { %v11903_v61 = vpop.f32.mrf.mxu0  ;;  %8221 = vmatmul.mubr.bf16.gmra.mxu0 %v4761_v4  ;;  %v4549_v4 = vadd.f32 %v11347_v56, %v4268_v23  ;;  %v4679_v23 = vmax.f32 %v4551_v50, 0.0 }
 0x29c   : > { %v11905_v55 = vpop.f32.mrf.mxu1  ;;  %8224 = vmatprep.mubr.bf16.mxu0 %v4762_v38 }
 0x29d   : > { %v11910_v14 = vpop.f32.mrf.mxu0  ;;  %v4677_v2 = vmax.f32 %v4549_v4, 0.0  ;;  %v4766_v37 = vpack.c.bf16 %v4679_v23, %v4678_v6  ;;  %v4552_v4 = vadd.f32 %v11955_v5, %v4281_v11  ;;  %v4308_v23 = vadd.f32 %v11843_v31, %v11841_v39 }
 0x29e   : > { %v11912_v21 = vpop.f32.mrf.mxu1  ;;  %v4768_v39 = vpack.c.bf16 %v4683_v8, %v4682_v27  ;;  %v4313_v8 = vadd.f32 %v11821_v30, %v11819_v53  ;;  %v4321_v27 = vadd.f32 %v11856_v49, %v11854_v54  ;;  %v4332_v54 = vadd.f32 %v11864_v3, %v11862_v17 }
 0x29f   : > { %v11918_v18 = vpop.f32.mrf.mxu0  ;;  %v4765_v1 = vpack.c.bf16 %v4677_v2, %v4676_v10  ;;  %v4680_v0 = vmax.f32 %v4552_v4, 0.0  ;;  %v4297_v10 = vadd.f32 %v11793_v57, %v11791_v15  ;;  %v4559_v25 = vadd.f32 %v11955_v5, %v4308_v23 }
 0x2a0   : > { %v11920_v43 = vpop.f32.mrf.mxu1  ;;  %v4558_v57 = vadd.f32 %v11955_v5, %v4305_v48  ;;  %v4562_v30 = vadd.f32 %v11955_v5, %v4321_v27  ;;  %v4565_v17 = vadd.f32 %v11955_v5, %v4332_v54 }
 0x2a1   : > { %v11925_v34 = vpop.f32.mrf.mxu0  ;;  %v4556_v31 = vadd.f32 %v11955_v5, %v4297_v10  ;;  %v4687_v59 = vmax.f32 %v4559_v25, 0.0  ;;  %v4689_v25 = vmax.f32 %v4561_v24, 0.0 }
 0x2a2   : > { %v11927_v46 = vpop.f32.mrf.mxu1  ;;  %v4686_v10 = vmax.f32 %v4558_v57, 0.0 }
 0x2a3   : > { %v11931_v42 = vpop.f32.mrf.mxu0  ;;  %8225 = vmatmul.mubr.bf16.gmra.mxu0 %v4763_v44 }
 0x2a4   : > { %v11933_v38 = vpop.f32.mrf.mxu1  ;;  %8228 = vmatprep.mubr.bf16.mxu0 %v4764_v51  ;;  %v4681_v51 = vmax.f32 %v4553_v19, 0.0 }
 0x2a5   : > { %v11938_v29 = vpop.f32.mrf.mxu0 }
 0x2a6   : > { %v11940_v7 = vpop.f32.mrf.mxu1  ;;  %v4767_v63 = vpack.c.bf16 %v4681_v51, %v4680_v0  ;;  %v4324_v51 = vadd.f32 %v11871_v9, %v11869_v32  ;;  %v4770_v32 = vpack.c.bf16 %v4687_v59, %v4686_v10  ;;  %v4560_v9 = vadd.f32 %v11955_v5, %v4313_v8 }
 0x2a7   : > { %v11946_v62 = vpop.f32.mrf.mxu0 }
 0x2a8   : > { %v11948_v56 = vpop.f32.mrf.mxu1  ;;  %v4688_v57 = vmax.f32 %v4560_v9, 0.0  ;;  %v4345_v9 = vadd.f32 %v11877_v20, %v11875_v28 }
 0x2a9   : > { %v11958_v52 = vpop.f32.mrf.mxu0 }
 0x2aa   : > { %v11960_v44 = vpop.f32.mrf.mxu1  ;;  %v4771_v8 = vpack.c.bf16 %v4689_v25, %v4688_v57 }
 0x2ab   : > { %v11964_v50 = vpop.f32.mrf.mxu0  ;;  %8229 = vmatmul.mubr.bf16.gmra.mxu0 %v4765_v1  ;;  %v4557_v1 = vadd.f32 %v11955_v5, %v4300_v40  ;;  %v4684_v40 = vmax.f32 %v4556_v31, 0.0  ;;  %v4340_v31 = vadd.f32 %v11899_v13, %v11897_v22 }
 0x2ac   : > { %v11966_v41 = vpop.f32.mrf.mxu1  ;;  %8232 = vmatprep.mubr.bf16.mxu0 %v4766_v37 }
 0x2ad   : > { %v11971_v16 = vpop.f32.mrf.mxu0  ;;  %v4685_v4 = vmax.f32 %v4557_v1, 0.0  ;;  %v4567_v10 = vadd.f32 %v11955_v5, %v4340_v31 }
 0x2ae   : > { %v11973_v2 = vpop.f32.mrf.mxu1 }
 0x2af   : > { %v11979_v11 = vpop.f32.mrf.mxu0  ;;  %v4769_v48 = vpack.c.bf16 %v4685_v4, %v4684_v40  ;;  %v4329_v4 = vadd.f32 %v11849_v45, %v11847_v58  ;;  %v4337_v40 = vadd.f32 %v11884_v60, %v11882_v12  ;;  %v4348_v12 = vadd.f32 %v11892_v33, %v11890_v35 }
 0x2b0   : > { %v11981_v6 = vpop.f32.mrf.mxu1  ;;  %v4695_v24 = vmax.f32 %v4567_v10, 0.0  ;;  %v4361_v10 = vadd.f32 %v11905_v55, %v11903_v61 }
 0x2b1   : > { %v11986_v19 = vpop.f32.mrf.mxu0  ;;  %v4564_v13 = vadd.f32 %v11955_v5, %v4329_v4  ;;  %v4566_v45 = vadd.f32 %v11955_v5, %v4337_v40  ;;  %v4569_v35 = vadd.f32 %v11955_v5, %v4348_v12 }
 0x2b2   : > { %v11990_v37 = vpop.f32.mrf.mxu1 }
 0x2b3   : > { %v11992_v15 = vpop.f32.mrf.mxu0  ;;  %8233 = vmatmul.mubr.bf16.gmra.mxu0 %v4767_v63  ;;  %v4563_v63 = vadd.f32 %v11955_v5, %v4324_v51  ;;  %v4690_v51 = vmax.f32 %v4562_v30, 0.0  ;;  %v4694_v54 = vmax.f32 %v4566_v45, 0.0 }
 0x2b4   : > { %8236 = vmatprep.mubr.bf16.mxu0 %v4768_v39  ;;  %v12003_v23 = vpop.f32.mrf.mxu1 }
 0x2b5   : > { %v11997_v47 = vpop.f32.mrf.mxu0  ;;  %v4691_v39 = vmax.f32 %v4563_v63, 0.0  ;;  %v4356_v63 = vadd.f32 %v11927_v46, %v11925_v34  ;;  %v4774_v34 = vpack.c.bf16 %v4695_v24, %v4694_v54  ;;  %v4568_v46 = vadd.f32 %v11955_v5, %v4345_v9 }
 0x2b6   : > { %v12014_v1 = vpop.f32.mrf.mxu1  ;;  %v4388_v54 = vadd.f32 %v11990_v37, %v11986_v19 }
 0x2b7   : > { %v12005_v0 = vpop.f32.mrf.mxu0  ;;  %v4772_v22 = vpack.c.bf16 %v4691_v39, %v4690_v51  ;;  %v4353_v39 = vadd.f32 %v11912_v21, %v11910_v14  ;;  %v4571_v57 = vadd.f32 %v11955_v5, %v4356_v63  ;;  %v4697_v51 = vmax.f32 %v4569_v35, 0.0 }
 0x2b8   : > { %v12027_v36 = vpop.f32.mrf.mxu1  ;;  %v4364_v14 = vadd.f32 %v11920_v43, %v11918_v18  ;;  %v4377_v35 = vadd.f32 %v11933_v38, %v11931_v42 }
 0x2b9   : > { %v12010_v26 = vpop.f32.mrf.mxu0  ;;  %v4570_v20 = vadd.f32 %v11955_v5, %v4353_v39  ;;  %v4699_v40 = vmax.f32 %v4571_v57, 0.0  ;;  %v12096_v39 = vld [vmem:[%s12571_s8] ss:$0 sm:$0xff] }
 0x2ba   : > { %v12038_v27 = vpop.f32.mrf.mxu1  ;;  %v4573_v18 = vadd.f32 %v11955_v5, %v4364_v14 }
 0x2bb   : > { %v12016_v53 = vpop.f32.mrf.mxu0  ;;  %8237 = vmatmul.mubr.bf16.gmra.mxu0 %v4769_v48  ;;  %v4693_v48 = vmax.f32 %v4565_v17, 0.0  ;;  %v4696_v17 = vmax.f32 %v4568_v46, 0.0  ;;  %v4698_v45 = vmax.f32 %v4570_v20, 0.0 }
 0x2bc   : > { %8240 = vmatprep.mubr.bf16.mxu0 %v4770_v32  ;;  %v4692_v32 = vmax.f32 %v4564_v13, 0.0  ;;  %v12051_v30 = vpop.f32.mrf.mxu1 }
 0x2bd   : > { %v12021_v49 = vpop.f32.mrf.mxu0  ;;  %v4775_v12 = vpack.c.bf16 %v4697_v51, %v4696_v17 }
 0x2be   : > { %v4773_v31 = vpack.c.bf16 %v4693_v48, %v4692_v32  ;;  %v12062_v4 = vpop.f32.mrf.mxu1  ;;  %v4369_v48 = vadd.f32 %v11940_v7, %v11938_v29  ;;  %v4701_v32 = vmax.f32 %v4573_v18, 0.0  ;;  %v4380_v29 = vadd.f32 %v11948_v56, %v11946_v62 }
 0x2bf   : > { %v12029_v59 = vpop.f32.mrf.mxu0  ;;  %v4385_v62 = vadd.f32 %v11973_v2, %v11971_v16  ;;  %v4396_v18 = vadd.f32 %v11981_v6, %v11979_v11 }
 0x2c0   : > { %v4574_v55 = vadd.f32 %v11955_v5, %v4369_v48  ;;  %v4577_v20 = vadd.f32 %v11955_v5, %v4380_v29  ;;  %v4393_v29 = vadd.f32 %v11966_v41, %v11964_v50 }
 0x2c1   : > { %v12034_v3 = vpop.f32.mrf.mxu0 }
 0x2c2   : > { %v4702_v46 = vmax.f32 %v4574_v55, 0.0 }
 0x2c3   : > { %v12040_v58 = vpop.f32.mrf.mxu0  ;;  %8241 = vmatmul.mubr.bf16.gmra.mxu0 %v4771_v8  ;;  %v4372_v8 = vadd.f32 %v11960_v44, %v11958_v52  ;;  %v4776_v52 = vpack.c.bf16 %v4699_v40, %v4698_v45  ;;  %v4572_v44 = vadd.f32 %v11955_v5, %v4361_v10  ;;  %v4579_v40 = vadd.f32 %v11955_v5, %v4388_v54 }
 0x2c4   : > { %8244 = vmatprep.mubr.bf16.mxu0 %v4772_v22  ;;  %v12075_v22 = vpop.f32.mrf.mxu1  ;;  %v4578_v10 = vadd.f32 %v11955_v5, %v4385_v62 }
 0x2c5   : > { %v12045_v60 = vpop.f32.mrf.mxu0  ;;  %v4575_v24 = vadd.f32 %v11955_v5, %v4372_v8  ;;  %v4576_v8 = vadd.f32 %v11955_v5, %v4377_v35  ;;  %v4401_v35 = vadd.f32 %v12014_v1, %v11997_v47 }
 0x2c6   : > { %v12086_v63 = vpop.f32.mrf.mxu1 }
 0x2c7   : > { %v12053_v25 = vpop.f32.mrf.mxu0  ;;  %v4703_v9 = vmax.f32 %v4575_v24, 0.0 }
 0x2c8   : > { %v12100_v57 = vpop.f32.mrf.mxu1 }
 0x2c9   : > { %v12058_v33 = vpop.f32.mrf.mxu0  ;;  %v4778_v38 = vpack.c.bf16 %v4703_v9, %v4702_v46 }
 0x2ca   : > { %v12111_v17 = vpop.f32.mrf.mxu1 }
 0x2cb   : > { %v12064_v28 = vpop.f32.mrf.mxu0  ;;  %8245 = vmatmul.mubr.bf16.gmra.mxu0 %v4773_v31  ;;  %v4700_v31 = vmax.f32 %v4572_v44, 0.0  ;;  %v4707_v44 = vmax.f32 %v4579_v40, 0.0  ;;  %v4412_v40 = vadd.f32 %v12027_v36, %v12005_v0 }
 0x2cc   : > { %8248 = vmatprep.mubr.bf16.mxu0 %v4774_v34 }
 0x2cd   : > { %v12069_v21 = vpop.f32.mrf.mxu0  ;;  %v4777_v37 = vpack.c.bf16 %v4701_v32, %v4700_v31  ;;  %v4704_v32 = vmax.f32 %v4576_v8, 0.0  ;;  %v4706_v31 = vmax.f32 %v4578_v10, 0.0 }
 0x2cf   : > { %v12077_v13 = vpop.f32.mrf.mxu0  ;;  %v4780_v62 = vpack.c.bf16 %v4707_v44, %v4706_v31 }
 0x2d1   : > { %v12082_v43 = vpop.f32.mrf.mxu0 }
 0x2d3   : > { %v8154_v61 = vpop.f32.mrf.mxu0  ;;  %8249 = vmatmul.mubr.bf16.gmra.mxu0 %v4775_v12  ;;  %v4705_v12 = vmax.f32 %v4577_v20, 0.0 }
 0x2d4   : > { %8252 = vmatprep.mubr.bf16.mxu0 %v4776_v52  ;;  %v4904_v51 = vadd.f32 %v8154_v61, %v12096_v39  ;;  %v4404_v61 = vadd.f32 %v12038_v27, %v12010_v26  ;;  %v4581_v26 = vadd.f32 %v11955_v5, %v4396_v18 }
 0x2d5   : > { %v4895_v7 = vpop.f32.mrf.mxu0 }
 0x2d6   : > { %v4896_v56 = vadd.f32 %v12096_v39, %v4895_v7  ;;  %v5408_v24 = vmax.f32 %v4904_v51, 0.0  ;;  %v12120_v7 = vpop.f32.mrf.mxu1  ;;  %v4583_v50 = vadd.f32 %v11955_v5, %v4404_v61 }
 0x2d7   : > { %v8155_v34 = vpop.f32.mrf.mxu0 }
 0x2d8   : > { %v4907_v19 = vadd.f32 %v8155_v34, %v12096_v39  ;;  %v5406_v45 = vmax.f32 %v4896_v56, 0.0  ;;  %v4779_v34 = vpack.c.bf16 %v4705_v12, %v4704_v32  ;;  %v4580_v56 = vadd.f32 %v11955_v5, %v4393_v29  ;;  %v4435_v47 = vpop.f32.mrf.mxu1 }
 0x2d9   : > { %v4898_v14 = vpop.f32.mrf.mxu0  ;;  %v4711_v8 = vmax.f32 %v4583_v50, 0.0 }
 0x2da   : > { %v4899_v42 = vadd.f32 %v12096_v39, %v4898_v14  ;;  %v5409_v16 = vmax.f32 %v4907_v19, 0.0  ;;  %v4709_v14 = vmax.f32 %v4581_v26, 0.0  ;;  %v4708_v10 = vmax.f32 %v4580_v56, 0.0 }
 0x2db   : > { %v8158_v2 = vpop.f32.mrf.mxu0  ;;  %8253 = vmatmul.mubr.bf16.gmra.mxu0 %v4777_v37  ;;  %v4582_v37 = vadd.f32 %v11955_v5, %v4401_v35 }
 0x2dc   : > { %v5407_v48 = vmax.f32 %v4899_v42, 0.0  ;;  %8256 = vmatprep.mubr.bf16.mxu0 %v4778_v38  ;;  %v5535_v9 = vpack.c.bf16 %v5409_v16, %v5408_v24  ;;  %v4920_v27 = vadd.f32 %v8158_v2, %v12096_v39  ;;  %v4420_v16 = vadd.f32 %v12086_v63, %v12034_v3 }
 0x2dd   : > { %v4911_v52 = vpop.f32.mrf.mxu0  ;;  %v4710_v24 = vmax.f32 %v4582_v37, 0.0  ;;  %v4781_v44 = vpack.c.bf16 %v4709_v14, %v4708_v10  ;;  %v4585_v3 = vadd.f32 %v11955_v5, %v4412_v40  ;;  %v4433_v37 = vadd.f32 %v12111_v17, %v12045_v60 }
 0x2de   : > { %v5534_v55 = vpack.c.bf16 %v5407_v48, %v5406_v45  ;;  %v4912_v11 = vadd.f32 %v12096_v39, %v4911_v52  ;;  %v5412_v42 = vmax.f32 %v4920_v27, 0.0  ;;  %v4409_v45 = vadd.f32 %v12003_v23, %v11992_v15  ;;  %v12138_v48 = vpop.f32.mrf.mxu1 }
 0x2df   : > { %v8159_v54 = vpop.f32.mrf.mxu0  ;;  %v4417_v52 = vadd.f32 %v12062_v4, %v12021_v49  ;;  %v4587_v15 = vadd.f32 %v11955_v5, %v4420_v16  ;;  %v4713_v35 = vmax.f32 %v4585_v3, 0.0  ;;  %v4436_v27 = vadd.f32 %v4435_v47, %v12058_v33 }
 0x2e0   : > { %v4923_v6 = vadd.f32 %v8159_v54, %v12096_v39  ;;  %8296 = vmatprep.mubr.bf16.mxu1 %v5534_v55  ;;  %v5410_v20 = vmax.f32 %v4912_v11, 0.0  ;;  %v4782_v55 = vpack.c.bf16 %v4711_v8, %v4710_v24  ;;  %v4584_v32 = vadd.f32 %v11955_v5, %v4409_v45  ;;  %v4448_v49 = vpop.f32.mrf.mxu1 }
 0x2e1   : > { %v4914_v46 = vpop.f32.mrf.mxu0  ;;  %8297 = vmatmul.mubr.bf16.vlgmr.msra.gmra.mxu1 %v5535_v9  ;;  %v4586_v9 = vadd.f32 %v11955_v5, %v4417_v52  ;;  %v4428_v11 = vadd.f32 %v12075_v22, %v12029_v59  ;;  %v4715_v26 = vmax.f32 %v4587_v15, 0.0  ;;  %v4444_v10 = vadd.f32 %v12120_v7, %v12053_v25 }
 0x2e2   : > { %v4915_v41 = vadd.f32 %v12096_v39, %v4914_v46  ;;  %v5413_v1 = vmax.f32 %v4923_v6, 0.0  ;;  %v4712_v50 = vmax.f32 %v4584_v32, 0.0 }
 0x2e3   : > { %v8162_v19 = vpop.f32.mrf.mxu0  ;;  %8257 = vmatmul.mubr.bf16.gmra.mxu0 %v4779_v34  ;;  %v4589_v33 = vadd.f32 %v11955_v5, %v4428_v11  ;;  %v4593_v7 = vadd.f32 %v11955_v5, %v4444_v10 }
 0x2e4   : > { %v5411_v51 = vmax.f32 %v4915_v41, 0.0  ;;  %8260 = vmatprep.mubr.bf16.mxu0 %v4780_v62  ;;  %v5537_v12 = vpack.c.bf16 %v5413_v1, %v5412_v42  ;;  %v4936_v63 = vadd.f32 %v8162_v19, %v12096_v39  ;;  %v4425_v41 = vadd.f32 %v12051_v30, %v12016_v53  ;;  %v8135_v62 = vpop.f32.mrf.mxu1 }
 0x2e5   : > { %v4927_v38 = vpop.f32.mrf.mxu0  ;;  %v4714_v19 = vmax.f32 %v4586_v9, 0.0  ;;  %v4783_v22 = vpack.c.bf16 %v4713_v35, %v4712_v50  ;;  %v4591_v53 = vadd.f32 %v11955_v5, %v4436_v27  ;;  %v4460_v35 = vadd.f32 %v8135_v62, %v12077_v13 }
 0x2e6   : > { %v5536_v2 = vpack.c.bf16 %v5411_v51, %v5410_v20  ;;  %v4928_v0 = vadd.f32 %v12096_v39, %v4927_v38  ;;  %v5416_v6 = vmax.f32 %v4936_v63, 0.0  ;;  %v4588_v40 = vadd.f32 %v11955_v5, %v4425_v41  ;;  %v4451_v60 = vpop.f32.mrf.mxu1 }
 0x2e7   : > { %v8163_v18 = vpop.f32.mrf.mxu0  ;;  %v4784_v14 = vpack.c.bf16 %v4715_v26, %v4714_v19  ;;  %v4590_v38 = vadd.f32 %v11955_v5, %v4433_v37  ;;  %v4452_v24 = vadd.f32 %v4451_v60, %v12082_v43 }
 0x2e8   : > { %v4939_v36 = vadd.f32 %v8163_v18, %v12096_v39  ;;  %8300 = vmatprep.mubr.bf16.mxu1 %v5536_v2  ;;  %v5414_v54 = vmax.f32 %v4928_v0, 0.0  ;;  %v4717_v2 = vmax.f32 %v4589_v33, 0.0  ;;  %v4719_v18 = vmax.f32 %v4591_v53, 0.0 }
 0x2e9   : > { %v4930_v61 = vpop.f32.mrf.mxu0  ;;  %8301 = vmatmul.mubr.bf16.gmra.mxu1 %v5537_v12  ;;  %v4716_v0 = vmax.f32 %v4588_v40, 0.0  ;;  %v4718_v63 = vmax.f32 %v4590_v38, 0.0  ;;  %v4595_v32 = vadd.f32 %v11955_v5, %v4452_v24 }
 0x2ea   : > { %v4931_v23 = vadd.f32 %v12096_v39, %v4930_v61  ;;  %v5417_v4 = vmax.f32 %v4939_v36, 0.0  ;;  %v4441_v36 = vadd.f32 %v12100_v57, %v12040_v58  ;;  %v4449_v61 = vadd.f32 %v4448_v49, %v12069_v21 }
 0x2eb   : > { %v8166_v29 = vpop.f32.mrf.mxu0  ;;  %8261 = vmatmul.mubr.bf16.gmra.mxu0 %v4781_v44  ;;  %v4785_v25 = vpack.c.bf16 %v4717_v2, %v4716_v0  ;;  %v4786_v57 = vpack.c.bf16 %v4719_v18, %v4718_v63 }
 0x2ec   : > { %v5415_v31 = vmax.f32 %v4931_v23, 0.0  ;;  %8264 = vmatprep.mubr.bf16.mxu0 %v4782_v55  ;;  %v5539_v56 = vpack.c.bf16 %v5417_v4, %v5416_v6  ;;  %v4952_v47 = vadd.f32 %v8166_v29, %v12096_v39  ;;  %v4592_v4 = vadd.f32 %v11955_v5, %v4441_v36 }
 0x2ed   : > { %v4943_v34 = vpop.f32.mrf.mxu0  ;;  %v4594_v29 = vadd.f32 %v11955_v5, %v4449_v61 }
 0x2ee   : > { %v5538_v46 = vpack.c.bf16 %v5415_v31, %v5414_v54  ;;  %v4944_v20 = vadd.f32 %v12096_v39, %v4943_v34  ;;  %v5420_v45 = vmax.f32 %v4952_v47, 0.0  ;;  %v4721_v31 = vmax.f32 %v4593_v7, 0.0 }
 0x2ef   : > { %v8167_v1 = vpop.f32.mrf.mxu0  ;;  %v4723_v34 = vmax.f32 %v4595_v32, 0.0  ;;  %v4720_v27 = vmax.f32 %v4592_v4, 0.0 }
 0x2f0   : > { %v4955_v59 = vadd.f32 %v8167_v1, %v12096_v39  ;;  %8304 = vmatprep.mubr.bf16.mxu1 %v5538_v46  ;;  %v5418_v8 = vmax.f32 %v4944_v20, 0.0  ;;  %v4457_v46 = vadd.f32 %v12138_v48, %v12064_v28  ;;  %v4597_v20 = vadd.f32 %v11955_v5, %v4460_v35 }
 0x2f1   : > { %v4946_v51 = vpop.f32.mrf.mxu0  ;;  %8305 = vmatmul.mubr.bf16.gmra.mxu1 %v5539_v56  ;;  %v4722_v56 = vmax.f32 %v4594_v29, 0.0  ;;  %v4787_v37 = vpack.c.bf16 %v4721_v31, %v4720_v27 }
 0x2f2   : > { %v4947_v30 = vadd.f32 %v12096_v39, %v4946_v51  ;;  %v5421_v17 = vmax.f32 %v4955_v59, 0.0  ;;  %v4596_v28 = vadd.f32 %v11955_v5, %v4457_v46  ;;  %v4725_v53 = vmax.f32 %v4597_v20, 0.0 }
 0x2f3   : > { %v8170_v42 = vpop.f32.mrf.mxu0  ;;  %8265 = vmatmul.mubr.bf16.gmra.mxu0 %v4783_v22  ;;  %v4788_v22 = vpack.c.bf16 %v4723_v34, %v4722_v56 }
 0x2f4   : > { %v5419_v16 = vmax.f32 %v4947_v30, 0.0  ;;  %8268 = vmatprep.mubr.bf16.mxu0 %v4784_v14  ;;  %v5541_v44 = vpack.c.bf16 %v5421_v17, %v5420_v45  ;;  %v4968_v43 = vadd.f32 %v8170_v42, %v12096_v39  ;;  %v4724_v60 = vmax.f32 %v4596_v28, 0.0 }
 0x2f5   : > { %v4959_v12 = vpop.f32.mrf.mxu0 }
 0x2f6   : > { %v5540_v52 = vpack.c.bf16 %v5419_v16, %v5418_v8  ;;  %v4960_v15 = vadd.f32 %v12096_v39, %v4959_v12  ;;  %v5424_v11 = vmax.f32 %v4968_v43, 0.0  ;;  %v4789_v16 = vpack.c.bf16 %v4725_v53, %v4724_v60 }
 0x2f7   : > { %v8171_v3 = vpop.f32.mrf.mxu0 }
 0x2f8   : > { %v4971_v23 = vadd.f32 %v8171_v3, %v12096_v39  ;;  %8308 = vmatprep.mubr.bf16.mxu1 %v5540_v52  ;;  %v5422_v9 = vmax.f32 %v4960_v15, 0.0 }
 0x2f9   : > { %v4962_v55 = vpop.f32.mrf.mxu0  ;;  %8309 = vmatmul.mubr.bf16.gmra.mxu1 %v5541_v44 }
 0x2fa   : > { %v4963_v58 = vadd.f32 %v12096_v39, %v4962_v55  ;;  %v5425_v21 = vmax.f32 %v4971_v23, 0.0 }
 0x2fb   : > { %v8174_v49 = vpop.f32.mrf.mxu0  ;;  %8269 = vmatmul.mubr.bf16.gmra.mxu0 %v4785_v25 }
 0x2fc   : > { %v5423_v54 = vmax.f32 %v4963_v58, 0.0  ;;  %8272 = vmatprep.mubr.bf16.mxu0 %v4786_v57  ;;  %v5543_v50 = vpack.c.bf16 %v5425_v21, %v5424_v11  ;;  %v4984_v13 = vadd.f32 %v8174_v49, %v12096_v39 }
 0x2fd   : > { %v4975_v6 = vpop.f32.mrf.mxu0 }
 0x2fe   : > { %v5542_v26 = vpack.c.bf16 %v5423_v54, %v5422_v9  ;;  %v4976_v1 = vadd.f32 %v12096_v39, %v4975_v6  ;;  %v5428_v30 = vmax.f32 %v4984_v13, 0.0 }
 0x2ff   : > { %v8175_v41 = vpop.f32.mrf.mxu0 }
 0x300   : > { %v4987_v19 = vadd.f32 %v8175_v41, %v12096_v39  ;;  %8312 = vmatprep.mubr.bf16.mxu1 %v5542_v26  ;;  %v5426_v47 = vmax.f32 %v4976_v1, 0.0 }
 0x301   : > { %v4978_v62 = vpop.f32.mrf.mxu0  ;;  %8313 = vmatmul.mubr.bf16.gmra.mxu1 %v5543_v50 }
 0x302   : > { %v4979_v59 = vadd.f32 %v12096_v39, %v4978_v62  ;;  %v5429_v48 = vmax.f32 %v4987_v19, 0.0 }
 0x303   : > { %v8178_v33 = vpop.f32.mrf.mxu0  ;;  %8273 = vmatmul.mubr.bf16.gmra.mxu0 %v4787_v37 }
 0x304   : > { %v5427_v51 = vmax.f32 %v4979_v59, 0.0  ;;  %8276 = vmatprep.mubr.bf16.mxu0 %v4788_v22  ;;  %v5545_v17 = vpack.c.bf16 %v5429_v48, %v5428_v30  ;;  %v5000_v5 = vadd.f32 %v8178_v33, %v12096_v39 }
 0x305   : > { %v4991_v14 = vpop.f32.mrf.mxu0 }
 0x306   : > { %v5544_v40 = vpack.c.bf16 %v5427_v51, %v5426_v47  ;;  %v4992_v38 = vadd.f32 %v12096_v39, %v4991_v14  ;;  %v5432_v52 = vmax.f32 %v5000_v5, 0.0 }
 0x307   : > { %v8179_v42 = vpop.f32.mrf.mxu0 }
 0x308   : > { %v5003_v8 = vadd.f32 %v8179_v42, %v12096_v39  ;;  %8316 = vmatprep.mubr.bf16.mxu1 %v5544_v40  ;;  %v5430_v18 = vmax.f32 %v4992_v38, 0.0 }
 0x309   : > { %v4994_v2 = vpop.f32.mrf.mxu0  ;;  %8317 = vmatmul.mubr.bf16.gmra.mxu1 %v5545_v17 }
 0x30a   : > { %v4995_v10 = vadd.f32 %v12096_v39, %v4994_v2  ;;  %v5433_v45 = vmax.f32 %v5003_v8, 0.0 }
 0x30b   : > { %v8182_v12 = vpop.f32.mrf.mxu0  ;;  %8277 = vmatmul.mubr.bf16.gmra.mxu0 %v4789_v16 }
 0x30c   : > { %v5431_v24 = vmax.f32 %v4995_v10, 0.0  ;;  %v5547_v44 = vpack.c.bf16 %v5433_v45, %v5432_v52  ;;  %v5016_v15 = vadd.f32 %v8182_v12, %v12096_v39 }
 0x30d   : > { %v5007_v0 = vpop.f32.mrf.mxu0 }
 0x30e   : > { %v5546_v36 = vpack.c.bf16 %v5431_v24, %v5430_v18  ;;  %v5008_v63 = vadd.f32 %v12096_v39, %v5007_v0  ;;  %v5436_v58 = vmax.f32 %v5016_v15, 0.0 }
 0x30f   : > { %v8183_v3 = vpop.f32.mrf.mxu0 }
 0x310   : > { %v5019_v61 = vadd.f32 %v8183_v3, %v12096_v39  ;;  %8320 = vmatprep.mubr.bf16.mxu1 %v5546_v36  ;;  %v5434_v55 = vmax.f32 %v5008_v63, 0.0 }
 0x311   : > { %v5010_v23 = vpop.f32.mrf.mxu0  ;;  %8321 = vmatmul.mubr.bf16.gmra.mxu1 %v5547_v44 }
 0x312   : > { %v5011_v25 = vadd.f32 %v12096_v39, %v5010_v23  ;;  %v5437_v7 = vmax.f32 %v5019_v61, 0.0 }
 0x313   : > { %v8186_v43 = vpop.f32.mrf.mxu0 }
 0x314   : > { %v5435_v32 = vmax.f32 %v5011_v25, 0.0  ;;  %v5549_v21 = vpack.c.bf16 %v5437_v7, %v5436_v58  ;;  %v5032_v54 = vadd.f32 %v8186_v43, %v12096_v39 }
 0x315   : > { %v5023_v57 = vpop.f32.mrf.mxu0 }
 0x316   : > { %v5548_v4 = vpack.c.bf16 %v5435_v32, %v5434_v55  ;;  %v5024_v29 = vadd.f32 %v12096_v39, %v5023_v57  ;;  %v5440_v27 = vmax.f32 %v5032_v54, 0.0 }
 0x317   : > { %v8187_v49 = vpop.f32.mrf.mxu0 }
 0x318   : > { %v5035_v9 = vadd.f32 %v8187_v49, %v12096_v39  ;;  %8324 = vmatprep.mubr.bf16.mxu1 %v5548_v4  ;;  %v5438_v34 = vmax.f32 %v5024_v29, 0.0 }
 0x319   : > { %v5026_v31 = vpop.f32.mrf.mxu0  ;;  %8325 = vmatmul.mubr.bf16.gmra.mxu1 %v5549_v21 }
 0x31a   : > { %v5027_v35 = vadd.f32 %v12096_v39, %v5026_v31  ;;  %v5441_v11 = vmax.f32 %v5035_v9, 0.0 }
 0x31b   : > { %v8190_v6 = vpop.f32.mrf.mxu0 }
 0x31c   : > { %v5439_v26 = vmax.f32 %v5027_v35, 0.0  ;;  %v5551_v41 = vpack.c.bf16 %v5441_v11, %v5440_v27  ;;  %v5048_v37 = vadd.f32 %v8190_v6, %v12096_v39 }
 0x31d   : > { %v5039_v46 = vpop.f32.mrf.mxu0 }
 0x31e   : > { %v5550_v50 = vpack.c.bf16 %v5439_v26, %v5438_v34  ;;  %v5040_v1 = vadd.f32 %v12096_v39, %v5039_v46  ;;  %v5444_v48 = vmax.f32 %v5048_v37, 0.0 }
 0x31f   : > { %v8191_v56 = vpop.f32.mrf.mxu0 }
 0x320   : > { %v5051_v19 = vadd.f32 %v8191_v56, %v12096_v39  ;;  %8328 = vmatprep.mubr.bf16.mxu1 %v5550_v50  ;;  %v5442_v22 = vmax.f32 %v5040_v1, 0.0 }
 0x321   : > { %v5042_v20 = vpop.f32.mrf.mxu0  ;;  %8329 = vmatmul.mubr.bf16.gmra.mxu1 %v5551_v41 }
 0x322   : > { %v5043_v13 = vadd.f32 %v12096_v39, %v5042_v20  ;;  %v5445_v62 = vmax.f32 %v5051_v19, 0.0 }
 0x323   : > { %v8194_v59 = vpop.f32.mrf.mxu0 }
 0x324   : > { %v5443_v28 = vmax.f32 %v5043_v13, 0.0  ;;  %v5553_v51 = vpack.c.bf16 %v5445_v62, %v5444_v48  ;;  %v5064_v40 = vadd.f32 %v8194_v59, %v12096_v39 }
 0x325   : > { %v5055_v33 = vpop.f32.mrf.mxu0 }
 0x326   : > { %v5552_v47 = vpack.c.bf16 %v5443_v28, %v5442_v22  ;;  %v5056_v30 = vadd.f32 %v12096_v39, %v5055_v33  ;;  %v5448_v5 = vmax.f32 %v5064_v40, 0.0 }
 0x327   : > { %v8195_v53 = vpop.f32.mrf.mxu0 }
 0x328   : > { %v5067_v14 = vadd.f32 %v8195_v53, %v12096_v39  ;;  %8332 = vmatprep.mubr.bf16.mxu1 %v5552_v47  ;;  %v5446_v8 = vmax.f32 %v5056_v30, 0.0 }
 0x329   : > { %v5058_v60 = vpop.f32.mrf.mxu0  ;;  %8333 = vmatmul.mubr.bf16.gmra.mxu1 %v5553_v51 }
 0x32a   : > { %v5059_v17 = vadd.f32 %v12096_v39, %v5058_v60  ;;  %v5449_v42 = vmax.f32 %v5067_v14, 0.0 }
 0x32b   : > { %v8198_v38 = vpop.f32.mrf.mxu0 }
 0x32c   : > { %v5447_v16 = vmax.f32 %v5059_v17, 0.0  ;;  %v5555_v45 = vpack.c.bf16 %v5449_v42, %v5448_v5  ;;  %v5080_v52 = vadd.f32 %v8198_v38, %v12096_v39 }
 0x32d   : > { %v5071_v2 = vpop.f32.mrf.mxu0 }
 0x32e   : > { %v5554_v10 = vpack.c.bf16 %v5447_v16, %v5446_v8  ;;  %v5072_v18 = vadd.f32 %v12096_v39, %v5071_v2  ;;  %v5452_v15 = vmax.f32 %v5080_v52, 0.0 }
 0x32f   : > { %v8199_v12 = vpop.f32.mrf.mxu0 }
 0x330   : > { %v5083_v24 = vadd.f32 %v8199_v12, %v12096_v39  ;;  %8336 = vmatprep.mubr.bf16.mxu1 %v5554_v10  ;;  %v5450_v63 = vmax.f32 %v5072_v18, 0.0 }
 0x331   : > { %v5074_v0 = vpop.f32.mrf.mxu0  ;;  %8337 = vmatmul.mubr.bf16.gmra.mxu1 %v5555_v45 }
 0x332   : > { %v5075_v36 = vadd.f32 %v12096_v39, %v5074_v0  ;;  %v5453_v44 = vmax.f32 %v5083_v24, 0.0 }
 0x333   : > { %v8202_v3 = vpop.f32.mrf.mxu0 }
 0x334   : > { %v5451_v61 = vmax.f32 %v5075_v36, 0.0  ;;  %v5557_v7 = vpack.c.bf16 %v5453_v44, %v5452_v15  ;;  %v5096_v58 = vadd.f32 %v8202_v3, %v12096_v39 }
 0x335   : > { %v5087_v23 = vpop.f32.mrf.mxu0 }
 0x336   : > { %v5556_v25 = vpack.c.bf16 %v5451_v61, %v5450_v63  ;;  %v5088_v55 = vadd.f32 %v12096_v39, %v5087_v23  ;;  %v5456_v54 = vmax.f32 %v5096_v58, 0.0 }
 0x337   : > { %v8203_v43 = vpop.f32.mrf.mxu0 }
 0x338   : > { %v5099_v32 = vadd.f32 %v8203_v43, %v12096_v39  ;;  %8340 = vmatprep.mubr.bf16.mxu1 %v5556_v25  ;;  %v5454_v29 = vmax.f32 %v5088_v55, 0.0 }
 0x339   : > { %v5090_v57 = vpop.f32.mrf.mxu0  ;;  %8341 = vmatmul.mubr.bf16.gmra.mxu1 %v5557_v7 }
 0x33a   : > { %v5091_v4 = vadd.f32 %v12096_v39, %v5090_v57  ;;  %v5457_v21 = vmax.f32 %v5099_v32, 0.0 }
 0x33b   : > { %v8206_v49 = vpop.f32.mrf.mxu0 }
 0x33c   : > { %v5455_v9 = vmax.f32 %v5091_v4, 0.0  ;;  %v5559_v11 = vpack.c.bf16 %v5457_v21, %v5456_v54  ;;  %v5112_v27 = vadd.f32 %v8206_v49, %v12096_v39 }
 0x33d   : > { %v5103_v31 = vpop.f32.mrf.mxu0 }
 0x33e   : > { %v5558_v35 = vpack.c.bf16 %v5455_v9, %v5454_v29  ;;  %v5104_v34 = vadd.f32 %v12096_v39, %v5103_v31  ;;  %v5460_v37 = vmax.f32 %v5112_v27, 0.0 }
 0x33f   : > { %v8207_v6 = vpop.f32.mrf.mxu0 }
 0x340   : > { %v5115_v26 = vadd.f32 %v8207_v6, %v12096_v39  ;;  %8344 = vmatprep.mubr.bf16.mxu1 %v5558_v35  ;;  %v5458_v1 = vmax.f32 %v5104_v34, 0.0 }
 0x341   : > { %v5106_v46 = vpop.f32.mrf.mxu0  ;;  %8345 = vmatmul.mubr.bf16.gmra.mxu1 %v5559_v11 }
 0x342   : > { %v5107_v50 = vadd.f32 %v12096_v39, %v5106_v46  ;;  %v5461_v41 = vmax.f32 %v5115_v26, 0.0 }
 0x343   : > { %v8210_v56 = vpop.f32.mrf.mxu0 }
 0x344   : > { %v5459_v19 = vmax.f32 %v5107_v50, 0.0  ;;  %v5561_v62 = vpack.c.bf16 %v5461_v41, %v5460_v37  ;;  %v5128_v48 = vadd.f32 %v8210_v56, %v12096_v39 }
 0x345   : > { %v5119_v20 = vpop.f32.mrf.mxu0 }
 0x346   : > { %v5560_v13 = vpack.c.bf16 %v5459_v19, %v5458_v1  ;;  %v5120_v22 = vadd.f32 %v12096_v39, %v5119_v20  ;;  %v5464_v40 = vmax.f32 %v5128_v48, 0.0 }
 0x347   : > { %v8211_v59 = vpop.f32.mrf.mxu0 }
 0x348   : > { %v5131_v28 = vadd.f32 %v8211_v59, %v12096_v39  ;;  %8348 = vmatprep.mubr.bf16.mxu1 %v5560_v13  ;;  %v5462_v30 = vmax.f32 %v5120_v22, 0.0 }
 0x349   : > { %v5122_v33 = vpop.f32.mrf.mxu0  ;;  %8349 = vmatmul.mubr.bf16.gmra.mxu1 %v5561_v62 }
 0x34a   : > { %v5123_v47 = vadd.f32 %v12096_v39, %v5122_v33  ;;  %v5465_v51 = vmax.f32 %v5131_v28, 0.0 }
 0x34b   : > { %v8214_v53 = vpop.f32.mrf.mxu0 }
 0x34c   : > { %v5463_v14 = vmax.f32 %v5123_v47, 0.0  ;;  %v5563_v42 = vpack.c.bf16 %v5465_v51, %v5464_v40  ;;  %v5144_v5 = vadd.f32 %v8214_v53, %v12096_v39 }
 0x34d   : > { %v5135_v60 = vpop.f32.mrf.mxu0 }
 0x34e   : > { %v5562_v17 = vpack.c.bf16 %v5463_v14, %v5462_v30  ;;  %v5136_v8 = vadd.f32 %v12096_v39, %v5135_v60  ;;  %v5468_v52 = vmax.f32 %v5144_v5, 0.0 }
 0x34f   : > { %v8215_v38 = vpop.f32.mrf.mxu0 }
 0x350   : > { %v5147_v16 = vadd.f32 %v8215_v38, %v12096_v39  ;;  %8352 = vmatprep.mubr.bf16.mxu1 %v5562_v17  ;;  %v5466_v18 = vmax.f32 %v5136_v8, 0.0 }
 0x351   : > { %v5138_v2 = vpop.f32.mrf.mxu0  ;;  %8353 = vmatmul.mubr.bf16.gmra.mxu1 %v5563_v42 }
 0x352   : > { %v5139_v10 = vadd.f32 %v12096_v39, %v5138_v2  ;;  %v5469_v45 = vmax.f32 %v5147_v16, 0.0 }
 0x353   : > { %v8218_v12 = vpop.f32.mrf.mxu0 }
 0x354   : > { %v5467_v24 = vmax.f32 %v5139_v10, 0.0  ;;  %v5565_v44 = vpack.c.bf16 %v5469_v45, %v5468_v52  ;;  %v5160_v15 = vadd.f32 %v8218_v12, %v12096_v39 }
 0x355   : > { %v5151_v0 = vpop.f32.mrf.mxu0 }
 0x356   : > { %v5564_v36 = vpack.c.bf16 %v5467_v24, %v5466_v18  ;;  %v5152_v63 = vadd.f32 %v12096_v39, %v5151_v0  ;;  %v5472_v58 = vmax.f32 %v5160_v15, 0.0 }
 0x357   : > { %v8219_v3 = vpop.f32.mrf.mxu0 }
 0x358   : > { %v5163_v61 = vadd.f32 %v8219_v3, %v12096_v39  ;;  %8356 = vmatprep.mubr.bf16.mxu1 %v5564_v36  ;;  %v5470_v55 = vmax.f32 %v5152_v63, 0.0 }
 0x359   : > { %v5154_v23 = vpop.f32.mrf.mxu0  ;;  %8357 = vmatmul.mubr.bf16.gmra.mxu1 %v5565_v44 }
 0x35a   : > { %v5155_v25 = vadd.f32 %v12096_v39, %v5154_v23  ;;  %v5473_v7 = vmax.f32 %v5163_v61, 0.0 }
 0x35b   : > { %v8222_v43 = vpop.f32.mrf.mxu0 }
 0x35c   : > { %v5471_v32 = vmax.f32 %v5155_v25, 0.0  ;;  %v5567_v21 = vpack.c.bf16 %v5473_v7, %v5472_v58  ;;  %v5176_v54 = vadd.f32 %v8222_v43, %v12096_v39 }
 0x35d   : > { %v5167_v57 = vpop.f32.mrf.mxu0 }
 0x35e   : > { %v5566_v4 = vpack.c.bf16 %v5471_v32, %v5470_v55  ;;  %v5168_v29 = vadd.f32 %v12096_v39, %v5167_v57  ;;  %v5476_v27 = vmax.f32 %v5176_v54, 0.0 }
 0x35f   : > { %v8223_v49 = vpop.f32.mrf.mxu0 }
 0x360   : > { %v5179_v9 = vadd.f32 %v8223_v49, %v12096_v39  ;;  %8360 = vmatprep.mubr.bf16.mxu1 %v5566_v4  ;;  %v5474_v34 = vmax.f32 %v5168_v29, 0.0 }
 0x361   : > { %v5170_v31 = vpop.f32.mrf.mxu0  ;;  %8361 = vmatmul.mubr.bf16.gmra.mxu1 %v5567_v21 }
 0x362   : > { %v5171_v35 = vadd.f32 %v12096_v39, %v5170_v31  ;;  %v5477_v11 = vmax.f32 %v5179_v9, 0.0 }
 0x363   : > { %v8226_v6 = vpop.f32.mrf.mxu0 }
 0x364   : > { %v5475_v26 = vmax.f32 %v5171_v35, 0.0  ;;  %v5569_v41 = vpack.c.bf16 %v5477_v11, %v5476_v27  ;;  %v5192_v37 = vadd.f32 %v8226_v6, %v12096_v39 }
 0x365   : > { %v5183_v46 = vpop.f32.mrf.mxu0 }
 0x366   : > { %v5568_v50 = vpack.c.bf16 %v5475_v26, %v5474_v34  ;;  %v5184_v1 = vadd.f32 %v12096_v39, %v5183_v46  ;;  %v5480_v48 = vmax.f32 %v5192_v37, 0.0 }
 0x367   : > { %v8227_v56 = vpop.f32.mrf.mxu0 }
 0x368   : > { %v5195_v19 = vadd.f32 %v8227_v56, %v12096_v39  ;;  %8364 = vmatprep.mubr.bf16.mxu1 %v5568_v50  ;;  %v5478_v22 = vmax.f32 %v5184_v1, 0.0 }
 0x369   : > { %v5186_v20 = vpop.f32.mrf.mxu0  ;;  %8365 = vmatmul.mubr.bf16.gmra.mxu1 %v5569_v41 }
 0x36a   : > { %v5187_v13 = vadd.f32 %v12096_v39, %v5186_v20  ;;  %v5481_v62 = vmax.f32 %v5195_v19, 0.0 }
 0x36b   : > { %v8230_v59 = vpop.f32.mrf.mxu0 }
 0x36c   : > { %v5479_v28 = vmax.f32 %v5187_v13, 0.0  ;;  %v5571_v51 = vpack.c.bf16 %v5481_v62, %v5480_v48  ;;  %v5208_v40 = vadd.f32 %v8230_v59, %v12096_v39 }
 0x36d   : > { %v5199_v33 = vpop.f32.mrf.mxu0 }
 0x36e   : > { %v5570_v47 = vpack.c.bf16 %v5479_v28, %v5478_v22  ;;  %v5200_v30 = vadd.f32 %v12096_v39, %v5199_v33  ;;  %v5484_v5 = vmax.f32 %v5208_v40, 0.0 }
 0x36f   : > { %v8231_v53 = vpop.f32.mrf.mxu0 }
 0x370   : > { %v5211_v14 = vadd.f32 %v8231_v53, %v12096_v39  ;;  %8368 = vmatprep.mubr.bf16.mxu1 %v5570_v47  ;;  %v5482_v8 = vmax.f32 %v5200_v30, 0.0 }
 0x371   : > { %v5202_v60 = vpop.f32.mrf.mxu0  ;;  %8369 = vmatmul.mubr.bf16.gmra.mxu1 %v5571_v51 }
 0x372   : > { %v5203_v17 = vadd.f32 %v12096_v39, %v5202_v60  ;;  %v5485_v42 = vmax.f32 %v5211_v14, 0.0 }
 0x373   : > { %v8234_v38 = vpop.f32.mrf.mxu0 }
 0x374   : > { %v5483_v16 = vmax.f32 %v5203_v17, 0.0  ;;  %v5573_v45 = vpack.c.bf16 %v5485_v42, %v5484_v5  ;;  %v5224_v52 = vadd.f32 %v8234_v38, %v12096_v39 }
 0x375   : > { %v5215_v2 = vpop.f32.mrf.mxu0 }
 0x376   : > { %v5572_v10 = vpack.c.bf16 %v5483_v16, %v5482_v8  ;;  %v5216_v18 = vadd.f32 %v12096_v39, %v5215_v2  ;;  %v5488_v15 = vmax.f32 %v5224_v52, 0.0 }
 0x377   : > { %v8235_v12 = vpop.f32.mrf.mxu0 }
 0x378   : > { %v5227_v24 = vadd.f32 %v8235_v12, %v12096_v39  ;;  %8372 = vmatprep.mubr.bf16.mxu1 %v5572_v10  ;;  %v5486_v63 = vmax.f32 %v5216_v18, 0.0 }
 0x379   : > { %v5218_v0 = vpop.f32.mrf.mxu0  ;;  %8373 = vmatmul.mubr.bf16.gmra.mxu1 %v5573_v45 }
 0x37a   : > { %v5219_v36 = vadd.f32 %v12096_v39, %v5218_v0  ;;  %v5489_v44 = vmax.f32 %v5227_v24, 0.0 }
 0x37b   : > { %v8238_v3 = vpop.f32.mrf.mxu0 }
 0x37c   : > { %v5487_v61 = vmax.f32 %v5219_v36, 0.0  ;;  %v5575_v7 = vpack.c.bf16 %v5489_v44, %v5488_v15  ;;  %v5240_v58 = vadd.f32 %v8238_v3, %v12096_v39 }
 0x37d   : > { %v5231_v23 = vpop.f32.mrf.mxu0 }
 0x37e   : > { %v5574_v25 = vpack.c.bf16 %v5487_v61, %v5486_v63  ;;  %v5232_v55 = vadd.f32 %v12096_v39, %v5231_v23  ;;  %v5492_v54 = vmax.f32 %v5240_v58, 0.0 }
 0x37f   : > { %v8239_v43 = vpop.f32.mrf.mxu0 }
 0x380   : > { %v5243_v32 = vadd.f32 %v8239_v43, %v12096_v39  ;;  %8376 = vmatprep.mubr.bf16.mxu1 %v5574_v25  ;;  %v5490_v29 = vmax.f32 %v5232_v55, 0.0 }
 0x381   : > { %v5234_v57 = vpop.f32.mrf.mxu0  ;;  %8377 = vmatmul.mubr.bf16.gmra.mxu1 %v5575_v7 }
 0x382   : > { %v5235_v4 = vadd.f32 %v12096_v39, %v5234_v57  ;;  %v5493_v21 = vmax.f32 %v5243_v32, 0.0 }
 0x383   : > { %v8242_v49 = vpop.f32.mrf.mxu0 }
 0x384   : > { %v5491_v9 = vmax.f32 %v5235_v4, 0.0  ;;  %v5577_v11 = vpack.c.bf16 %v5493_v21, %v5492_v54  ;;  %v5256_v27 = vadd.f32 %v8242_v49, %v12096_v39 }
 0x385   : > { %v5247_v31 = vpop.f32.mrf.mxu0 }
 0x386   : > { %v5576_v35 = vpack.c.bf16 %v5491_v9, %v5490_v29  ;;  %v5248_v34 = vadd.f32 %v12096_v39, %v5247_v31  ;;  %v5496_v37 = vmax.f32 %v5256_v27, 0.0 }
 0x387   : > { %v8243_v6 = vpop.f32.mrf.mxu0 }
 0x388   : > { %v5259_v26 = vadd.f32 %v8243_v6, %v12096_v39  ;;  %8380 = vmatprep.mubr.bf16.mxu1 %v5576_v35  ;;  %v5494_v1 = vmax.f32 %v5248_v34, 0.0  ;;  %v12271_v35 = vld [vmem:[%s12571_s8] ss:$0 sm:$0xff] }
 0x389   : > { %v5250_v46 = vpop.f32.mrf.mxu0  ;;  %8381 = vmatmul.mubr.bf16.gmra.mxu1 %v5577_v11 }
 0x38a   : > { %v5251_v50 = vadd.f32 %v12096_v39, %v5250_v46  ;;  %v5497_v41 = vmax.f32 %v5259_v26, 0.0 }
 0x38b   : > { %v8246_v56 = vpop.f32.mrf.mxu0 }
 0x38c   : > { %v5495_v19 = vmax.f32 %v5251_v50, 0.0  ;;  %v5579_v62 = vpack.c.bf16 %v5497_v41, %v5496_v37  ;;  %v5272_v48 = vadd.f32 %v8246_v56, %v12096_v39 }
 0x38d   : > { %v5263_v20 = vpop.f32.mrf.mxu0 }
 0x38e   : > { %v5578_v13 = vpack.c.bf16 %v5495_v19, %v5494_v1  ;;  %v5264_v22 = vadd.f32 %v12096_v39, %v5263_v20  ;;  %v5500_v40 = vmax.f32 %v5272_v48, 0.0 }
 0x38f   : > { %v8247_v59 = vpop.f32.mrf.mxu0 }
 0x390   : > { %v5275_v28 = vadd.f32 %v8247_v59, %v12096_v39  ;;  %8384 = vmatprep.mubr.bf16.mxu1 %v5578_v13  ;;  %v5498_v30 = vmax.f32 %v5264_v22, 0.0 }
 0x391   : > { %v5266_v33 = vpop.f32.mrf.mxu0  ;;  %8385 = vmatmul.mubr.bf16.gmra.mxu1 %v5579_v62 }
 0x392   : > { %v5267_v47 = vadd.f32 %v12096_v39, %v5266_v33  ;;  %v5501_v51 = vmax.f32 %v5275_v28, 0.0 }
 0x393   : > { %v8250_v53 = vpop.f32.mrf.mxu0 }
 0x394   : > { %v5499_v14 = vmax.f32 %v5267_v47, 0.0  ;;  %v5581_v42 = vpack.c.bf16 %v5501_v51, %v5500_v40  ;;  %v5288_v5 = vadd.f32 %v8250_v53, %v12096_v39 }
 0x395   : > { %v5279_v60 = vpop.f32.mrf.mxu0 }
 0x396   : > { %v5580_v17 = vpack.c.bf16 %v5499_v14, %v5498_v30  ;;  %v5280_v8 = vadd.f32 %v12096_v39, %v5279_v60  ;;  %v5504_v52 = vmax.f32 %v5288_v5, 0.0 }
 0x397   : > { %v8251_v38 = vpop.f32.mrf.mxu0 }
 0x398   : > { %v5291_v16 = vadd.f32 %v8251_v38, %v12096_v39  ;;  %8388 = vmatprep.mubr.bf16.mxu1 %v5580_v17  ;;  %v5502_v18 = vmax.f32 %v5280_v8, 0.0 }
 0x399   : > { %v5282_v2 = vpop.f32.mrf.mxu0  ;;  %8389 = vmatmul.mubr.bf16.gmra.mxu1 %v5581_v42 }
 0x39a   : > { %v5283_v10 = vadd.f32 %v12096_v39, %v5282_v2  ;;  %v5505_v45 = vmax.f32 %v5291_v16, 0.0 }
 0x39b   : > { %v8254_v12 = vpop.f32.mrf.mxu0 }
 0x39c   : > { %v5503_v24 = vmax.f32 %v5283_v10, 0.0  ;;  %v5583_v44 = vpack.c.bf16 %v5505_v45, %v5504_v52  ;;  %v5304_v15 = vadd.f32 %v8254_v12, %v12096_v39 }
 0x39d   : > { %v5295_v0 = vpop.f32.mrf.mxu0 }
 0x39e   : > { %v5582_v36 = vpack.c.bf16 %v5503_v24, %v5502_v18  ;;  %v5296_v63 = vadd.f32 %v12096_v39, %v5295_v0  ;;  %v5508_v4 = vmax.f32 %v5304_v15, 0.0 }
 0x39f   : > { %v8255_v3 = vpop.f32.mrf.mxu0 }
 0x3a0   : > { %v5307_v61 = vadd.f32 %v8255_v3, %v12096_v39  ;;  %8392 = vmatprep.mubr.bf16.mxu1 %v5582_v36  ;;  %v5506_v58 = vmax.f32 %v5296_v63, 0.0 }
 0x3a1   : > { %v5298_v23 = vpop.f32.mrf.mxu0  ;;  %v8298_v25 = vpop.f32.mrf.mxu1  ;;  %8393 = vmatmul.mubr.bf16.gmra.mxu1 %v5583_v44 }
 0x3a2   : > { %v5299_v7 = vadd.f32 %v12096_v39, %v5298_v23  ;;  %8967 = vtanh.f32 %v8298_v25  ;;  %v5509_v43 = vmax.f32 %v5307_v61, 0.0 }
 0x3a3   : > { %v8258_v55 = vpop.f32.mrf.mxu0  ;;  %v5696_v32 = vpop.f32.mrf.mxu1 }
 0x3a4   : > { %v5507_v57 = vmax.f32 %v5299_v7, 0.0  ;;  %8969 = vtanh.f32 %v5696_v32  ;;  %v5585_v9 = vpack.c.bf16 %v5509_v43, %v5508_v4  ;;  %v5320_v6 = vadd.f32 %v12271_v35, %v8258_v55 }
 0x3a5   : > { %v5311_v21 = vpop.f32.mrf.mxu0  ;;  %v8299_v49 = vpop.f32.mrf.mxu1 }
 0x3a6   : > { %v5584_v29 = vpack.c.bf16 %v5507_v57, %v5506_v58  ;;  %8971 = vtanh.f32 %v8299_v49  ;;  %v5312_v39 = vadd.f32 %v12271_v35, %v5311_v21  ;;  %v5512_v19 = vmax.f32 %v5320_v6, 0.0 }
 0x3a7   : > { %v8259_v54 = vpop.f32.mrf.mxu0  ;;  %v5699_v31 = vpop.f32.mrf.mxu1 }
 0x3a8   : > { %v5323_v11 = vadd.f32 %v12271_v35, %v8259_v54  ;;  %8973 = vtanh.f32 %v5699_v31  ;;  %8396 = vmatprep.mubr.bf16.mxu1 %v5584_v29  ;;  %v5510_v56 = vmax.f32 %v5312_v39, 0.0 }
 0x3a9   : > { %v5314_v34 = vpop.f32.mrf.mxu0  ;;  %v8302_v26 = vpop.f32.mrf.mxu1  ;;  %8397 = vmatmul.mubr.bf16.gmra.mxu1 %v5585_v9 }
 0x3aa   : > { %v5315_v27 = vadd.f32 %v12271_v35, %v5314_v34  ;;  %8975 = vtanh.f32 %v8302_v26  ;;  %v5513_v46 = vmax.f32 %v5323_v11, 0.0 }
 0x3ab   : > { %v8262_v50 = vpop.f32.mrf.mxu0  ;;  %v5712_v41 = vpop.f32.mrf.mxu1 }
 0x3ac   : > { %v5511_v1 = vmax.f32 %v5315_v27, 0.0  ;;  %8977 = vtanh.f32 %v5712_v41  ;;  %v5587_v59 = vpack.c.bf16 %v5513_v46, %v5512_v19  ;;  %v5336_v51 = vadd.f32 %v12271_v35, %v8262_v50 }
 0x3ad   : > { %v5327_v37 = vpop.f32.mrf.mxu0  ;;  %v8303_v20 = vpop.f32.mrf.mxu1 }
 0x3ae   : > { %v5586_v13 = vpack.c.bf16 %v5511_v1, %v5510_v56  ;;  %8979 = vtanh.f32 %v8303_v20  ;;  %v5328_v48 = vadd.f32 %v12271_v35, %v5327_v37  ;;  %v5516_v5 = vmax.f32 %v5336_v51, 0.0 }
 0x3af   : > { %v8968_v62 = vpop.eup %8967  ;;  %v8263_v22 = vpop.f32.mrf.mxu0 }
 0x3b0   : > { %v5715_v28 = vpop.f32.mrf.mxu1  ;;  %6338 = vst.msk [vmem:[%s12282_s18 + $0x10] sm:$0xff] %vm6335_vm5, %v8968_v62  ;;  %v5339_v33 = vadd.f32 %v12271_v35, %v8263_v22  ;;  %8400 = vmatprep.mubr.bf16.mxu1 %v5586_v13  ;;  %v5514_v38 = vmax.f32 %v5328_v48, 0.0 }
 0x3b1   : > { %8981 = vtanh.f32 %v5715_v28  ;;  %v8970_v47 = vpop.eup %8969  ;;  %v5330_v53 = vpop.f32.mrf.mxu0  ;;  %8401 = vmatmul.mubr.bf16.gmra.mxu1 %v5587_v59 }
 0x3b2   : > { %v8306_v30 = vpop.f32.mrf.mxu1  ;;  %6336 = vst.msk [vmem:[%s12282_s18] sm:$0xff] %vm6335_vm5, %v8970_v47  ;;  %v5331_v14 = vadd.f32 %v12271_v35, %v5330_v53  ;;  %v5517_v60 = vmax.f32 %v5339_v33, 0.0 }
 0x3b3   : > { %8983 = vtanh.f32 %v8306_v30  ;;  %v8972_v40 = vpop.eup %8971  ;;  %v8266_v17 = vpop.f32.mrf.mxu0 }
 0x3b4   : > { %v5728_v42 = vpop.f32.mrf.mxu1  ;;  %6339 = vst.msk [vmem:[%s12282_s18 + $0x18] sm:$0xff] %vm6335_vm5, %v8972_v40  ;;  %v5515_v8 = vmax.f32 %v5331_v14, 0.0  ;;  %v5589_v18 = vpack.c.bf16 %v5517_v60, %v5516_v5  ;;  %v5352_v3 = vadd.f32 %v12271_v35, %v8266_v17 }
 0x3b5   : > { %8985 = vtanh.f32 %v5728_v42  ;;  %v8974_v16 = vpop.eup %8973  ;;  %v5343_v2 = vpop.f32.mrf.mxu0 }
 0x3b6   : > { %v8307_v10 = vpop.f32.mrf.mxu1  ;;  %6337 = vst.msk [vmem:[%s12282_s18 + $0x8] sm:$0xff] %vm6335_vm5, %v8974_v16  ;;  %v5588_v45 = vpack.c.bf16 %v5515_v8, %v5514_v38  ;;  %v5344_v0 = vadd.f32 %v12271_v35, %v5343_v2  ;;  %v5520_v57 = vmax.f32 %v5352_v3, 0.0 }
 0x3b7   : > { %8987 = vtanh.f32 %v8307_v10  ;;  %v8976_v12 = vpop.eup %8975  ;;  %v8267_v24 = vpop.f32.mrf.mxu0 }
 0x3b8   : > { %v5731_v52 = vpop.f32.mrf.mxu1  ;;  %6342 = vst.msk [vmem:[%s12282_s18 + $0x30] sm:$0xff] %vm6335_vm5, %v8976_v12  ;;  %v5355_v36 = vadd.f32 %v12271_v35, %v8267_v24  ;;  %8404 = vmatprep.mubr.bf16.mxu1 %v5588_v45  ;;  %v5518_v55 = vmax.f32 %v5344_v0, 0.0 }
 0x3b9   : > { %8989 = vtanh.f32 %v5731_v52  ;;  %v8978_v44 = vpop.eup %8977  ;;  %v5346_v63 = vpop.f32.mrf.mxu0  ;;  %8405 = vmatmul.mubr.bf16.gmra.mxu1 %v5589_v18 }
 0x3ba   : > { %v8310_v61 = vpop.f32.mrf.mxu1  ;;  %6340 = vst.msk [vmem:[%s12282_s18 + $0x20] sm:$0xff] %vm6335_vm5, %v8978_v44  ;;  %v5347_v15 = vadd.f32 %v12271_v35, %v5346_v63  ;;  %v5521_v25 = vmax.f32 %v5355_v36, 0.0 }
 0x3bb   : > { %8991 = vtanh.f32 %v8310_v61  ;;  %v8980_v23 = vpop.eup %8979  ;;  %v8270_v7 = vpop.f32.mrf.mxu0 }
 0x3bc   : > { %v5744_v43 = vpop.f32.mrf.mxu1  ;;  %6343 = vst.msk [vmem:[%s12282_s18 + $0x38] sm:$0xff] %vm6335_vm5, %v8980_v23  ;;  %v5519_v32 = vmax.f32 %v5347_v15, 0.0  ;;  %v5591_v9 = vpack.c.bf16 %v5521_v25, %v5520_v57  ;;  %v5368_v34 = vadd.f32 %v12271_v35, %v8270_v7 }
 0x3bd   : > { %8993 = vtanh.f32 %v5744_v43  ;;  %v5359_v4 = vpop.f32.mrf.mxu0 }
 0x3be   : > { %v8982_v58 = vpop.eup %8981  ;;  %v8311_v21 = vpop.f32.mrf.mxu1  ;;  %v5590_v49 = vpack.c.bf16 %v5519_v32, %v5518_v55  ;;  %v5360_v39 = vadd.f32 %v12271_v35, %v5359_v4  ;;  %v5524_v13 = vmax.f32 %v5368_v34, 0.0 }
 0x3bf   : > { %6341 = vst.msk [vmem:[%s12282_s18 + $0x28] sm:$0xff] %vm6335_vm5, %v8982_v58  ;;  %8995 = vtanh.f32 %v8311_v21  ;;  %v8271_v54 = vpop.f32.mrf.mxu0 }
 0x3c0   : > { %v8984_v29 = vpop.eup %8983  ;;  %v5747_v31 = vpop.f32.mrf.mxu1  ;;  %v5371_v11 = vadd.f32 %v12271_v35, %v8271_v54  ;;  %8408 = vmatprep.mubr.bf16.mxu1 %v5590_v49  ;;  %v5522_v19 = vmax.f32 %v5360_v39, 0.0 }
 0x3c1   : > { %6346 = vst.msk [vmem:[%s12282_s18 + $0x50] sm:$0xff] %vm6335_vm5, %v8984_v29  ;;  %8997 = vtanh.f32 %v5747_v31  ;;  %v5362_v26 = vpop.f32.mrf.mxu0  ;;  %8409 = vmatmul.mubr.bf16.gmra.mxu1 %v5591_v9 }
 0x3c2   : > { %v8986_v6 = vpop.eup %8985  ;;  %v8314_v27 = vpop.f32.mrf.mxu1  ;;  %v5363_v46 = vadd.f32 %v12271_v35, %v5362_v26  ;;  %v5525_v41 = vmax.f32 %v5371_v11, 0.0 }
 0x3c3   : > { %6344 = vst.msk [vmem:[%s12282_s18 + $0x40] sm:$0xff] %vm6335_vm5, %v8986_v6  ;;  %8999 = vtanh.f32 %v8314_v27  ;;  %v8274_v56 = vpop.f32.mrf.mxu0 }
 0x3c4   : > { %v8988_v50 = vpop.eup %8987  ;;  %v5760_v1 = vpop.f32.mrf.mxu1  ;;  %v5523_v37 = vmax.f32 %v5363_v46, 0.0  ;;  %v5593_v48 = vpack.c.bf16 %v5525_v41, %v5524_v13  ;;  %v5384_v14 = vadd.f32 %v12271_v35, %v8274_v56 }
 0x3c5   : > { %6347 = vst.msk [vmem:[%s12282_s18 + $0x58] sm:$0xff] %vm6335_vm5, %v8988_v50  ;;  %9001 = vtanh.f32 %v5760_v1  ;;  %v5375_v62 = vpop.f32.mrf.mxu0 }
 0x3c6   : > { %v8990_v20 = vpop.eup %8989  ;;  %v8315_v59 = vpop.f32.mrf.mxu1  ;;  %v5592_v22 = vpack.c.bf16 %v5523_v37, %v5522_v19  ;;  %v5376_v51 = vadd.f32 %v12271_v35, %v5375_v62  ;;  %v5528_v45 = vmax.f32 %v5384_v14, 0.0 }
 0x3c7   : > { %6345 = vst.msk [vmem:[%s12282_s18 + $0x48] sm:$0xff] %vm6335_vm5, %v8990_v20  ;;  %9003 = vtanh.f32 %v8315_v59  ;;  %v8275_v33 = vpop.f32.mrf.mxu0 }
 0x3c8   : > { %v8992_v28 = vpop.eup %8991  ;;  %v5763_v47 = vpop.f32.mrf.mxu1  ;;  %v5387_v53 = vadd.f32 %v12271_v35, %v8275_v33  ;;  %8412 = vmatprep.mubr.bf16.mxu1 %v5592_v22  ;;  %v5526_v5 = vmax.f32 %v5376_v51, 0.0 }
 0x3c9   : > { %6350 = vst.msk [vmem:[%s12282_s18 + $0x70] sm:$0xff] %vm6335_vm5, %v8992_v28  ;;  %9005 = vtanh.f32 %v5763_v47  ;;  %v5378_v40 = vpop.f32.mrf.mxu0  ;;  %8413 = vmatmul.mubr.bf16.gmra.mxu1 %v5593_v48 }
 0x3ca   : > { %v8994_v30 = vpop.eup %8993  ;;  %v8318_v60 = vpop.f32.mrf.mxu1  ;;  %v5379_v17 = vadd.f32 %v12271_v35, %v5378_v40  ;;  %v5529_v38 = vmax.f32 %v5387_v53, 0.0 }
 0x3cb   : > { %6348 = vst.msk [vmem:[%s12282_s18 + $0x60] sm:$0xff] %vm6335_vm5, %v8994_v30  ;;  %9007 = vtanh.f32 %v8318_v60  ;;  %v8278_v8 = vpop.f32.mrf.mxu0 }
 0x3cc   : > { %v8996_v42 = vpop.eup %8995  ;;  %v5776_v16 = vpop.f32.mrf.mxu1  ;;  %v5527_v2 = vmax.f32 %v5379_v17, 0.0  ;;  %v5595_v0 = vpack.c.bf16 %v5529_v38, %v5528_v45  ;;  %v5400_v15 = vadd.f32 %v12271_v35, %v8278_v8 }
 0x3cd   : > { %6351 = vst.msk [vmem:[%s12282_s18 + $0x78] sm:$0xff] %vm6335_vm5, %v8996_v42  ;;  %9009 = vtanh.f32 %v5776_v16  ;;  %v5391_v12 = vpop.f32.mrf.mxu0 }
 0x3ce   : > { %v8998_v10 = vpop.eup %8997  ;;  %v8319_v18 = vpop.f32.mrf.mxu1  ;;  %v5594_v24 = vpack.c.bf16 %v5527_v2, %v5526_v5  ;;  %v5392_v3 = vadd.f32 %v12271_v35, %v5391_v12  ;;  %v5532_v21 = vmax.f32 %v5400_v15, 0.0 }
 0x3cf   : > { %6349 = vst.msk [vmem:[%s12282_s18 + $0x68] sm:$0xff] %vm6335_vm5, %v8998_v10  ;;  %9011 = vtanh.f32 %v8319_v18  ;;  %v8279_v36 = vpop.f32.mrf.mxu0 }
 0x3d0   : > { %v9000_v52 = vpop.eup %8999  ;;  %v5779_v44 = vpop.f32.mrf.mxu1  ;;  %v5403_v63 = vadd.f32 %v12271_v35, %v8279_v36  ;;  %8416 = vmatprep.mubr.bf16.mxu1 %v5594_v24  ;;  %v5530_v58 = vmax.f32 %v5392_v3, 0.0 }
 0x3d1   : > { %6354 = vst.msk [vmem:[%s12282_s18 + $0x90] sm:$0xff] %vm6335_vm5, %v9000_v52  ;;  %9013 = vtanh.f32 %v5779_v44  ;;  %v5394_v23 = vpop.f32.mrf.mxu0  ;;  %8417 = vmatmul.mubr.bf16.gmra.mxu1 %v5595_v0 }
 0x3d2   : > { %v9002_v61 = vpop.eup %9001  ;;  %v8322_v25 = vpop.f32.mrf.mxu1  ;;  %v5395_v7 = vadd.f32 %v12271_v35, %v5394_v23  ;;  %v5533_v55 = vmax.f32 %v5403_v63, 0.0 }
 0x3d3   : > { %6352 = vst.msk [vmem:[%s12282_s18 + $0x80] sm:$0xff] %vm6335_vm5, %v9002_v61  ;;  %9015 = vtanh.f32 %v8322_v25 }
 0x3d4   : > { %v9004_v43 = vpop.eup %9003  ;;  %v5792_v32 = vpop.f32.mrf.mxu1  ;;  %v5531_v57 = vmax.f32 %v5395_v7, 0.0  ;;  %v5597_v9 = vpack.c.bf16 %v5533_v55, %v5532_v21 }
 0x3d5   : > { %6355 = vst.msk [vmem:[%s12282_s18 + $0x98] sm:$0xff] %vm6335_vm5, %v9004_v43  ;;  %9017 = vtanh.f32 %v5792_v32 }
 0x3d6   : > { %v9006_v4 = vpop.eup %9005  ;;  %v8323_v49 = vpop.f32.mrf.mxu1  ;;  %v5596_v29 = vpack.c.bf16 %v5531_v57, %v5530_v58 }
 0x3d7   : > { %6353 = vst.msk [vmem:[%s12282_s18 + $0x88] sm:$0xff] %vm6335_vm5, %v9006_v4  ;;  %9019 = vtanh.f32 %v8323_v49 }
 0x3d8   : > { %v9008_v35 = vpop.eup %9007  ;;  %v5795_v54 = vpop.f32.mrf.mxu1  ;;  %8420 = vmatprep.mubr.bf16.mxu1 %v5596_v29 }
 0x3d9   : > { %6358 = vst.msk [vmem:[%s12282_s18 + $0xb0] sm:$0xff] %vm6335_vm5, %v9008_v35  ;;  %9021 = vtanh.f32 %v5795_v54  ;;  %8421 = vmatmul.mubr.bf16.gmra.mxu1 %v5597_v9 }
 0x3da   : > { %v9010_v31 = vpop.eup %9009  ;;  %v8326_v39 = vpop.f32.mrf.mxu1 }
 0x3db   : > { %6356 = vst.msk [vmem:[%s12282_s18 + $0xa0] sm:$0xff] %vm6335_vm5, %v9010_v31  ;;  %9023 = vtanh.f32 %v8326_v39 }
 0x3dc   : > { %v9012_v11 = vpop.eup %9011  ;;  %v5808_v6 = vpop.f32.mrf.mxu1 }
 0x3dd   : > { %6359 = vst.msk [vmem:[%s12282_s18 + $0xb8] sm:$0xff] %vm6335_vm5, %v9012_v11  ;;  %9025 = vtanh.f32 %v5808_v6 }
 0x3de   : > { %v9014_v34 = vpop.eup %9013  ;;  %v8327_v26 = vpop.f32.mrf.mxu1 }
 0x3df   : > { %6357 = vst.msk [vmem:[%s12282_s18 + $0xa8] sm:$0xff] %vm6335_vm5, %v9014_v34  ;;  %9027 = vtanh.f32 %v8327_v26 }
 0x3e0   : > { %v9016_v27 = vpop.eup %9015  ;;  %v5811_v46 = vpop.f32.mrf.mxu1 }
 0x3e1   : > { %6362 = vst.msk [vmem:[%s12282_s18 + $0xd0] sm:$0xff] %vm6335_vm5, %v9016_v27  ;;  %9029 = vtanh.f32 %v5811_v46 }
 0x3e2   : > { %v9018_v50 = vpop.eup %9017  ;;  %v8330_v41 = vpop.f32.mrf.mxu1 }
 0x3e3   : > { %6360 = vst.msk [vmem:[%s12282_s18 + $0xc0] sm:$0xff] %vm6335_vm5, %v9018_v50  ;;  %9031 = vtanh.f32 %v8330_v41 }
 0x3e4   : > { %v9020_v56 = vpop.eup %9019  ;;  %v5824_v1 = vpop.f32.mrf.mxu1 }
 0x3e5   : > { %6363 = vst.msk [vmem:[%s12282_s18 + $0xd8] sm:$0xff] %vm6335_vm5, %v9020_v56  ;;  %9033 = vtanh.f32 %v5824_v1 }
 0x3e6   : > { %v9022_v19 = vpop.eup %9021  ;;  %v8331_v37 = vpop.f32.mrf.mxu1 }
 0x3e7   : > { %6361 = vst.msk [vmem:[%s12282_s18 + $0xc8] sm:$0xff] %vm6335_vm5, %v9022_v19  ;;  %9035 = vtanh.f32 %v8331_v37 }
 0x3e8   : > { %v9024_v20 = vpop.eup %9023  ;;  %v5827_v13 = vpop.f32.mrf.mxu1 }
 0x3e9   : > { %6366 = vst.msk [vmem:[%s12282_s18 + $0xf0] sm:$0xff] %vm6335_vm5, %v9024_v20  ;;  %9037 = vtanh.f32 %v5827_v13 }
 0x3ea   : > { %v9026_v62 = vpop.eup %9025  ;;  %v8334_v59 = vpop.f32.mrf.mxu1 }
 0x3eb   : > { %6364 = vst.msk [vmem:[%s12282_s18 + $0xe0] sm:$0xff] %vm6335_vm5, %v9026_v62  ;;  %9039 = vtanh.f32 %v8334_v59 }
 0x3ec   : > { %v9028_v22 = vpop.eup %9027  ;;  %v5840_v28 = vpop.f32.mrf.mxu1 }
 0x3ed   : > { %6367 = vst.msk [vmem:[%s12282_s18 + $0xf8] sm:$0xff] %vm6335_vm5, %v9028_v22  ;;  %9041 = vtanh.f32 %v5840_v28 }
 0x3ee   : > { %v9030_v48 = vpop.eup %9029  ;;  %v8335_v33 = vpop.f32.mrf.mxu1 }
 0x3ef   : > { %6365 = vst.msk [vmem:[%s12282_s18 + $0xe8] sm:$0xff] %vm6335_vm5, %v9030_v48  ;;  %9043 = vtanh.f32 %v8335_v33 }
 0x3f0   : > { %v9032_v47 = vpop.eup %9031  ;;  %v5843_v51 = vpop.f32.mrf.mxu1 }
 0x3f1   : > { %6370 = vst.msk [vmem:[%s12282_s18 + $0x110] sm:$0xff] %vm6335_vm5, %v9032_v47  ;;  %9045 = vtanh.f32 %v5843_v51 }
 0x3f2   : > { %v9034_v53 = vpop.eup %9033  ;;  %v8338_v30 = vpop.f32.mrf.mxu1 }
 0x3f3   : > { %6368 = vst.msk [vmem:[%s12282_s18 + $0x100] sm:$0xff] %vm6335_vm5, %v9034_v53  ;;  %9047 = vtanh.f32 %v8338_v30 }
 0x3f4   : > { %v9036_v14 = vpop.eup %9035  ;;  %v5856_v40 = vpop.f32.mrf.mxu1 }
 0x3f5   : > { %6371 = vst.msk [vmem:[%s12282_s18 + $0x118] sm:$0xff] %vm6335_vm5, %v9036_v14  ;;  %9049 = vtanh.f32 %v5856_v40 }
 0x3f6   : > { %v9038_v60 = vpop.eup %9037  ;;  %v8339_v17 = vpop.f32.mrf.mxu1 }
 0x3f7   : > { %6369 = vst.msk [vmem:[%s12282_s18 + $0x108] sm:$0xff] %vm6335_vm5, %v9038_v60  ;;  %9051 = vtanh.f32 %v8339_v17 }
 0x3f8   : > { %v9040_v42 = vpop.eup %9039  ;;  %v5859_v38 = vpop.f32.mrf.mxu1 }
 0x3f9   : > { %6374 = vst.msk [vmem:[%s12282_s18 + $0x130] sm:$0xff] %vm6335_vm5, %v9040_v42  ;;  %9053 = vtanh.f32 %v5859_v38 }
 0x3fa   : > { %v9042_v8 = vpop.eup %9041  ;;  %v8342_v16 = vpop.f32.mrf.mxu1 }
 0x3fb   : > { %6372 = vst.msk [vmem:[%s12282_s18 + $0x120] sm:$0xff] %vm6335_vm5, %v9042_v8  ;;  %9055 = vtanh.f32 %v8342_v16 }
 0x3fc   : > { %v9044_v5 = vpop.eup %9043  ;;  %v5872_v2 = vpop.f32.mrf.mxu1 }
 0x3fd   : > { %6375 = vst.msk [vmem:[%s12282_s18 + $0x138] sm:$0xff] %vm6335_vm5, %v9044_v5  ;;  %9057 = vtanh.f32 %v5872_v2 }
 0x3fe   : > { %v9046_v10 = vpop.eup %9045  ;;  %v8343_v45 = vpop.f32.mrf.mxu1 }
 0x3ff   : > { %6373 = vst.msk [vmem:[%s12282_s18 + $0x128] sm:$0xff] %vm6335_vm5, %v9046_v10  ;;  %9059 = vtanh.f32 %v8343_v45 }
 0x400   : > { %v9048_v12 = vpop.eup %9047  ;;  %v5875_v18 = vpop.f32.mrf.mxu1 }
 0x401   : > { %6378 = vst.msk [vmem:[%s12282_s18 + $0x150] sm:$0xff] %vm6335_vm5, %v9048_v12  ;;  %9061 = vtanh.f32 %v5875_v18 }
 0x402   : > { %v9050_v24 = vpop.eup %9049  ;;  %v8346_v52 = vpop.f32.mrf.mxu1 }
 0x403   : > { %6376 = vst.msk [vmem:[%s12282_s18 + $0x140] sm:$0xff] %vm6335_vm5, %v9050_v24  ;;  %9063 = vtanh.f32 %v8346_v52 }
 0x404   : > { %v9052_v0 = vpop.eup %9051  ;;  %v5888_v36 = vpop.f32.mrf.mxu1 }
 0x405   : > { %6379 = vst.msk [vmem:[%s12282_s18 + $0x158] sm:$0xff] %vm6335_vm5, %v9052_v0  ;;  %9065 = vtanh.f32 %v5888_v36 }
 0x406   : > { %v9054_v44 = vpop.eup %9053  ;;  %v8347_v3 = vpop.f32.mrf.mxu1 }
 0x407   : > { %6377 = vst.msk [vmem:[%s12282_s18 + $0x148] sm:$0xff] %vm6335_vm5, %v9054_v44  ;;  %9067 = vtanh.f32 %v8347_v3 }
 0x408   : > { %v9056_v63 = vpop.eup %9055  ;;  %v5891_v61 = vpop.f32.mrf.mxu1 }
 0x409   : > { %6382 = vst.msk [vmem:[%s12282_s18 + $0x170] sm:$0xff] %vm6335_vm5, %v9056_v63  ;;  %9069 = vtanh.f32 %v5891_v61 }
 0x40a   : > { %v9058_v15 = vpop.eup %9057  ;;  %v8350_v23 = vpop.f32.mrf.mxu1 }
 0x40b   : > { %6380 = vst.msk [vmem:[%s12282_s18 + $0x160] sm:$0xff] %vm6335_vm5, %v9058_v15  ;;  %9071 = vtanh.f32 %v8350_v23 }
 0x40c   : > { %v9060_v25 = vpop.eup %9059  ;;  %v5904_v7 = vpop.f32.mrf.mxu1 }
 0x40d   : > { %6383 = vst.msk [vmem:[%s12282_s18 + $0x178] sm:$0xff] %vm6335_vm5, %v9060_v25  ;;  %9073 = vtanh.f32 %v5904_v7 }
 0x40e   : > { %v9062_v43 = vpop.eup %9061  ;;  %v8351_v55 = vpop.f32.mrf.mxu1 }
 0x40f   : > { %6381 = vst.msk [vmem:[%s12282_s18 + $0x168] sm:$0xff] %vm6335_vm5, %v9062_v43  ;;  %9075 = vtanh.f32 %v8351_v55 }
 0x410   : > { %v9064_v32 = vpop.eup %9063  ;;  %v5907_v58 = vpop.f32.mrf.mxu1 }
 0x411   : > { %6386 = vst.msk [vmem:[%s12282_s18 + $0x190] sm:$0xff] %vm6335_vm5, %v9064_v32  ;;  %9077 = vtanh.f32 %v5907_v58 }
 0x412   : > { %v9066_v57 = vpop.eup %9065  ;;  %v8354_v4 = vpop.f32.mrf.mxu1 }
 0x413   : > { %6384 = vst.msk [vmem:[%s12282_s18 + $0x180] sm:$0xff] %vm6335_vm5, %v9066_v57  ;;  %9079 = vtanh.f32 %v8354_v4 }
 0x414   : > { %v9068_v21 = vpop.eup %9067  ;;  %v5920_v49 = vpop.f32.mrf.mxu1 }
 0x415   : > { %6387 = vst.msk [vmem:[%s12282_s18 + $0x198] sm:$0xff] %vm6335_vm5, %v9068_v21  ;;  %9081 = vtanh.f32 %v5920_v49 }
 0x416   : > { %v9070_v29 = vpop.eup %9069  ;;  %v8355_v35 = vpop.f32.mrf.mxu1 }
 0x417   : > { %6385 = vst.msk [vmem:[%s12282_s18 + $0x188] sm:$0xff] %vm6335_vm5, %v9070_v29  ;;  %9083 = vtanh.f32 %v8355_v35 }
 0x418   : > { %v9072_v9 = vpop.eup %9071  ;;  %v5923_v54 = vpop.f32.mrf.mxu1 }
 0x419   : > { %6390 = vst.msk [vmem:[%s12282_s18 + $0x1b0] sm:$0xff] %vm6335_vm5, %v9072_v9  ;;  %9085 = vtanh.f32 %v5923_v54 }
 0x41a   : > { %v9074_v31 = vpop.eup %9073  ;;  %v8358_v39 = vpop.f32.mrf.mxu1 }
 0x41b   : > { %6388 = vst.msk [vmem:[%s12282_s18 + $0x1a0] sm:$0xff] %vm6335_vm5, %v9074_v31  ;;  %9087 = vtanh.f32 %v8358_v39 }
 0x41c   : > { %v9076_v11 = vpop.eup %9075  ;;  %v5936_v6 = vpop.f32.mrf.mxu1 }
 0x41d   : > { %6391 = vst.msk [vmem:[%s12282_s18 + $0x1b8] sm:$0xff] %vm6335_vm5, %v9076_v11  ;;  %9089 = vtanh.f32 %v5936_v6 }
 0x41e   : > { %v9078_v34 = vpop.eup %9077  ;;  %v8359_v26 = vpop.f32.mrf.mxu1 }
 0x41f   : > { %6389 = vst.msk [vmem:[%s12282_s18 + $0x1a8] sm:$0xff] %vm6335_vm5, %v9078_v34  ;;  %9091 = vtanh.f32 %v8359_v26 }
 0x420   : > { %v9080_v27 = vpop.eup %9079  ;;  %v5939_v46 = vpop.f32.mrf.mxu1 }
 0x421   : > { %6394 = vst.msk [vmem:[%s12282_s18 + $0x1d0] sm:$0xff] %vm6335_vm5, %v9080_v27  ;;  %9093 = vtanh.f32 %v5939_v46 }
 0x422   : > { %v9082_v50 = vpop.eup %9081  ;;  %v8362_v41 = vpop.f32.mrf.mxu1 }
 0x423   : > { %6392 = vst.msk [vmem:[%s12282_s18 + $0x1c0] sm:$0xff] %vm6335_vm5, %v9082_v50  ;;  %9095 = vtanh.f32 %v8362_v41 }
 0x424   : > { %v9084_v56 = vpop.eup %9083  ;;  %v5952_v1 = vpop.f32.mrf.mxu1 }
 0x425   : > { %6395 = vst.msk [vmem:[%s12282_s18 + $0x1d8] sm:$0xff] %vm6335_vm5, %v9084_v56  ;;  %9097 = vtanh.f32 %v5952_v1 }
 0x426   : > { %v9086_v19 = vpop.eup %9085  ;;  %v8363_v37 = vpop.f32.mrf.mxu1 }
 0x427   : > { %6393 = vst.msk [vmem:[%s12282_s18 + $0x1c8] sm:$0xff] %vm6335_vm5, %v9086_v19  ;;  %9099 = vtanh.f32 %v8363_v37 }
 0x428   : > { %v9088_v20 = vpop.eup %9087  ;;  %v5955_v13 = vpop.f32.mrf.mxu1 }
 0x429   : > { %6398 = vst.msk [vmem:[%s12282_s18 + $0x1f0] sm:$0xff] %vm6335_vm5, %v9088_v20  ;;  %9101 = vtanh.f32 %v5955_v13 }
 0x42a   : > { %v9090_v62 = vpop.eup %9089  ;;  %v8366_v59 = vpop.f32.mrf.mxu1 }
 0x42b   : > { %6396 = vst.msk [vmem:[%s12282_s18 + $0x1e0] sm:$0xff] %vm6335_vm5, %v9090_v62  ;;  %9103 = vtanh.f32 %v8366_v59 }
 0x42c   : > { %v9092_v22 = vpop.eup %9091  ;;  %v5968_v28 = vpop.f32.mrf.mxu1 }
 0x42d   : > { %6399 = vst.msk [vmem:[%s12282_s18 + $0x1f8] sm:$0xff] %vm6335_vm5, %v9092_v22  ;;  %9105 = vtanh.f32 %v5968_v28 }
 0x42e   : > { %v9094_v48 = vpop.eup %9093  ;;  %v8367_v33 = vpop.f32.mrf.mxu1 }
 0x42f   : > { %6397 = vst.msk [vmem:[%s12282_s18 + $0x1e8] sm:$0xff] %vm6335_vm5, %v9094_v48  ;;  %9107 = vtanh.f32 %v8367_v33 }
 0x430   : > { %v9096_v47 = vpop.eup %9095  ;;  %v5971_v51 = vpop.f32.mrf.mxu1 }
 0x431   : > { %6402 = vst.msk [vmem:[%s12282_s18 + $0x210] sm:$0xff] %vm6335_vm5, %v9096_v47  ;;  %9109 = vtanh.f32 %v5971_v51 }
 0x432   : > { %v9098_v53 = vpop.eup %9097  ;;  %v8370_v30 = vpop.f32.mrf.mxu1 }
 0x433   : > { %6400 = vst.msk [vmem:[%s12282_s18 + $0x200] sm:$0xff] %vm6335_vm5, %v9098_v53  ;;  %9111 = vtanh.f32 %v8370_v30 }
 0x434   : > { %v9100_v14 = vpop.eup %9099  ;;  %v5984_v40 = vpop.f32.mrf.mxu1 }
 0x435   : > { %6403 = vst.msk [vmem:[%s12282_s18 + $0x218] sm:$0xff] %vm6335_vm5, %v9100_v14  ;;  %9113 = vtanh.f32 %v5984_v40 }
 0x436   : > { %v9102_v60 = vpop.eup %9101  ;;  %v8371_v17 = vpop.f32.mrf.mxu1 }
 0x437   : > { %6401 = vst.msk [vmem:[%s12282_s18 + $0x208] sm:$0xff] %vm6335_vm5, %v9102_v60  ;;  %9115 = vtanh.f32 %v8371_v17 }
 0x438   : > { %v9104_v42 = vpop.eup %9103  ;;  %v5987_v38 = vpop.f32.mrf.mxu1 }
 0x439   : > { %6406 = vst.msk [vmem:[%s12282_s18 + $0x230] sm:$0xff] %vm6335_vm5, %v9104_v42  ;;  %9117 = vtanh.f32 %v5987_v38 }
 0x43a   : > { %v9106_v8 = vpop.eup %9105  ;;  %v8374_v16 = vpop.f32.mrf.mxu1 }
 0x43b   : > { %6404 = vst.msk [vmem:[%s12282_s18 + $0x220] sm:$0xff] %vm6335_vm5, %v9106_v8  ;;  %9119 = vtanh.f32 %v8374_v16 }
 0x43c   : > { %v9108_v5 = vpop.eup %9107  ;;  %v6000_v2 = vpop.f32.mrf.mxu1 }
 0x43d   : > { %6407 = vst.msk [vmem:[%s12282_s18 + $0x238] sm:$0xff] %vm6335_vm5, %v9108_v5  ;;  %9121 = vtanh.f32 %v6000_v2 }
 0x43e   : > { %v9110_v10 = vpop.eup %9109  ;;  %v8375_v45 = vpop.f32.mrf.mxu1 }
 0x43f   : > { %6405 = vst.msk [vmem:[%s12282_s18 + $0x228] sm:$0xff] %vm6335_vm5, %v9110_v10  ;;  %9123 = vtanh.f32 %v8375_v45 }
 0x440   : > { %v9112_v12 = vpop.eup %9111  ;;  %v6003_v18 = vpop.f32.mrf.mxu1 }
 0x441   : > { %6410 = vst.msk [vmem:[%s12282_s18 + $0x250] sm:$0xff] %vm6335_vm5, %v9112_v12  ;;  %9125 = vtanh.f32 %v6003_v18 }
 0x442   : > { %v9114_v24 = vpop.eup %9113  ;;  %v8378_v52 = vpop.f32.mrf.mxu1 }
 0x443   : > { %6408 = vst.msk [vmem:[%s12282_s18 + $0x240] sm:$0xff] %vm6335_vm5, %v9114_v24  ;;  %9127 = vtanh.f32 %v8378_v52 }
 0x444   : > { %v9116_v0 = vpop.eup %9115  ;;  %v6016_v36 = vpop.f32.mrf.mxu1 }
 0x445   : > { %6411 = vst.msk [vmem:[%s12282_s18 + $0x258] sm:$0xff] %vm6335_vm5, %v9116_v0  ;;  %9129 = vtanh.f32 %v6016_v36 }
 0x446   : > { %v9118_v44 = vpop.eup %9117  ;;  %v8379_v3 = vpop.f32.mrf.mxu1 }
 0x447   : > { %6409 = vst.msk [vmem:[%s12282_s18 + $0x248] sm:$0xff] %vm6335_vm5, %v9118_v44  ;;  %9131 = vtanh.f32 %v8379_v3 }
 0x448   : > { %v9120_v63 = vpop.eup %9119  ;;  %v6019_v61 = vpop.f32.mrf.mxu1 }
 0x449   : > { %6414 = vst.msk [vmem:[%s12282_s18 + $0x270] sm:$0xff] %vm6335_vm5, %v9120_v63  ;;  %9133 = vtanh.f32 %v6019_v61 }
 0x44a   : > { %v9122_v15 = vpop.eup %9121  ;;  %v8382_v23 = vpop.f32.mrf.mxu1 }
 0x44b   : > { %6412 = vst.msk [vmem:[%s12282_s18 + $0x260] sm:$0xff] %vm6335_vm5, %v9122_v15  ;;  %9135 = vtanh.f32 %v8382_v23 }
 0x44c   : > { %v9124_v25 = vpop.eup %9123  ;;  %v6032_v7 = vpop.f32.mrf.mxu1 }
 0x44d   : > { %6415 = vst.msk [vmem:[%s12282_s18 + $0x278] sm:$0xff] %vm6335_vm5, %v9124_v25  ;;  %9137 = vtanh.f32 %v6032_v7 }
 0x44e   : > { %v9126_v43 = vpop.eup %9125  ;;  %v8383_v55 = vpop.f32.mrf.mxu1 }
 0x44f   : > { %6413 = vst.msk [vmem:[%s12282_s18 + $0x268] sm:$0xff] %vm6335_vm5, %v9126_v43  ;;  %9139 = vtanh.f32 %v8383_v55 }
 0x450   : > { %v9128_v32 = vpop.eup %9127  ;;  %v6035_v58 = vpop.f32.mrf.mxu1 }
 0x451   : > { %6418 = vst.msk [vmem:[%s12282_s18 + $0x290] sm:$0xff] %vm6335_vm5, %v9128_v32  ;;  %9141 = vtanh.f32 %v6035_v58 }
 0x452   : > { %v9130_v57 = vpop.eup %9129  ;;  %v8386_v4 = vpop.f32.mrf.mxu1 }
 0x453   : > { %6416 = vst.msk [vmem:[%s12282_s18 + $0x280] sm:$0xff] %vm6335_vm5, %v9130_v57  ;;  %9143 = vtanh.f32 %v8386_v4 }
 0x454   : > { %v9132_v21 = vpop.eup %9131  ;;  %v6048_v49 = vpop.f32.mrf.mxu1 }
 0x455   : > { %6419 = vst.msk [vmem:[%s12282_s18 + $0x298] sm:$0xff] %vm6335_vm5, %v9132_v21  ;;  %9145 = vtanh.f32 %v6048_v49 }
 0x456   : > { %v9134_v29 = vpop.eup %9133  ;;  %v8387_v35 = vpop.f32.mrf.mxu1 }
 0x457   : > { %6417 = vst.msk [vmem:[%s12282_s18 + $0x288] sm:$0xff] %vm6335_vm5, %v9134_v29  ;;  %9147 = vtanh.f32 %v8387_v35 }
 0x458   : > { %v9136_v9 = vpop.eup %9135  ;;  %v6051_v54 = vpop.f32.mrf.mxu1 }
 0x459   : > { %6422 = vst.msk [vmem:[%s12282_s18 + $0x2b0] sm:$0xff] %vm6335_vm5, %v9136_v9  ;;  %9149 = vtanh.f32 %v6051_v54 }
 0x45a   : > { %v9138_v31 = vpop.eup %9137  ;;  %v8390_v39 = vpop.f32.mrf.mxu1 }
 0x45b   : > { %6420 = vst.msk [vmem:[%s12282_s18 + $0x2a0] sm:$0xff] %vm6335_vm5, %v9138_v31  ;;  %9151 = vtanh.f32 %v8390_v39 }
 0x45c   : > { %v9140_v11 = vpop.eup %9139  ;;  %v6064_v6 = vpop.f32.mrf.mxu1 }
 0x45d   : > { %6423 = vst.msk [vmem:[%s12282_s18 + $0x2b8] sm:$0xff] %vm6335_vm5, %v9140_v11  ;;  %9153 = vtanh.f32 %v6064_v6 }
 0x45e   : > { %v9142_v34 = vpop.eup %9141  ;;  %v8391_v26 = vpop.f32.mrf.mxu1 }
 0x45f   : > { %6421 = vst.msk [vmem:[%s12282_s18 + $0x2a8] sm:$0xff] %vm6335_vm5, %v9142_v34  ;;  %9155 = vtanh.f32 %v8391_v26 }
 0x460   : > { %v9144_v27 = vpop.eup %9143  ;;  %v6067_v46 = vpop.f32.mrf.mxu1 }
 0x461   : > { %6426 = vst.msk [vmem:[%s12282_s18 + $0x2d0] sm:$0xff] %vm6335_vm5, %v9144_v27  ;;  %9157 = vtanh.f32 %v6067_v46 }
 0x462   : > { %v9146_v50 = vpop.eup %9145  ;;  %v8394_v41 = vpop.f32.mrf.mxu1 }
 0x463   : > { %6424 = vst.msk [vmem:[%s12282_s18 + $0x2c0] sm:$0xff] %vm6335_vm5, %v9146_v50  ;;  %9159 = vtanh.f32 %v8394_v41 }
 0x464   : > { %v9148_v56 = vpop.eup %9147  ;;  %v6080_v1 = vpop.f32.mrf.mxu1 }
 0x465   : > { %6427 = vst.msk [vmem:[%s12282_s18 + $0x2d8] sm:$0xff] %vm6335_vm5, %v9148_v56  ;;  %9161 = vtanh.f32 %v6080_v1 }
 0x466   : > { %v9150_v19 = vpop.eup %9149  ;;  %v8395_v37 = vpop.f32.mrf.mxu1 }
 0x467   : > { %6425 = vst.msk [vmem:[%s12282_s18 + $0x2c8] sm:$0xff] %vm6335_vm5, %v9150_v19  ;;  %9163 = vtanh.f32 %v8395_v37 }
 0x468   : > { %v9152_v20 = vpop.eup %9151  ;;  %v6083_v13 = vpop.f32.mrf.mxu1 }
 0x469   : > { %6430 = vst.msk [vmem:[%s12282_s18 + $0x2f0] sm:$0xff] %vm6335_vm5, %v9152_v20  ;;  %9165 = vtanh.f32 %v6083_v13 }
 0x46a   : > { %v9154_v62 = vpop.eup %9153  ;;  %v8398_v59 = vpop.f32.mrf.mxu1 }
 0x46b   : > { %6428 = vst.msk [vmem:[%s12282_s18 + $0x2e0] sm:$0xff] %vm6335_vm5, %v9154_v62  ;;  %9167 = vtanh.f32 %v8398_v59 }
 0x46c   : > { %v9156_v22 = vpop.eup %9155  ;;  %v6096_v28 = vpop.f32.mrf.mxu1 }
 0x46d   : > { %6431 = vst.msk [vmem:[%s12282_s18 + $0x2f8] sm:$0xff] %vm6335_vm5, %v9156_v22  ;;  %9169 = vtanh.f32 %v6096_v28 }
 0x46e   : > { %v9158_v48 = vpop.eup %9157  ;;  %v8399_v33 = vpop.f32.mrf.mxu1 }
 0x46f   : > { %6429 = vst.msk [vmem:[%s12282_s18 + $0x2e8] sm:$0xff] %vm6335_vm5, %v9158_v48  ;;  %9171 = vtanh.f32 %v8399_v33 }
 0x470   : > { %v9160_v47 = vpop.eup %9159  ;;  %v6099_v51 = vpop.f32.mrf.mxu1 }
 0x471   : > { %6434 = vst.msk [vmem:[%s12282_s18 + $0x310] sm:$0xff] %vm6335_vm5, %v9160_v47  ;;  %9173 = vtanh.f32 %v6099_v51 }
 0x472   : > { %v9162_v53 = vpop.eup %9161  ;;  %v8402_v30 = vpop.f32.mrf.mxu1 }
 0x473   : > { %6432 = vst.msk [vmem:[%s12282_s18 + $0x300] sm:$0xff] %vm6335_vm5, %v9162_v53  ;;  %9175 = vtanh.f32 %v8402_v30 }
 0x474   : > { %v9164_v14 = vpop.eup %9163  ;;  %v6112_v40 = vpop.f32.mrf.mxu1 }
 0x475   : > { %6435 = vst.msk [vmem:[%s12282_s18 + $0x318] sm:$0xff] %vm6335_vm5, %v9164_v14  ;;  %9177 = vtanh.f32 %v6112_v40 }
 0x476   : > { %v9166_v60 = vpop.eup %9165  ;;  %v8403_v17 = vpop.f32.mrf.mxu1 }
 0x477   : > { %6433 = vst.msk [vmem:[%s12282_s18 + $0x308] sm:$0xff] %vm6335_vm5, %v9166_v60  ;;  %9179 = vtanh.f32 %v8403_v17 }
 0x478   : > { %v9168_v42 = vpop.eup %9167  ;;  %v6115_v38 = vpop.f32.mrf.mxu1 }
 0x479   : > { %6438 = vst.msk [vmem:[%s12282_s18 + $0x330] sm:$0xff] %vm6335_vm5, %v9168_v42  ;;  %9181 = vtanh.f32 %v6115_v38 }
 0x47a   : > { %v9170_v8 = vpop.eup %9169  ;;  %v8406_v16 = vpop.f32.mrf.mxu1 }
 0x47b   : > { %6436 = vst.msk [vmem:[%s12282_s18 + $0x320] sm:$0xff] %vm6335_vm5, %v9170_v8  ;;  %9183 = vtanh.f32 %v8406_v16 }
 0x47c   : > { %v9172_v5 = vpop.eup %9171  ;;  %v6128_v2 = vpop.f32.mrf.mxu1 }
 0x47d   : > { %6439 = vst.msk [vmem:[%s12282_s18 + $0x338] sm:$0xff] %vm6335_vm5, %v9172_v5  ;;  %9185 = vtanh.f32 %v6128_v2 }
 0x47e   : > { %v9174_v10 = vpop.eup %9173  ;;  %v8407_v45 = vpop.f32.mrf.mxu1 }
 0x47f   : > { %6437 = vst.msk [vmem:[%s12282_s18 + $0x328] sm:$0xff] %vm6335_vm5, %v9174_v10  ;;  %9187 = vtanh.f32 %v8407_v45 }
 0x480   : > { %v9176_v12 = vpop.eup %9175  ;;  %v6131_v18 = vpop.f32.mrf.mxu1 }
 0x481   : > { %6442 = vst.msk [vmem:[%s12282_s18 + $0x350] sm:$0xff] %vm6335_vm5, %v9176_v12  ;;  %9189 = vtanh.f32 %v6131_v18 }
 0x482   : > { %v9178_v24 = vpop.eup %9177  ;;  %v8410_v52 = vpop.f32.mrf.mxu1 }
 0x483   : > { %6440 = vst.msk [vmem:[%s12282_s18 + $0x340] sm:$0xff] %vm6335_vm5, %v9178_v24  ;;  %9191 = vtanh.f32 %v8410_v52 }
 0x484   : > { %v9180_v0 = vpop.eup %9179  ;;  %v6144_v36 = vpop.f32.mrf.mxu1 }
 0x485   : > { %6443 = vst.msk [vmem:[%s12282_s18 + $0x358] sm:$0xff] %vm6335_vm5, %v9180_v0  ;;  %9193 = vtanh.f32 %v6144_v36 }
 0x486   : > { %v9182_v44 = vpop.eup %9181  ;;  %v8411_v3 = vpop.f32.mrf.mxu1 }
 0x487   : > { %6441 = vst.msk [vmem:[%s12282_s18 + $0x348] sm:$0xff] %vm6335_vm5, %v9182_v44  ;;  %9195 = vtanh.f32 %v8411_v3 }
 0x488   : > { %v9184_v63 = vpop.eup %9183  ;;  %v6147_v61 = vpop.f32.mrf.mxu1 }
 0x489   : > { %6446 = vst.msk [vmem:[%s12282_s18 + $0x370] sm:$0xff] %vm6335_vm5, %v9184_v63  ;;  %9197 = vtanh.f32 %v6147_v61 }
 0x48a   : > { %v9186_v15 = vpop.eup %9185  ;;  %v8414_v23 = vpop.f32.mrf.mxu1 }
 0x48b   : > { %6444 = vst.msk [vmem:[%s12282_s18 + $0x360] sm:$0xff] %vm6335_vm5, %v9186_v15  ;;  %9199 = vtanh.f32 %v8414_v23 }
 0x48c   : > { %v9188_v25 = vpop.eup %9187  ;;  %v6160_v7 = vpop.f32.mrf.mxu1 }
 0x48d   : > { %6447 = vst.msk [vmem:[%s12282_s18 + $0x378] sm:$0xff] %vm6335_vm5, %v9188_v25  ;;  %9201 = vtanh.f32 %v6160_v7 }
 0x48e   : > { %v9190_v43 = vpop.eup %9189  ;;  %v8415_v55 = vpop.f32.mrf.mxu1 }
 0x48f   : > { %6445 = vst.msk [vmem:[%s12282_s18 + $0x368] sm:$0xff] %vm6335_vm5, %v9190_v43  ;;  %9203 = vtanh.f32 %v8415_v55 }
 0x490   : > { %v9192_v32 = vpop.eup %9191  ;;  %v6163_v58 = vpop.f32.mrf.mxu1 }
 0x491   : > { %6450 = vst.msk [vmem:[%s12282_s18 + $0x390] sm:$0xff] %vm6335_vm5, %v9192_v32  ;;  %9205 = vtanh.f32 %v6163_v58 }
 0x492   : > { %v9194_v57 = vpop.eup %9193  ;;  %v8418_v4 = vpop.f32.mrf.mxu1 }
 0x493   : > { %6448 = vst.msk [vmem:[%s12282_s18 + $0x380] sm:$0xff] %vm6335_vm5, %v9194_v57  ;;  %9207 = vtanh.f32 %v8418_v4 }
 0x494   : > { %v9196_v21 = vpop.eup %9195  ;;  %v6176_v49 = vpop.f32.mrf.mxu1 }
 0x495   : > { %6451 = vst.msk [vmem:[%s12282_s18 + $0x398] sm:$0xff] %vm6335_vm5, %v9196_v21  ;;  %9209 = vtanh.f32 %v6176_v49 }
 0x496   : > { %v9198_v29 = vpop.eup %9197  ;;  %v8419_v35 = vpop.f32.mrf.mxu1 }
 0x497   : > { %6449 = vst.msk [vmem:[%s12282_s18 + $0x388] sm:$0xff] %vm6335_vm5, %v9198_v29  ;;  %9211 = vtanh.f32 %v8419_v35 }
 0x498   : > { %v9200_v9 = vpop.eup %9199  ;;  %v6179_v54 = vpop.f32.mrf.mxu1 }
 0x499   : > { %6454 = vst.msk [vmem:[%s12282_s18 + $0x3b0] sm:$0xff] %vm6335_vm5, %v9200_v9  ;;  %9213 = vtanh.f32 %v6179_v54 }
 0x49a   : > { %v9202_v31 = vpop.eup %9201  ;;  %v8422_v39 = vpop.f32.mrf.mxu1 }
 0x49b   : > { %6452 = vst.msk [vmem:[%s12282_s18 + $0x3a0] sm:$0xff] %vm6335_vm5, %v9202_v31  ;;  %9215 = vtanh.f32 %v8422_v39 }
 0x49c   : > { %v9204_v11 = vpop.eup %9203  ;;  %v6192_v6 = vpop.f32.mrf.mxu1 }
 0x49d   : > { %6455 = vst.msk [vmem:[%s12282_s18 + $0x3b8] sm:$0xff] %vm6335_vm5, %v9204_v11  ;;  %9217 = vtanh.f32 %v6192_v6 }
 0x49e   : > { %v9206_v34 = vpop.eup %9205  ;;  %v8423_v26 = vpop.f32.mrf.mxu1 }
 0x49f   : > { %6453 = vst.msk [vmem:[%s12282_s18 + $0x3a8] sm:$0xff] %vm6335_vm5, %v9206_v34  ;;  %9219 = vtanh.f32 %v8423_v26 }
 0x4a0   : > { %v9208_v27 = vpop.eup %9207  ;;  %v6195_v46 = vpop.f32.mrf.mxu1 }
 0x4a1   : > { %6458 = vst.msk [vmem:[%s12282_s18 + $0x3d0] sm:$0xff] %vm6335_vm5, %v9208_v27  ;;  %9221 = vtanh.f32 %v6195_v46 }
 0x4a2   : > { %v9210_v50 = vpop.eup %9209 }
 0x4a3   : > { %6456 = vst.msk [vmem:[%s12282_s18 + $0x3c0] sm:$0xff] %vm6335_vm5, %v9210_v50 }
 0x4a4   : > { %v9212_v41 = vpop.eup %9211 }
 0x4a5   : > { %6459 = vst.msk [vmem:[%s12282_s18 + $0x3d8] sm:$0xff] %vm6335_vm5, %v9212_v41 }
 0x4a6   : > { %v9214_v56 = vpop.eup %9213 }
 0x4a7   : > { %6457 = vst.msk [vmem:[%s12282_s18 + $0x3c8] sm:$0xff] %vm6335_vm5, %v9214_v56 }
 0x4a8   : > { %v9216_v1 = vpop.eup %9215 }
 0x4a9   : > { %6462 = vst.msk [vmem:[%s12282_s18 + $0x3f0] sm:$0xff] %vm6335_vm5, %v9216_v1 }
 0x4aa   : > { %v9218_v19 = vpop.eup %9217 }
 0x4ab   : > { %6460 = vst.msk [vmem:[%s12282_s18 + $0x3e0] sm:$0xff] %vm6335_vm5, %v9218_v19 }
 0x4ac   : > { %v9220_v37 = vpop.eup %9219 }
 0x4ad   : > { %6463 = vst.msk [vmem:[%s12282_s18 + $0x3f8] sm:$0xff] %vm6335_vm5, %v9220_v37 }
 0x4ae   : > { %v9222_v20 = vpop.eup %9221 }
 0x4af   : > { %6461 = vst.msk [vmem:[%s12282_s18 + $0x3e8] sm:$0xff] %vm6335_vm5, %v9222_v20 }
 0x4b0 PF: > { %s20_s13 = sadd.s32 1, %s9321_s13  }
 0x4b1   : > { %p17_p4 = scmp.ge.s32.totalorder %s20_s13, 4  }
 0x4b3   :  { %19 = sbr.rel (!%p17_p4) target bundleno = 1 (0x1), region = 90 }

</bundles_post_ra>
